<compile_context>
chip_gen: v7x
topology: tpu7x:2x2x1
jax: 0.10.0
libtpu: 0.0.40
codegen_flags: <defaults>
</compile_context>

<pallas_src>
import functools
import math

import jax
import jax.numpy as jnp
from jax.experimental import pallas as pl
from jax.experimental.pallas import tpu as pltpu


# ----------------------------------------------------------------------------
# Fused decoder-block kernel.
# Grid = (batch, q-row tile). K/V are cached in VMEM scratch at t == 0.
# ----------------------------------------------------------------------------
def decoder_block_kernel(
    # activations / masks (full per-batch blocks, resident across q tiles)
    dec_ref, enc_ref, tmask_ref, smask_ref,
    # self-attention weights + norm1
    wq1_ref, bq1_ref, wk1_ref, bk1_ref, wv1_ref, bv1_ref, wo1_ref, bo1_ref,
    g1_ref, be1_ref,
    # encoder-decoder attention weights + norm2
    wq2_ref, bq2_ref, wk2_ref, bk2_ref, wv2_ref, bv2_ref, wo2_ref, bo2_ref,
    g2_ref, be2_ref,
    # FFN weights + norm3
    w1_ref, b1_ref, w2_ref, b2_ref, g3_ref, be3_ref,
    # output
    o_ref,
    # scratch: cached K/V projections (per batch) + per-head ctx assembly
    k1_ref, v1_ref, k2_ref, v2_ref, ctx_ref,
    *, n_heads, eps, mm_dtype):

    f32 = jnp.float32
    q_tile = o_ref.shape[1]
    t = pl.program_id(1)

    def mm(a, b):
        # MXU matmul: bf16 (or f32) operands, fp32 accumulation.
        return jnp.dot(a.astype(mm_dtype), b.astype(mm_dtype),
                       preferred_element_type=f32)

    def layer_norm(x, g_ref, b_ref):
        mean = jnp.mean(x, axis=-1, keepdims=True)
        var = jnp.mean((x - mean) ** 2, axis=-1, keepdims=True)  # biased (torch)
        return (x - mean) * jax.lax.rsqrt(var + eps) * g_ref[...] + b_ref[...]

    # ------------------------------------------------------------------
    # K/V projections for the FULL self/cross sequences: computed once per
    # batch element (first q tile) and cached in VMEM scratch -- no redundant
    # (S,D)@(D,D) matmuls on subsequent query tiles.
    # ------------------------------------------------------------------
    @pl.when(t == 0)
    def _():
        x_self = dec_ref[0].astype(f32)                   # (Sd, D)
        x_enc = enc_ref[0].astype(f32)                    # (Se, D)
        k1_ref[...] = (mm(x_self, wk1_ref[...]) + bk1_ref[...]).astype(k1_ref.dtype)
        v1_ref[...] = (mm(x_self, wv1_ref[...]) + bv1_ref[...]).astype(v1_ref.dtype)
        k2_ref[...] = (mm(x_enc, wk2_ref[...]) + bk2_ref[...]).astype(k2_ref.dtype)
        v2_ref[...] = (mm(x_enc, wv2_ref[...]) + bv2_ref[...]).astype(v2_ref.dtype)

    # Query rows / residual for this tile, sliced from the resident dec block.
    row0 = pl.multiple_of(t * q_tile, q_tile)
    xq = dec_ref[0, pl.ds(row0, q_tile), :].astype(f32)   # (Tq, D)

    # Additive mask bias, built ONCE for all heads from int8 masks
    # (equivalent to masked_fill(mask==0, -10000) whenever each query row has
    #  at least one unmasked key -- true for causal / padding masks).
    tbias = jnp.where(
        tmask_ref[0, pl.ds(row0, q_tile), :].astype(f32) == 0.0, -10000.0, 0.0)
    sbias = jnp.where(
        smask_ref[0, pl.ds(row0, q_tile), :].astype(f32) == 0.0, -10000.0, 0.0)

    def mha(xq_rows, k_cache_ref, v_cache_ref, bias,
            wq_ref, bq_ref, wo_ref, bo_ref):
        d_model = wq_ref.shape[0]
        d_head = d_model // n_heads
        scale = 1.0 / math.sqrt(d_head)

        # Q projection (f32 epilogue), 1/sqrt(d_head) folded in once.
        q = ((mm(xq_rows, wq_ref[...]) + bq_ref[...]) * scale).astype(mm_dtype)
        k = k_cache_ref[...]                              # (Sk, D) cached
        v = v_cache_ref[...]                              # (Sk, D) cached

        # Per-head attention; each head's context is written into its lane
        # slot of a (Tq, D) VMEM scratch so the output projection is a single
        # full-K (Tq,D)@(D,D) matmul (no K=32 accumulated matmuls, no concat).
        for h in range(n_heads):
            sl = slice(h * d_head, (h + 1) * d_head)
            s = jax.lax.dot_general(
                q[:, sl], k[:, sl],
                (((1,), (1,)), ((), ())),
                preferred_element_type=f32) + bias        # (Tq, Sk)
            s = s - jnp.max(s, axis=-1, keepdims=True)
            p = jnp.exp(s)
            p = p * pl.reciprocal(jnp.sum(p, axis=-1, keepdims=True),
                                  approx=True)            # EUP, not VPU divide
            ctx_ref[:, sl] = mm(p, v[:, sl]).astype(ctx_ref.dtype)
        return mm(ctx_ref[...], wo_ref[...]) + bo_ref[...]

    # self-attention -> add & norm (dropout = identity in eval mode)
    a1 = mha(xq, k1_ref, v1_ref, tbias, wq1_ref, bq1_ref, wo1_ref, bo1_ref)
    x1 = layer_norm(a1 + xq, g1_ref, be1_ref)

    # encoder-decoder attention -> add & norm
    a2 = mha(x1, k2_ref, v2_ref, sbias, wq2_ref, bq2_ref, wo2_ref, bo2_ref)
    x2 = layer_norm(a2 + x1, g2_ref, be2_ref)

    # position-wise FFN -> add & norm
    hdn = jnp.maximum(mm(x2, w1_ref[...]) + b1_ref[...], 0.0)
    ffn_out = mm(hdn, w2_ref[...]) + b2_ref[...]
    x3 = layer_norm(ffn_out + x2, g3_ref, be3_ref)

    o_ref[0] = x3.astype(o_ref.dtype)


# ----------------------------------------------------------------------------
# Wrapper
# ----------------------------------------------------------------------------
def _replicated(shape):
    # Same weight block for every grid point; block index never changes so it
    # stays resident in VMEM (single DMA per call).
    return pl.BlockSpec(shape, lambda b, t: (0,) * len(shape))


def decoder_block_forward(dec, enc, trg_mask, src_mask, params, n_heads,
                          *, q_tile=None, eps=1e-12, mm_dtype=jnp.bfloat16):
    B, Sd, D = dec.shape
    Se = enc.shape[1]
    Hf = params["ffn"]["w1"].shape[1]
    assert D % n_heads == 0
    if q_tile is None:
        q_tile = Sd if Sd <= 128 else 128
    assert Sd % q_tile == 0 and (q_tile % 8 == 0 or q_tile == Sd)
    n_qt = Sd // q_tile

    a1p, a2p, fp = params["attn1"], params["attn2"], params["ffn"]
    n1p, n2p, n3p = params["norm1"], params["norm2"], params["norm3"]

    # int8 masks: 4x less DMA / VMEM than f32; bias built in-kernel.
    tmask_i8 = (trg_mask != 0).astype(jnp.int8)
    smask_i8 = (src_mask != 0).astype(jnp.int8)

    def w(x):  # weight matrices in bf16 (ideally stored bf16 by the caller)
        return x.astype(mm_dtype)

    act_specs = [
        pl.BlockSpec((1, Sd, D),  lambda b, t: (b, 0, 0)),  # dec (q rows + self K/V src)
        pl.BlockSpec((1, Se, D),  lambda b, t: (b, 0, 0)),  # enc (cross K/V src)
        pl.BlockSpec((1, Sd, Sd), lambda b, t: (b, 0, 0)),  # trg mask (int8)
        pl.BlockSpec((1, Sd, Se), lambda b, t: (b, 0, 0)),  # src mask (int8)
    ]
    w_specs = []
    w_specs += [_replicated((D, D)), _replicated((1, D))] * 4   # attn1 wq..wo
    w_specs += [_replicated((1, D)), _replicated((1, D))]       # norm1
    w_specs += [_replicated((D, D)), _replicated((1, D))] * 4   # attn2 wq..wo
    w_specs += [_replicated((1, D)), _replicated((1, D))]       # norm2
    w_specs += [_replicated((D, Hf)), _replicated((1, Hf)),
                _replicated((Hf, D)), _replicated((1, D))]      # ffn
    w_specs += [_replicated((1, D)), _replicated((1, D))]       # norm3

    kernel = functools.partial(decoder_block_kernel, n_heads=n_heads, eps=eps,
                               mm_dtype=mm_dtype)

    return pl.pallas_call(
        kernel,
        out_shape=jax.ShapeDtypeStruct((B, Sd, D), dec.dtype),
        grid=(B, n_qt),
        in_specs=act_specs + w_specs,
        out_specs=pl.BlockSpec((1, q_tile, D), lambda b, t: (b, t, 0)),
        scratch_shapes=[
            pltpu.VMEM((Sd, D), mm_dtype),      # cached self-attn K
            pltpu.VMEM((Sd, D), mm_dtype),      # cached self-attn V
            pltpu.VMEM((Se, D), mm_dtype),      # cached cross-attn K
            pltpu.VMEM((Se, D), mm_dtype),      # cached cross-attn V
            pltpu.VMEM((q_tile, D), mm_dtype),  # per-head ctx assembly
        ],
        # q-tile axis must be "arbitrary": scratch K/V computed at t==0 is
        # reused by later tiles of the same batch element. Batch is "parallel"
        # so v7x's 2 TensorCores split work along it.
        compiler_params=pltpu.CompilerParams(
            dimension_semantics=("parallel", "arbitrary")),
    )(dec, enc, tmask_i8, smask_i8,
      w(a1p["wq"]), a1p["bq"], w(a1p["wk"]), a1p["bk"],
      w(a1p["wv"]), a1p["bv"], w(a1p["wo"]), a1p["bo"],
      n1p["gamma"], n1p["beta"],
      w(a2p["wq"]), a2p["bq"], w(a2p["wk"]), a2p["bk"],
      w(a2p["wv"]), a2p["bv"], w(a2p["wo"]), a2p["bo"],
      n2p["gamma"], n2p["beta"],
      w(fp["w1"]), fp["b1"], w(fp["w2"]), fp["b2"],
      n3p["gamma"], n3p["beta"])


# ----------------------------------------------------------------------------
# Pure-JAX f32 reference (same math as the PyTorch module in eval mode)
# ----------------------------------------------------------------------------
def decoder_block_reference(dec, enc, trg_mask, src_mask, params, n_heads,
                            eps=1e-12):
    def ln(x, p):
        mean = x.mean(-1, keepdims=True)
        var = ((x - mean) ** 2).mean(-1, keepdims=True)
        return (x - mean) / jnp.sqrt(var + eps) * p["gamma"] + p["beta"]

    def mha(xq, xkv, mask, p):
        B, Tq, D = xq.shape
        Sk = xkv.shape[1]
        dh = D // n_heads
        q = (xq @ p["wq"] + p["bq"]).reshape(B, Tq, n_heads, dh).transpose(0, 2, 1, 3)
        k = (xkv @ p["wk"] + p["bk"]).reshape(B, Sk, n_heads, dh).transpose(0, 2, 1, 3)
        v = (xkv @ p["wv"] + p["bv"]).reshape(B, Sk, n_heads, dh).transpose(0, 2, 1, 3)
        s = jnp.einsum("bhqd,bhkd->bhqk", q, k) / math.sqrt(dh)
        s = jnp.where(mask[:, None, :, :] == 0, -10000.0, s)
        a = jax.nn.softmax(s, axis=-1)
        ctx = jnp.einsum("bhqk,bhkd->bhqd", a, v)
        ctx = ctx.transpose(0, 2, 1, 3).reshape(B, Tq, D)
        return ctx @ p["wo"] + p["bo"]

    x1 = ln(mha(dec, dec, trg_mask, params["attn1"]) + dec, params["norm1"])
    x2 = ln(mha(x1, enc, src_mask, params["attn2"]) + x1, params["norm2"])
    h = jax.nn.relu(x2 @ params["ffn"]["w1"] + params["ffn"]["b1"])
    f = h @ params["ffn"]["w2"] + params["ffn"]["b2"]
    return ln(f + x2, params["norm3"])


# ----------------------------------------------------------------------------
# Deterministic parameter init (weights stored [in_features, out_features])
# ----------------------------------------------------------------------------
def init_params(key, d_model, ffn_hidden):
    keys = jax.random.split(key, 16)
    it = iter(keys)

    def lin(kin, kout):
        k = next(it)
        w = jax.random.normal(k, (kin, kout), jnp.float32) * (1.0 / math.sqrt(kin))
        b = jnp.zeros((1, kout), jnp.float32)
        return w, b

    def attn_params():
        wq, bq = lin(d_model, d_model)
        wk, bk = lin(d_model, d_model)
        wv, bv = lin(d_model, d_model)
        wo, bo = lin(d_model, d_model)
        return dict(wq=wq, bq=bq, wk=wk, bk=bk, wv=wv, bv=bv, wo=wo, bo=bo)

    def norm_params():
        return dict(gamma=jnp.ones((1, d_model), jnp.float32),
                    beta=jnp.zeros((1, d_model), jnp.float32))

    w1, b1 = lin(d_model, ffn_hidden)
    w2, b2 = lin(ffn_hidden, d_model)
    return dict(
        attn1=attn_params(), norm1=norm_params(),
        attn2=attn_params(), norm2=norm_params(),
        ffn=dict(w1=w1, b1=b1, w2=w2, b2=b2), norm3=norm_params(),
    )


# ----------------------------------------------------------------------------
if __name__ == "__main__":
    # Small but lane-dense shapes: d_model = 128 (one full lane width),
    # seq multiple of 8. Default q_tile == Sd (no artificially small tiles).
    B, S_dec, S_enc = 2, 16, 16
    d_model, ffn_hidden, n_heads = 128, 256, 4
    # dropout p=0.1 in the module, but eval-mode dropout is identity.

    key = jax.random.PRNGKey(0)
    k_dec, k_enc, k_params = jax.random.split(key, 3)

    dec = jax.random.normal(k_dec, (B, S_dec, d_model), jnp.float32)
    enc = jax.random.normal(k_enc, (B, S_enc, d_model), jnp.float32)

    # trg_mask: causal; src_mask: all valid. Built directly as int8 (1 = keep).
    trg_mask = jnp.broadcast_to(
        jnp.tril(jnp.ones((S_dec, S_dec), jnp.int8)), (B, S_dec, S_dec))
    src_mask = jnp.ones((B, S_dec, S_enc), jnp.int8)

    params = init_params(k_params, d_model, ffn_hidden)

    out = decoder_block_forward(dec, enc, trg_mask, src_mask, params, n_heads)
    out = jax.block_until_ready(out)
    assert out.shape == (B, S_dec, d_model)
    assert bool(jnp.all(jnp.isfinite(out)))

    # Parity vs. pure-JAX f32 reference (bf16 MXU + approx reciprocal -> loose tol).
    ref = decoder_block_reference(dec, enc, trg_mask, src_mask, params, n_heads)
    err = float(jnp.max(jnp.abs(out - ref)))
    assert err < 0.1, f"max abs err vs reference too large: {err}"

    # Multi-q-tile path (K/V cached across tiles) must agree with single-tile path.
    out_tiled = decoder_block_forward(dec, enc, trg_mask, src_mask, params,
                                      n_heads, q_tile=8)
    out_tiled = jax.block_until_ready(out_tiled)
    tile_err = float(jnp.max(jnp.abs(out_tiled - out)))
    assert tile_err < 1e-3, f"q-tile consistency error: {tile_err}"

    print("KERNEL_OK")
</pallas_src>

<mosaic_0001>
module attributes {stable_mosaic.version = 11 : i64} {
  func.func @decoder_block_kernel(%arg0: i32, %arg1: i32, %arg2: memref<1x16x128xf32, #tpu.memory_space<vmem>>, %arg3: memref<1x16x128xf32, #tpu.memory_space<vmem>>, %arg4: memref<1x16x16xi8, #tpu.memory_space<vmem>>, %arg5: memref<1x16x16xi8, #tpu.memory_space<vmem>>, %arg6: memref<128x128xbf16, #tpu.memory_space<vmem>>, %arg7: memref<1x128xf32, #tpu.memory_space<vmem>>, %arg8: memref<128x128xbf16, #tpu.memory_space<vmem>>, %arg9: memref<1x128xf32, #tpu.memory_space<vmem>>, %arg10: memref<128x128xbf16, #tpu.memory_space<vmem>>, %arg11: memref<1x128xf32, #tpu.memory_space<vmem>>, %arg12: memref<128x128xbf16, #tpu.memory_space<vmem>>, %arg13: memref<1x128xf32, #tpu.memory_space<vmem>>, %arg14: memref<1x128xf32, #tpu.memory_space<vmem>>, %arg15: memref<1x128xf32, #tpu.memory_space<vmem>>, %arg16: memref<128x128xbf16, #tpu.memory_space<vmem>>, %arg17: memref<1x128xf32, #tpu.memory_space<vmem>>, %arg18: memref<128x128xbf16, #tpu.memory_space<vmem>>, %arg19: memref<1x128xf32, #tpu.memory_space<vmem>>, %arg20: memref<128x128xbf16, #tpu.memory_space<vmem>>, %arg21: memref<1x128xf32, #tpu.memory_space<vmem>>, %arg22: memref<128x128xbf16, #tpu.memory_space<vmem>>, %arg23: memref<1x128xf32, #tpu.memory_space<vmem>>, %arg24: memref<1x128xf32, #tpu.memory_space<vmem>>, %arg25: memref<1x128xf32, #tpu.memory_space<vmem>>, %arg26: memref<128x256xbf16, #tpu.memory_space<vmem>>, %arg27: memref<1x256xf32, #tpu.memory_space<vmem>>, %arg28: memref<256x128xbf16, #tpu.memory_space<vmem>>, %arg29: memref<1x128xf32, #tpu.memory_space<vmem>>, %arg30: memref<1x128xf32, #tpu.memory_space<vmem>>, %arg31: memref<1x128xf32, #tpu.memory_space<vmem>>, %arg32: memref<1x16x128xf32, #tpu.memory_space<vmem>>, %arg33: memref<16x128xbf16, #tpu.memory_space<vmem>>, %arg34: memref<16x128xbf16, #tpu.memory_space<vmem>>, %arg35: memref<16x128xbf16, #tpu.memory_space<vmem>>, %arg36: memref<16x128xbf16, #tpu.memory_space<vmem>>, %arg37: memref<16x128xbf16, #tpu.memory_space<vmem>>) attributes {dimension_semantics = [#tpu.dimension_semantics<parallel>, #tpu.dimension_semantics<arbitrary>], iteration_bounds = array<i64: 2, 1>, scalar_prefetch = 0 : i64, scratch_operands = 5 : i64, tpu.core_type = #tpu.core_type<tc>, window_params = [{transform_indices = @transform_0, window_bounds = array<i64: 1, 16, 128>}, {transform_indices = @transform_1, window_bounds = array<i64: 1, 16, 128>}, {transform_indices = @transform_2, window_bounds = array<i64: 1, 16, 16>}, {transform_indices = @transform_3, window_bounds = array<i64: 1, 16, 16>}, {pipeline_mode = #tpu.pipeline_mode<synchronous>, transform_indices = @transform_4, window_bounds = array<i64: 128, 128>}, {pipeline_mode = #tpu.pipeline_mode<synchronous>, transform_indices = @transform_5, window_bounds = array<i64: 1, 128>}, {pipeline_mode = #tpu.pipeline_mode<synchronous>, transform_indices = @transform_6, window_bounds = array<i64: 128, 128>}, {pipeline_mode = #tpu.pipeline_mode<synchronous>, transform_indices = @transform_7, window_bounds = array<i64: 1, 128>}, {pipeline_mode = #tpu.pipeline_mode<synchronous>, transform_indices = @transform_8, window_bounds = array<i64: 128, 128>}, {pipeline_mode = #tpu.pipeline_mode<synchronous>, transform_indices = @transform_9, window_bounds = array<i64: 1, 128>}, {pipeline_mode = #tpu.pipeline_mode<synchronous>, transform_indices = @transform_10, window_bounds = array<i64: 128, 128>}, {pipeline_mode = #tpu.pipeline_mode<synchronous>, transform_indices = @transform_11, window_bounds = array<i64: 1, 128>}, {pipeline_mode = #tpu.pipeline_mode<synchronous>, transform_indices = @transform_12, window_bounds = array<i64: 1, 128>}, {pipeline_mode = #tpu.pipeline_mode<synchronous>, transform_indices = @transform_13, window_bounds = array<i64: 1, 128>}, {pipeline_mode = #tpu.pipeline_mode<synchronous>, transform_indices = @transform_14, window_bounds = array<i64: 128, 128>}, {pipeline_mode = #tpu.pipeline_mode<synchronous>, transform_indices = @transform_15, window_bounds = array<i64: 1, 128>}, {pipeline_mode = #tpu.pipeline_mode<synchronous>, transform_indices = @transform_16, window_bounds = array<i64: 128, 128>}, {pipeline_mode = #tpu.pipeline_mode<synchronous>, transform_indices = @transform_17, window_bounds = array<i64: 1, 128>}, {pipeline_mode = #tpu.pipeline_mode<synchronous>, transform_indices = @transform_18, window_bounds = array<i64: 128, 128>}, {pipeline_mode = #tpu.pipeline_mode<synchronous>, transform_indices = @transform_19, window_bounds = array<i64: 1, 128>}, {pipeline_mode = #tpu.pipeline_mode<synchronous>, transform_indices = @transform_20, window_bounds = array<i64: 128, 128>}, {pipeline_mode = #tpu.pipeline_mode<synchronous>, transform_indices = @transform_21, window_bounds = array<i64: 1, 128>}, {pipeline_mode = #tpu.pipeline_mode<synchronous>, transform_indices = @transform_22, window_bounds = array<i64: 1, 128>}, {pipeline_mode = #tpu.pipeline_mode<synchronous>, transform_indices = @transform_23, window_bounds = array<i64: 1, 128>}, {pipeline_mode = #tpu.pipeline_mode<synchronous>, transform_indices = @transform_24, window_bounds = array<i64: 128, 256>}, {pipeline_mode = #tpu.pipeline_mode<synchronous>, transform_indices = @transform_25, window_bounds = array<i64: 1, 256>}, {pipeline_mode = #tpu.pipeline_mode<synchronous>, transform_indices = @transform_26, window_bounds = array<i64: 256, 128>}, {pipeline_mode = #tpu.pipeline_mode<synchronous>, transform_indices = @transform_27, window_bounds = array<i64: 1, 128>}, {pipeline_mode = #tpu.pipeline_mode<synchronous>, transform_indices = @transform_28, window_bounds = array<i64: 1, 128>}, {pipeline_mode = #tpu.pipeline_mode<synchronous>, transform_indices = @transform_29, window_bounds = array<i64: 1, 128>}, {transform_indices = @transform_30, window_bounds = array<i64: 1, 16, 128>}]} {
    %c0_i32 = arith.constant 0 : i32
    %0 = arith.cmpi eq, %arg1, %c0_i32 : i32
    %1 = arith.extui %0 : i1 to i32
    %c0_i32_0 = arith.constant 0 : i32
    %2 = arith.cmpi ne, %1, %c0_i32_0 : i32
    scf.if %2 {
      %c0_131 = arith.constant 0 : index
      %c0_132 = arith.constant 0 : index
      %c0_133 = arith.constant 0 : index
      %304 = vector.load %arg2[%c0_131, %c0_132, %c0_133] : memref<1x16x128xf32, #tpu.memory_space<vmem>>, vector<1x16x128xf32>
      %305 = vector.shape_cast %304 : vector<1x16x128xf32> to vector<16x128xf32>
      %c0_134 = arith.constant 0 : index
      %c0_135 = arith.constant 0 : index
      %c0_136 = arith.constant 0 : index
      %306 = vector.load %arg3[%c0_134, %c0_135, %c0_136] : memref<1x16x128xf32, #tpu.memory_space<vmem>>, vector<1x16x128xf32>
      %307 = vector.shape_cast %306 : vector<1x16x128xf32> to vector<16x128xf32>
      %c0_137 = arith.constant 0 : index
      %c0_138 = arith.constant 0 : index
      %308 = vector.load %arg8[%c0_137, %c0_138] : memref<128x128xbf16, #tpu.memory_space<vmem>>, vector<128x128xbf16>
      %309 = arith.truncf %305 : vector<16x128xf32> to vector<16x128xbf16>
      %cst_139 = arith.constant dense<0.000000e+00> : vector<16x128xf32>
      %310 = tpu.matmul %309, %308, %cst_139 {dimension_numbers = #tpu.dot_dimension_numbers<[1], [0], [0], [1], [0, 0, 1, 1], [], []>} : vector<16x128xbf16>, vector<128x128xbf16>, vector<16x128xf32> -> vector<16x128xf32>
      %c0_140 = arith.constant 0 : index
      %c0_141 = arith.constant 0 : index
      %311 = vector.load %arg9[%c0_140, %c0_141] : memref<1x128xf32, #tpu.memory_space<vmem>>, vector<1x128xf32>
      %312 = vector.broadcast %311 : vector<1x128xf32> to vector<16x128xf32>
      %313 = arith.addf %310, %312 : vector<16x128xf32>
      %314 = arith.truncf %313 : vector<16x128xf32> to vector<16x128xbf16>
      %c0_142 = arith.constant 0 : index
      %c0_143 = arith.constant 0 : index
      %315 = vector.load %arg33[%c0_142, %c0_143] : memref<16x128xbf16, #tpu.memory_space<vmem>>, vector<16x128xbf16>
      tpu.vector_store %arg33[%c0_142, %c0_143], %314 {strides = array<i32>} : memref<16x128xbf16, #tpu.memory_space<vmem>>, vector<16x128xbf16>,
      %c0_144 = arith.constant 0 : index
      %c0_145 = arith.constant 0 : index
      %316 = vector.load %arg10[%c0_144, %c0_145] : memref<128x128xbf16, #tpu.memory_space<vmem>>, vector<128x128xbf16>
      %317 = arith.truncf %305 : vector<16x128xf32> to vector<16x128xbf16>
      %cst_146 = arith.constant dense<0.000000e+00> : vector<16x128xf32>
      %318 = tpu.matmul %317, %316, %cst_146 {dimension_numbers = #tpu.dot_dimension_numbers<[1], [0], [0], [1], [0, 0, 1, 1], [], []>} : vector<16x128xbf16>, vector<128x128xbf16>, vector<16x128xf32> -> vector<16x128xf32>
      %c0_147 = arith.constant 0 : index
      %c0_148 = arith.constant 0 : index
      %319 = vector.load %arg11[%c0_147, %c0_148] : memref<1x128xf32, #tpu.memory_space<vmem>>, vector<1x128xf32>
      %320 = vector.broadcast %319 : vector<1x128xf32> to vector<16x128xf32>
      %321 = arith.addf %318, %320 : vector<16x128xf32>
      %322 = arith.truncf %321 : vector<16x128xf32> to vector<16x128xbf16>
      %c0_149 = arith.constant 0 : index
      %c0_150 = arith.constant 0 : index
      %323 = vector.load %arg34[%c0_149, %c0_150] : memref<16x128xbf16, #tpu.memory_space<vmem>>, vector<16x128xbf16>
      tpu.vector_store %arg34[%c0_149, %c0_150], %322 {strides = array<i32>} : memref<16x128xbf16, #tpu.memory_space<vmem>>, vector<16x128xbf16>,
      %c0_151 = arith.constant 0 : index
      %c0_152 = arith.constant 0 : index
      %324 = vector.load %arg18[%c0_151, %c0_152] : memref<128x128xbf16, #tpu.memory_space<vmem>>, vector<128x128xbf16>
      %325 = arith.truncf %307 : vector<16x128xf32> to vector<16x128xbf16>
      %cst_153 = arith.constant dense<0.000000e+00> : vector<16x128xf32>
      %326 = tpu.matmul %325, %324, %cst_153 {dimension_numbers = #tpu.dot_dimension_numbers<[1], [0], [0], [1], [0, 0, 1, 1], [], []>} : vector<16x128xbf16>, vector<128x128xbf16>, vector<16x128xf32> -> vector<16x128xf32>
      %c0_154 = arith.constant 0 : index
      %c0_155 = arith.constant 0 : index
      %327 = vector.load %arg19[%c0_154, %c0_155] : memref<1x128xf32, #tpu.memory_space<vmem>>, vector<1x128xf32>
      %328 = vector.broadcast %327 : vector<1x128xf32> to vector<16x128xf32>
      %329 = arith.addf %326, %328 : vector<16x128xf32>
      %330 = arith.truncf %329 : vector<16x128xf32> to vector<16x128xbf16>
      %c0_156 = arith.constant 0 : index
      %c0_157 = arith.constant 0 : index
      %331 = vector.load %arg35[%c0_156, %c0_157] : memref<16x128xbf16, #tpu.memory_space<vmem>>, vector<16x128xbf16>
      tpu.vector_store %arg35[%c0_156, %c0_157], %330 {strides = array<i32>} : memref<16x128xbf16, #tpu.memory_space<vmem>>, vector<16x128xbf16>,
      %c0_158 = arith.constant 0 : index
      %c0_159 = arith.constant 0 : index
      %332 = vector.load %arg20[%c0_158, %c0_159] : memref<128x128xbf16, #tpu.memory_space<vmem>>, vector<128x128xbf16>
      %333 = arith.truncf %307 : vector<16x128xf32> to vector<16x128xbf16>
      %cst_160 = arith.constant dense<0.000000e+00> : vector<16x128xf32>
      %334 = tpu.matmul %333, %332, %cst_160 {dimension_numbers = #tpu.dot_dimension_numbers<[1], [0], [0], [1], [0, 0, 1, 1], [], []>} : vector<16x128xbf16>, vector<128x128xbf16>, vector<16x128xf32> -> vector<16x128xf32>
      %c0_161 = arith.constant 0 : index
      %c0_162 = arith.constant 0 : index
      %335 = vector.load %arg21[%c0_161, %c0_162] : memref<1x128xf32, #tpu.memory_space<vmem>>, vector<1x128xf32>
      %336 = vector.broadcast %335 : vector<1x128xf32> to vector<16x128xf32>
      %337 = arith.addf %334, %336 : vector<16x128xf32>
      %338 = arith.truncf %337 : vector<16x128xf32> to vector<16x128xbf16>
      %c0_163 = arith.constant 0 : index
      %c0_164 = arith.constant 0 : index
      %339 = vector.load %arg36[%c0_163, %c0_164] : memref<16x128xbf16, #tpu.memory_space<vmem>>, vector<16x128xbf16>
      tpu.vector_store %arg36[%c0_163, %c0_164], %338 {strides = array<i32>} : memref<16x128xbf16, #tpu.memory_space<vmem>>, vector<16x128xbf16>,
    } else {
    }
    %c16_i32 = arith.constant 16 : i32
    %3 = arith.muli %arg1, %c16_i32 : i32
    %4 = tpu.assume_multiple %3, 16 : i32
    %c0 = arith.constant 0 : index
    %5 = arith.index_cast %4 : i32 to index
    %c0_1 = arith.constant 0 : index
    %6 = vector.load %arg2[%c0, %5, %c0_1] : memref<1x16x128xf32, #tpu.memory_space<vmem>>, vector<1x16x128xf32>
    %7 = vector.shape_cast %6 : vector<1x16x128xf32> to vector<16x128xf32>
    %c0_2 = arith.constant 0 : index
    %8 = arith.index_cast %4 : i32 to index
    %c0_3 = arith.constant 0 : index
    %9 = vector.load %arg4[%c0_2, %8, %c0_3] : memref<1x16x16xi8, #tpu.memory_space<vmem>>, vector<1x16x16xi8>
    %10 = vector.shape_cast %9 : vector<1x16x16xi8> to vector<16x16xi8>
    %11 = arith.sitofp %10 : vector<16x16xi8> to vector<16x16xf32>
    %cst = arith.constant 0.000000e+00 : f32
    %12 = vector.broadcast %cst : f32 to vector<16x16xf32>
    %13 = arith.cmpf oeq, %11, %12 : vector<16x16xf32>
    %cst_4 = arith.constant -1.000000e+04 : f32
    %cst_5 = arith.constant 0.000000e+00 : f32
    %14 = vector.broadcast %cst_4 : f32 to vector<16x16xf32>
    %15 = vector.broadcast %cst_5 : f32 to vector<16x16xf32>
    %16 = arith.select %13, %14, %15 : vector<16x16xi1>, vector<16x16xf32>
    %c0_6 = arith.constant 0 : index
    %17 = arith.index_cast %4 : i32 to index
    %c0_7 = arith.constant 0 : index
    %18 = vector.load %arg5[%c0_6, %17, %c0_7] : memref<1x16x16xi8, #tpu.memory_space<vmem>>, vector<1x16x16xi8>
    %19 = vector.shape_cast %18 : vector<1x16x16xi8> to vector<16x16xi8>
    %20 = arith.sitofp %19 : vector<16x16xi8> to vector<16x16xf32>
    %cst_8 = arith.constant 0.000000e+00 : f32
    %21 = vector.broadcast %cst_8 : f32 to vector<16x16xf32>
    %22 = arith.cmpf oeq, %20, %21 : vector<16x16xf32>
    %cst_9 = arith.constant -1.000000e+04 : f32
    %cst_10 = arith.constant 0.000000e+00 : f32
    %23 = vector.broadcast %cst_9 : f32 to vector<16x16xf32>
    %24 = vector.broadcast %cst_10 : f32 to vector<16x16xf32>
    %25 = arith.select %22, %23, %24 : vector<16x16xi1>, vector<16x16xf32>
    %c0_11 = arith.constant 0 : index
    %c0_12 = arith.constant 0 : index
    %26 = vector.load %arg6[%c0_11, %c0_12] : memref<128x128xbf16, #tpu.memory_space<vmem>>, vector<128x128xbf16>
    %27 = arith.truncf %7 : vector<16x128xf32> to vector<16x128xbf16>
    %cst_13 = arith.constant dense<0.000000e+00> : vector<16x128xf32>
    %28 = tpu.matmul %27, %26, %cst_13 {dimension_numbers = #tpu.dot_dimension_numbers<[1], [0], [0], [1], [0, 0, 1, 1], [], []>} : vector<16x128xbf16>, vector<128x128xbf16>, vector<16x128xf32> -> vector<16x128xf32>
    %c0_14 = arith.constant 0 : index
    %c0_15 = arith.constant 0 : index
    %29 = vector.load %arg7[%c0_14, %c0_15] : memref<1x128xf32, #tpu.memory_space<vmem>>, vector<1x128xf32>
    %30 = vector.broadcast %29 : vector<1x128xf32> to vector<16x128xf32>
    %31 = arith.addf %28, %30 : vector<16x128xf32>
    %cst_16 = arith.constant 0.176776692 : f32
    %32 = vector.broadcast %cst_16 : f32 to vector<16x128xf32>
    %33 = arith.mulf %31, %32 : vector<16x128xf32>
    %34 = arith.truncf %33 : vector<16x128xf32> to vector<16x128xbf16>
    %c0_17 = arith.constant 0 : index
    %c0_18 = arith.constant 0 : index
    %35 = vector.load %arg33[%c0_17, %c0_18] : memref<16x128xbf16, #tpu.memory_space<vmem>>, vector<16x128xbf16>
    %c0_19 = arith.constant 0 : index
    %c0_20 = arith.constant 0 : index
    %36 = vector.load %arg34[%c0_19, %c0_20] : memref<16x128xbf16, #tpu.memory_space<vmem>>, vector<16x128xbf16>
    %37 = vector.extract_strided_slice %34 {offsets = [0, 0], sizes = [16, 32], strides = [1, 1]} : vector<16x128xbf16> to vector<16x32xbf16>
    %38 = vector.extract_strided_slice %35 {offsets = [0, 0], sizes = [16, 32], strides = [1, 1]} : vector<16x128xbf16> to vector<16x32xbf16>
    %cst_21 = arith.constant dense<0.000000e+00> : vector<16x16xf32>
    %39 = tpu.matmul %37, %38, %cst_21 {dimension_numbers = #tpu.dot_dimension_numbers<[1], [1], [0], [0], [0, 0, 1, 0], [], []>} : vector<16x32xbf16>, vector<16x32xbf16>, vector<16x16xf32> -> vector<16x16xf32>
    %40 = arith.addf %39, %16 : vector<16x16xf32>
    %cst_22 = arith.constant dense<0xFF800000> : vector<16xf32>
    %41 = vector.multi_reduction <maximumf>, %40, %cst_22 [1] : vector<16x16xf32> to vector<16xf32>
    %42 = vector.shape_cast %41 : vector<16xf32> to vector<16x1xf32>
    %43 = vector.broadcast %42 : vector<16x1xf32> to vector<16x16xf32>
    %44 = arith.subf %40, %43 : vector<16x16xf32>
    %45 = math.exp %44 : vector<16x16xf32>
    %cst_23 = arith.constant dense<0.000000e+00> : vector<16xf32>
    %46 = vector.multi_reduction <add>, %45, %cst_23 [1] : vector<16x16xf32> to vector<16xf32>
    %47 = vector.shape_cast %46 : vector<16xf32> to vector<16x1xf32>
    %48 = tpu.reciprocal %47 {approx = true} : vector<16x1xf32> -> vector<16x1xf32>
    %49 = vector.broadcast %48 : vector<16x1xf32> to vector<16x16xf32>
    %50 = arith.mulf %45, %49 : vector<16x16xf32>
    %51 = vector.extract_strided_slice %36 {offsets = [0, 0], sizes = [16, 32], strides = [1, 1]} : vector<16x128xbf16> to vector<16x32xbf16>
    %52 = arith.truncf %50 : vector<16x16xf32> to vector<16x16xbf16>
    %cst_24 = arith.constant dense<0.000000e+00> : vector<16x32xf32>
    %53 = tpu.matmul %52, %51, %cst_24 {dimension_numbers = #tpu.dot_dimension_numbers<[1], [0], [0], [1], [0, 0, 1, 1], [], []>} : vector<16x16xbf16>, vector<16x32xbf16>, vector<16x32xf32> -> vector<16x32xf32>
    %54 = arith.truncf %53 : vector<16x32xf32> to vector<16x32xbf16>
    %c0_25 = arith.constant 0 : index
    %c0_26 = arith.constant 0 : index
    %55 = vector.load %arg37[%c0_25, %c0_26] : memref<16x128xbf16, #tpu.memory_space<vmem>>, vector<16x32xbf16>
    tpu.vector_store %arg37[%c0_25, %c0_26], %54 {strides = array<i32>} : memref<16x128xbf16, #tpu.memory_space<vmem>>, vector<16x32xbf16>,
    %56 = vector.extract_strided_slice %34 {offsets = [0, 32], sizes = [16, 32], strides = [1, 1]} : vector<16x128xbf16> to vector<16x32xbf16>
    %57 = vector.extract_strided_slice %35 {offsets = [0, 32], sizes = [16, 32], strides = [1, 1]} : vector<16x128xbf16> to vector<16x32xbf16>
    %cst_27 = arith.constant dense<0.000000e+00> : vector<16x16xf32>
    %58 = tpu.matmul %56, %57, %cst_27 {dimension_numbers = #tpu.dot_dimension_numbers<[1], [1], [0], [0], [0, 0, 1, 0], [], []>} : vector<16x32xbf16>, vector<16x32xbf16>, vector<16x16xf32> -> vector<16x16xf32>
    %59 = arith.addf %58, %16 : vector<16x16xf32>
    %cst_28 = arith.constant dense<0xFF800000> : vector<16xf32>
    %60 = vector.multi_reduction <maximumf>, %59, %cst_28 [1] : vector<16x16xf32> to vector<16xf32>
    %61 = vector.shape_cast %60 : vector<16xf32> to vector<16x1xf32>
    %62 = vector.broadcast %61 : vector<16x1xf32> to vector<16x16xf32>
    %63 = arith.subf %59, %62 : vector<16x16xf32>
    %64 = math.exp %63 : vector<16x16xf32>
    %cst_29 = arith.constant dense<0.000000e+00> : vector<16xf32>
    %65 = vector.multi_reduction <add>, %64, %cst_29 [1] : vector<16x16xf32> to vector<16xf32>
    %66 = vector.shape_cast %65 : vector<16xf32> to vector<16x1xf32>
    %67 = tpu.reciprocal %66 {approx = true} : vector<16x1xf32> -> vector<16x1xf32>
    %68 = vector.broadcast %67 : vector<16x1xf32> to vector<16x16xf32>
    %69 = arith.mulf %64, %68 : vector<16x16xf32>
    %70 = vector.extract_strided_slice %36 {offsets = [0, 32], sizes = [16, 32], strides = [1, 1]} : vector<16x128xbf16> to vector<16x32xbf16>
    %71 = arith.truncf %69 : vector<16x16xf32> to vector<16x16xbf16>
    %cst_30 = arith.constant dense<0.000000e+00> : vector<16x32xf32>
    %72 = tpu.matmul %71, %70, %cst_30 {dimension_numbers = #tpu.dot_dimension_numbers<[1], [0], [0], [1], [0, 0, 1, 1], [], []>} : vector<16x16xbf16>, vector<16x32xbf16>, vector<16x32xf32> -> vector<16x32xf32>
    %73 = arith.truncf %72 : vector<16x32xf32> to vector<16x32xbf16>
    %c0_31 = arith.constant 0 : index
    %c32 = arith.constant 32 : index
    %74 = vector.load %arg37[%c0_31, %c32] : memref<16x128xbf16, #tpu.memory_space<vmem>>, vector<16x32xbf16>
    tpu.vector_store %arg37[%c0_31, %c32], %73 {strides = array<i32>} : memref<16x128xbf16, #tpu.memory_space<vmem>>, vector<16x32xbf16>,
    %75 = vector.extract_strided_slice %34 {offsets = [0, 64], sizes = [16, 32], strides = [1, 1]} : vector<16x128xbf16> to vector<16x32xbf16>
    %76 = vector.extract_strided_slice %35 {offsets = [0, 64], sizes = [16, 32], strides = [1, 1]} : vector<16x128xbf16> to vector<16x32xbf16>
    %cst_32 = arith.constant dense<0.000000e+00> : vector<16x16xf32>
    %77 = tpu.matmul %75, %76, %cst_32 {dimension_numbers = #tpu.dot_dimension_numbers<[1], [1], [0], [0], [0, 0, 1, 0], [], []>} : vector<16x32xbf16>, vector<16x32xbf16>, vector<16x16xf32> -> vector<16x16xf32>
    %78 = arith.addf %77, %16 : vector<16x16xf32>
    %cst_33 = arith.constant dense<0xFF800000> : vector<16xf32>
    %79 = vector.multi_reduction <maximumf>, %78, %cst_33 [1] : vector<16x16xf32> to vector<16xf32>
    %80 = vector.shape_cast %79 : vector<16xf32> to vector<16x1xf32>
    %81 = vector.broadcast %80 : vector<16x1xf32> to vector<16x16xf32>
    %82 = arith.subf %78, %81 : vector<16x16xf32>
    %83 = math.exp %82 : vector<16x16xf32>
    %cst_34 = arith.constant dense<0.000000e+00> : vector<16xf32>
    %84 = vector.multi_reduction <add>, %83, %cst_34 [1] : vector<16x16xf32> to vector<16xf32>
    %85 = vector.shape_cast %84 : vector<16xf32> to vector<16x1xf32>
    %86 = tpu.reciprocal %85 {approx = true} : vector<16x1xf32> -> vector<16x1xf32>
    %87 = vector.broadcast %86 : vector<16x1xf32> to vector<16x16xf32>
    %88 = arith.mulf %83, %87 : vector<16x16xf32>
    %89 = vector.extract_strided_slice %36 {offsets = [0, 64], sizes = [16, 32], strides = [1, 1]} : vector<16x128xbf16> to vector<16x32xbf16>
    %90 = arith.truncf %88 : vector<16x16xf32> to vector<16x16xbf16>
    %cst_35 = arith.constant dense<0.000000e+00> : vector<16x32xf32>
    %91 = tpu.matmul %90, %89, %cst_35 {dimension_numbers = #tpu.dot_dimension_numbers<[1], [0], [0], [1], [0, 0, 1, 1], [], []>} : vector<16x16xbf16>, vector<16x32xbf16>, vector<16x32xf32> -> vector<16x32xf32>
    %92 = arith.truncf %91 : vector<16x32xf32> to vector<16x32xbf16>
    %c0_36 = arith.constant 0 : index
    %c64 = arith.constant 64 : index
    %93 = vector.load %arg37[%c0_36, %c64] : memref<16x128xbf16, #tpu.memory_space<vmem>>, vector<16x32xbf16>
    tpu.vector_store %arg37[%c0_36, %c64], %92 {strides = array<i32>} : memref<16x128xbf16, #tpu.memory_space<vmem>>, vector<16x32xbf16>,
    %94 = vector.extract_strided_slice %34 {offsets = [0, 96], sizes = [16, 32], strides = [1, 1]} : vector<16x128xbf16> to vector<16x32xbf16>
    %95 = vector.extract_strided_slice %35 {offsets = [0, 96], sizes = [16, 32], strides = [1, 1]} : vector<16x128xbf16> to vector<16x32xbf16>
    %cst_37 = arith.constant dense<0.000000e+00> : vector<16x16xf32>
    %96 = tpu.matmul %94, %95, %cst_37 {dimension_numbers = #tpu.dot_dimension_numbers<[1], [1], [0], [0], [0, 0, 1, 0], [], []>} : vector<16x32xbf16>, vector<16x32xbf16>, vector<16x16xf32> -> vector<16x16xf32>
    %97 = arith.addf %96, %16 : vector<16x16xf32>
    %cst_38 = arith.constant dense<0xFF800000> : vector<16xf32>
    %98 = vector.multi_reduction <maximumf>, %97, %cst_38 [1] : vector<16x16xf32> to vector<16xf32>
    %99 = vector.shape_cast %98 : vector<16xf32> to vector<16x1xf32>
    %100 = vector.broadcast %99 : vector<16x1xf32> to vector<16x16xf32>
    %101 = arith.subf %97, %100 : vector<16x16xf32>
    %102 = math.exp %101 : vector<16x16xf32>
    %cst_39 = arith.constant dense<0.000000e+00> : vector<16xf32>
    %103 = vector.multi_reduction <add>, %102, %cst_39 [1] : vector<16x16xf32> to vector<16xf32>
    %104 = vector.shape_cast %103 : vector<16xf32> to vector<16x1xf32>
    %105 = tpu.reciprocal %104 {approx = true} : vector<16x1xf32> -> vector<16x1xf32>
    %106 = vector.broadcast %105 : vector<16x1xf32> to vector<16x16xf32>
    %107 = arith.mulf %102, %106 : vector<16x16xf32>
    %108 = vector.extract_strided_slice %36 {offsets = [0, 96], sizes = [16, 32], strides = [1, 1]} : vector<16x128xbf16> to vector<16x32xbf16>
    %109 = arith.truncf %107 : vector<16x16xf32> to vector<16x16xbf16>
    %cst_40 = arith.constant dense<0.000000e+00> : vector<16x32xf32>
    %110 = tpu.matmul %109, %108, %cst_40 {dimension_numbers = #tpu.dot_dimension_numbers<[1], [0], [0], [1], [0, 0, 1, 1], [], []>} : vector<16x16xbf16>, vector<16x32xbf16>, vector<16x32xf32> -> vector<16x32xf32>
    %111 = arith.truncf %110 : vector<16x32xf32> to vector<16x32xbf16>
    %c0_41 = arith.constant 0 : index
    %c96 = arith.constant 96 : index
    %112 = vector.load %arg37[%c0_41, %c96] : memref<16x128xbf16, #tpu.memory_space<vmem>>, vector<16x32xbf16>
    tpu.vector_store %arg37[%c0_41, %c96], %111 {strides = array<i32>} : memref<16x128xbf16, #tpu.memory_space<vmem>>, vector<16x32xbf16>,
    %c0_42 = arith.constant 0 : index
    %c0_43 = arith.constant 0 : index
    %113 = vector.load %arg37[%c0_42, %c0_43] : memref<16x128xbf16, #tpu.memory_space<vmem>>, vector<16x128xbf16>
    %c0_44 = arith.constant 0 : index
    %c0_45 = arith.constant 0 : index
    %114 = vector.load %arg12[%c0_44, %c0_45] : memref<128x128xbf16, #tpu.memory_space<vmem>>, vector<128x128xbf16>
    %cst_46 = arith.constant dense<0.000000e+00> : vector<16x128xf32>
    %115 = tpu.matmul %113, %114, %cst_46 {dimension_numbers = #tpu.dot_dimension_numbers<[1], [0], [0], [1], [0, 0, 1, 1], [], []>} : vector<16x128xbf16>, vector<128x128xbf16>, vector<16x128xf32> -> vector<16x128xf32>
    %c0_47 = arith.constant 0 : index
    %c0_48 = arith.constant 0 : index
    %116 = vector.load %arg13[%c0_47, %c0_48] : memref<1x128xf32, #tpu.memory_space<vmem>>, vector<1x128xf32>
    %117 = vector.broadcast %116 : vector<1x128xf32> to vector<16x128xf32>
    %118 = arith.addf %115, %117 : vector<16x128xf32>
    %119 = arith.addf %118, %7 : vector<16x128xf32>
    %cst_49 = arith.constant dense<0.000000e+00> : vector<16xf32>
    %120 = vector.multi_reduction <add>, %119, %cst_49 [1] : vector<16x128xf32> to vector<16xf32>
    %121 = vector.shape_cast %120 : vector<16xf32> to vector<16x1xf32>
    %cst_50 = arith.constant 1.280000e+02 : f32
    %122 = vector.broadcast %cst_50 : f32 to vector<16x1xf32>
    %123 = arith.divf %121, %122 : vector<16x1xf32>
    %124 = vector.broadcast %123 : vector<16x1xf32> to vector<16x128xf32>
    %125 = arith.subf %119, %124 : vector<16x128xf32>
    %126 = arith.mulf %125, %125 : vector<16x128xf32>
    %cst_51 = arith.constant dense<0.000000e+00> : vector<16xf32>
    %127 = vector.multi_reduction <add>, %126, %cst_51 [1] : vector<16x128xf32> to vector<16xf32>
    %128 = vector.shape_cast %127 : vector<16xf32> to vector<16x1xf32>
    %cst_52 = arith.constant 1.280000e+02 : f32
    %129 = vector.broadcast %cst_52 : f32 to vector<16x1xf32>
    %130 = arith.divf %128, %129 : vector<16x1xf32>
    %131 = vector.broadcast %123 : vector<16x1xf32> to vector<16x128xf32>
    %132 = arith.subf %119, %131 : vector<16x128xf32>
    %cst_53 = arith.constant 9.99999996E-13 : f32
    %133 = vector.broadcast %cst_53 : f32 to vector<16x1xf32>
    %134 = arith.addf %130, %133 : vector<16x1xf32>
    %135 = math.rsqrt %134 : vector<16x1xf32>
    %136 = vector.broadcast %135 : vector<16x1xf32> to vector<16x128xf32>
    %137 = arith.mulf %132, %136 : vector<16x128xf32>
    %c0_54 = arith.constant 0 : index
    %c0_55 = arith.constant 0 : index
    %138 = vector.load %arg14[%c0_54, %c0_55] : memref<1x128xf32, #tpu.memory_space<vmem>>, vector<1x128xf32>
    %139 = vector.broadcast %138 : vector<1x128xf32> to vector<16x128xf32>
    %140 = arith.mulf %137, %139 : vector<16x128xf32>
    %c0_56 = arith.constant 0 : index
    %c0_57 = arith.constant 0 : index
    %141 = vector.load %arg15[%c0_56, %c0_57] : memref<1x128xf32, #tpu.memory_space<vmem>>, vector<1x128xf32>
    %142 = vector.broadcast %141 : vector<1x128xf32> to vector<16x128xf32>
    %143 = arith.addf %140, %142 : vector<16x128xf32>
    %c0_58 = arith.constant 0 : index
    %c0_59 = arith.constant 0 : index
    %144 = vector.load %arg16[%c0_58, %c0_59] : memref<128x128xbf16, #tpu.memory_space<vmem>>, vector<128x128xbf16>
    %145 = arith.truncf %143 : vector<16x128xf32> to vector<16x128xbf16>
    %cst_60 = arith.constant dense<0.000000e+00> : vector<16x128xf32>
    %146 = tpu.matmul %145, %144, %cst_60 {dimension_numbers = #tpu.dot_dimension_numbers<[1], [0], [0], [1], [0, 0, 1, 1], [], []>} : vector<16x128xbf16>, vector<128x128xbf16>, vector<16x128xf32> -> vector<16x128xf32>
    %c0_61 = arith.constant 0 : index
    %c0_62 = arith.constant 0 : index
    %147 = vector.load %arg17[%c0_61, %c0_62] : memref<1x128xf32, #tpu.memory_space<vmem>>, vector<1x128xf32>
    %148 = vector.broadcast %147 : vector<1x128xf32> to vector<16x128xf32>
    %149 = arith.addf %146, %148 : vector<16x128xf32>
    %cst_63 = arith.constant 0.176776692 : f32
    %150 = vector.broadcast %cst_63 : f32 to vector<16x128xf32>
    %151 = arith.mulf %149, %150 : vector<16x128xf32>
    %152 = arith.truncf %151 : vector<16x128xf32> to vector<16x128xbf16>
    %c0_64 = arith.constant 0 : index
    %c0_65 = arith.constant 0 : index
    %153 = vector.load %arg35[%c0_64, %c0_65] : memref<16x128xbf16, #tpu.memory_space<vmem>>, vector<16x128xbf16>
    %c0_66 = arith.constant 0 : index
    %c0_67 = arith.constant 0 : index
    %154 = vector.load %arg36[%c0_66, %c0_67] : memref<16x128xbf16, #tpu.memory_space<vmem>>, vector<16x128xbf16>
    %155 = vector.extract_strided_slice %152 {offsets = [0, 0], sizes = [16, 32], strides = [1, 1]} : vector<16x128xbf16> to vector<16x32xbf16>
    %156 = vector.extract_strided_slice %153 {offsets = [0, 0], sizes = [16, 32], strides = [1, 1]} : vector<16x128xbf16> to vector<16x32xbf16>
    %cst_68 = arith.constant dense<0.000000e+00> : vector<16x16xf32>
    %157 = tpu.matmul %155, %156, %cst_68 {dimension_numbers = #tpu.dot_dimension_numbers<[1], [1], [0], [0], [0, 0, 1, 0], [], []>} : vector<16x32xbf16>, vector<16x32xbf16>, vector<16x16xf32> -> vector<16x16xf32>
    %158 = arith.addf %157, %25 : vector<16x16xf32>
    %cst_69 = arith.constant dense<0xFF800000> : vector<16xf32>
    %159 = vector.multi_reduction <maximumf>, %158, %cst_69 [1] : vector<16x16xf32> to vector<16xf32>
    %160 = vector.shape_cast %159 : vector<16xf32> to vector<16x1xf32>
    %161 = vector.broadcast %160 : vector<16x1xf32> to vector<16x16xf32>
    %162 = arith.subf %158, %161 : vector<16x16xf32>
    %163 = math.exp %162 : vector<16x16xf32>
    %cst_70 = arith.constant dense<0.000000e+00> : vector<16xf32>
    %164 = vector.multi_reduction <add>, %163, %cst_70 [1] : vector<16x16xf32> to vector<16xf32>
    %165 = vector.shape_cast %164 : vector<16xf32> to vector<16x1xf32>
    %166 = tpu.reciprocal %165 {approx = true} : vector<16x1xf32> -> vector<16x1xf32>
    %167 = vector.broadcast %166 : vector<16x1xf32> to vector<16x16xf32>
    %168 = arith.mulf %163, %167 : vector<16x16xf32>
    %169 = vector.extract_strided_slice %154 {offsets = [0, 0], sizes = [16, 32], strides = [1, 1]} : vector<16x128xbf16> to vector<16x32xbf16>
    %170 = arith.truncf %168 : vector<16x16xf32> to vector<16x16xbf16>
    %cst_71 = arith.constant dense<0.000000e+00> : vector<16x32xf32>
    %171 = tpu.matmul %170, %169, %cst_71 {dimension_numbers = #tpu.dot_dimension_numbers<[1], [0], [0], [1], [0, 0, 1, 1], [], []>} : vector<16x16xbf16>, vector<16x32xbf16>, vector<16x32xf32> -> vector<16x32xf32>
    %172 = arith.truncf %171 : vector<16x32xf32> to vector<16x32xbf16>
    %c0_72 = arith.constant 0 : index
    %c0_73 = arith.constant 0 : index
    %173 = vector.load %arg37[%c0_72, %c0_73] : memref<16x128xbf16, #tpu.memory_space<vmem>>, vector<16x32xbf16>
    tpu.vector_store %arg37[%c0_72, %c0_73], %172 {strides = array<i32>} : memref<16x128xbf16, #tpu.memory_space<vmem>>, vector<16x32xbf16>,
    %174 = vector.extract_strided_slice %152 {offsets = [0, 32], sizes = [16, 32], strides = [1, 1]} : vector<16x128xbf16> to vector<16x32xbf16>
    %175 = vector.extract_strided_slice %153 {offsets = [0, 32], sizes = [16, 32], strides = [1, 1]} : vector<16x128xbf16> to vector<16x32xbf16>
    %cst_74 = arith.constant dense<0.000000e+00> : vector<16x16xf32>
    %176 = tpu.matmul %174, %175, %cst_74 {dimension_numbers = #tpu.dot_dimension_numbers<[1], [1], [0], [0], [0, 0, 1, 0], [], []>} : vector<16x32xbf16>, vector<16x32xbf16>, vector<16x16xf32> -> vector<16x16xf32>
    %177 = arith.addf %176, %25 : vector<16x16xf32>
    %cst_75 = arith.constant dense<0xFF800000> : vector<16xf32>
    %178 = vector.multi_reduction <maximumf>, %177, %cst_75 [1] : vector<16x16xf32> to vector<16xf32>
    %179 = vector.shape_cast %178 : vector<16xf32> to vector<16x1xf32>
    %180 = vector.broadcast %179 : vector<16x1xf32> to vector<16x16xf32>
    %181 = arith.subf %177, %180 : vector<16x16xf32>
    %182 = math.exp %181 : vector<16x16xf32>
    %cst_76 = arith.constant dense<0.000000e+00> : vector<16xf32>
    %183 = vector.multi_reduction <add>, %182, %cst_76 [1] : vector<16x16xf32> to vector<16xf32>
    %184 = vector.shape_cast %183 : vector<16xf32> to vector<16x1xf32>
    %185 = tpu.reciprocal %184 {approx = true} : vector<16x1xf32> -> vector<16x1xf32>
    %186 = vector.broadcast %185 : vector<16x1xf32> to vector<16x16xf32>
    %187 = arith.mulf %182, %186 : vector<16x16xf32>
    %188 = vector.extract_strided_slice %154 {offsets = [0, 32], sizes = [16, 32], strides = [1, 1]} : vector<16x128xbf16> to vector<16x32xbf16>
    %189 = arith.truncf %187 : vector<16x16xf32> to vector<16x16xbf16>
    %cst_77 = arith.constant dense<0.000000e+00> : vector<16x32xf32>
    %190 = tpu.matmul %189, %188, %cst_77 {dimension_numbers = #tpu.dot_dimension_numbers<[1], [0], [0], [1], [0, 0, 1, 1], [], []>} : vector<16x16xbf16>, vector<16x32xbf16>, vector<16x32xf32> -> vector<16x32xf32>
    %191 = arith.truncf %190 : vector<16x32xf32> to vector<16x32xbf16>
    %c0_78 = arith.constant 0 : index
    %c32_79 = arith.constant 32 : index
    %192 = vector.load %arg37[%c0_78, %c32_79] : memref<16x128xbf16, #tpu.memory_space<vmem>>, vector<16x32xbf16>
    tpu.vector_store %arg37[%c0_78, %c32_79], %191 {strides = array<i32>} : memref<16x128xbf16, #tpu.memory_space<vmem>>, vector<16x32xbf16>,
    %193 = vector.extract_strided_slice %152 {offsets = [0, 64], sizes = [16, 32], strides = [1, 1]} : vector<16x128xbf16> to vector<16x32xbf16>
    %194 = vector.extract_strided_slice %153 {offsets = [0, 64], sizes = [16, 32], strides = [1, 1]} : vector<16x128xbf16> to vector<16x32xbf16>
    %cst_80 = arith.constant dense<0.000000e+00> : vector<16x16xf32>
    %195 = tpu.matmul %193, %194, %cst_80 {dimension_numbers = #tpu.dot_dimension_numbers<[1], [1], [0], [0], [0, 0, 1, 0], [], []>} : vector<16x32xbf16>, vector<16x32xbf16>, vector<16x16xf32> -> vector<16x16xf32>
    %196 = arith.addf %195, %25 : vector<16x16xf32>
    %cst_81 = arith.constant dense<0xFF800000> : vector<16xf32>
    %197 = vector.multi_reduction <maximumf>, %196, %cst_81 [1] : vector<16x16xf32> to vector<16xf32>
    %198 = vector.shape_cast %197 : vector<16xf32> to vector<16x1xf32>
    %199 = vector.broadcast %198 : vector<16x1xf32> to vector<16x16xf32>
    %200 = arith.subf %196, %199 : vector<16x16xf32>
    %201 = math.exp %200 : vector<16x16xf32>
    %cst_82 = arith.constant dense<0.000000e+00> : vector<16xf32>
    %202 = vector.multi_reduction <add>, %201, %cst_82 [1] : vector<16x16xf32> to vector<16xf32>
    %203 = vector.shape_cast %202 : vector<16xf32> to vector<16x1xf32>
    %204 = tpu.reciprocal %203 {approx = true} : vector<16x1xf32> -> vector<16x1xf32>
    %205 = vector.broadcast %204 : vector<16x1xf32> to vector<16x16xf32>
    %206 = arith.mulf %201, %205 : vector<16x16xf32>
    %207 = vector.extract_strided_slice %154 {offsets = [0, 64], sizes = [16, 32], strides = [1, 1]} : vector<16x128xbf16> to vector<16x32xbf16>
    %208 = arith.truncf %206 : vector<16x16xf32> to vector<16x16xbf16>
    %cst_83 = arith.constant dense<0.000000e+00> : vector<16x32xf32>
    %209 = tpu.matmul %208, %207, %cst_83 {dimension_numbers = #tpu.dot_dimension_numbers<[1], [0], [0], [1], [0, 0, 1, 1], [], []>} : vector<16x16xbf16>, vector<16x32xbf16>, vector<16x32xf32> -> vector<16x32xf32>
    %210 = arith.truncf %209 : vector<16x32xf32> to vector<16x32xbf16>
    %c0_84 = arith.constant 0 : index
    %c64_85 = arith.constant 64 : index
    %211 = vector.load %arg37[%c0_84, %c64_85] : memref<16x128xbf16, #tpu.memory_space<vmem>>, vector<16x32xbf16>
    tpu.vector_store %arg37[%c0_84, %c64_85], %210 {strides = array<i32>} : memref<16x128xbf16, #tpu.memory_space<vmem>>, vector<16x32xbf16>,
    %212 = vector.extract_strided_slice %152 {offsets = [0, 96], sizes = [16, 32], strides = [1, 1]} : vector<16x128xbf16> to vector<16x32xbf16>
    %213 = vector.extract_strided_slice %153 {offsets = [0, 96], sizes = [16, 32], strides = [1, 1]} : vector<16x128xbf16> to vector<16x32xbf16>
    %cst_86 = arith.constant dense<0.000000e+00> : vector<16x16xf32>
    %214 = tpu.matmul %212, %213, %cst_86 {dimension_numbers = #tpu.dot_dimension_numbers<[1], [1], [0], [0], [0, 0, 1, 0], [], []>} : vector<16x32xbf16>, vector<16x32xbf16>, vector<16x16xf32> -> vector<16x16xf32>
    %215 = arith.addf %214, %25 : vector<16x16xf32>
    %cst_87 = arith.constant dense<0xFF800000> : vector<16xf32>
    %216 = vector.multi_reduction <maximumf>, %215, %cst_87 [1] : vector<16x16xf32> to vector<16xf32>
    %217 = vector.shape_cast %216 : vector<16xf32> to vector<16x1xf32>
    %218 = vector.broadcast %217 : vector<16x1xf32> to vector<16x16xf32>
    %219 = arith.subf %215, %218 : vector<16x16xf32>
    %220 = math.exp %219 : vector<16x16xf32>
    %cst_88 = arith.constant dense<0.000000e+00> : vector<16xf32>
    %221 = vector.multi_reduction <add>, %220, %cst_88 [1] : vector<16x16xf32> to vector<16xf32>
    %222 = vector.shape_cast %221 : vector<16xf32> to vector<16x1xf32>
    %223 = tpu.reciprocal %222 {approx = true} : vector<16x1xf32> -> vector<16x1xf32>
    %224 = vector.broadcast %223 : vector<16x1xf32> to vector<16x16xf32>
    %225 = arith.mulf %220, %224 : vector<16x16xf32>
    %226 = vector.extract_strided_slice %154 {offsets = [0, 96], sizes = [16, 32], strides = [1, 1]} : vector<16x128xbf16> to vector<16x32xbf16>
    %227 = arith.truncf %225 : vector<16x16xf32> to vector<16x16xbf16>
    %cst_89 = arith.constant dense<0.000000e+00> : vector<16x32xf32>
    %228 = tpu.matmul %227, %226, %cst_89 {dimension_numbers = #tpu.dot_dimension_numbers<[1], [0], [0], [1], [0, 0, 1, 1], [], []>} : vector<16x16xbf16>, vector<16x32xbf16>, vector<16x32xf32> -> vector<16x32xf32>
    %229 = arith.truncf %228 : vector<16x32xf32> to vector<16x32xbf16>
    %c0_90 = arith.constant 0 : index
    %c96_91 = arith.constant 96 : index
    %230 = vector.load %arg37[%c0_90, %c96_91] : memref<16x128xbf16, #tpu.memory_space<vmem>>, vector<16x32xbf16>
    tpu.vector_store %arg37[%c0_90, %c96_91], %229 {strides = array<i32>} : memref<16x128xbf16, #tpu.memory_space<vmem>>, vector<16x32xbf16>,
    %c0_92 = arith.constant 0 : index
    %c0_93 = arith.constant 0 : index
    %231 = vector.load %arg37[%c0_92, %c0_93] : memref<16x128xbf16, #tpu.memory_space<vmem>>, vector<16x128xbf16>
    %c0_94 = arith.constant 0 : index
    %c0_95 = arith.constant 0 : index
    %232 = vector.load %arg22[%c0_94, %c0_95] : memref<128x128xbf16, #tpu.memory_space<vmem>>, vector<128x128xbf16>
    %cst_96 = arith.constant dense<0.000000e+00> : vector<16x128xf32>
    %233 = tpu.matmul %231, %232, %cst_96 {dimension_numbers = #tpu.dot_dimension_numbers<[1], [0], [0], [1], [0, 0, 1, 1], [], []>} : vector<16x128xbf16>, vector<128x128xbf16>, vector<16x128xf32> -> vector<16x128xf32>
    %c0_97 = arith.constant 0 : index
    %c0_98 = arith.constant 0 : index
    %234 = vector.load %arg23[%c0_97, %c0_98] : memref<1x128xf32, #tpu.memory_space<vmem>>, vector<1x128xf32>
    %235 = vector.broadcast %234 : vector<1x128xf32> to vector<16x128xf32>
    %236 = arith.addf %233, %235 : vector<16x128xf32>
    %237 = arith.addf %236, %143 : vector<16x128xf32>
    %cst_99 = arith.constant dense<0.000000e+00> : vector<16xf32>
    %238 = vector.multi_reduction <add>, %237, %cst_99 [1] : vector<16x128xf32> to vector<16xf32>
    %239 = vector.shape_cast %238 : vector<16xf32> to vector<16x1xf32>
    %cst_100 = arith.constant 1.280000e+02 : f32
    %240 = vector.broadcast %cst_100 : f32 to vector<16x1xf32>
    %241 = arith.divf %239, %240 : vector<16x1xf32>
    %242 = vector.broadcast %241 : vector<16x1xf32> to vector<16x128xf32>
    %243 = arith.subf %237, %242 : vector<16x128xf32>
    %244 = arith.mulf %243, %243 : vector<16x128xf32>
    %cst_101 = arith.constant dense<0.000000e+00> : vector<16xf32>
    %245 = vector.multi_reduction <add>, %244, %cst_101 [1] : vector<16x128xf32> to vector<16xf32>
    %246 = vector.shape_cast %245 : vector<16xf32> to vector<16x1xf32>
    %cst_102 = arith.constant 1.280000e+02 : f32
    %247 = vector.broadcast %cst_102 : f32 to vector<16x1xf32>
    %248 = arith.divf %246, %247 : vector<16x1xf32>
    %249 = vector.broadcast %241 : vector<16x1xf32> to vector<16x128xf32>
    %250 = arith.subf %237, %249 : vector<16x128xf32>
    %cst_103 = arith.constant 9.99999996E-13 : f32
    %251 = vector.broadcast %cst_103 : f32 to vector<16x1xf32>
    %252 = arith.addf %248, %251 : vector<16x1xf32>
    %253 = math.rsqrt %252 : vector<16x1xf32>
    %254 = vector.broadcast %253 : vector<16x1xf32> to vector<16x128xf32>
    %255 = arith.mulf %250, %254 : vector<16x128xf32>
    %c0_104 = arith.constant 0 : index
    %c0_105 = arith.constant 0 : index
    %256 = vector.load %arg24[%c0_104, %c0_105] : memref<1x128xf32, #tpu.memory_space<vmem>>, vector<1x128xf32>
    %257 = vector.broadcast %256 : vector<1x128xf32> to vector<16x128xf32>
    %258 = arith.mulf %255, %257 : vector<16x128xf32>
    %c0_106 = arith.constant 0 : index
    %c0_107 = arith.constant 0 : index
    %259 = vector.load %arg25[%c0_106, %c0_107] : memref<1x128xf32, #tpu.memory_space<vmem>>, vector<1x128xf32>
    %260 = vector.broadcast %259 : vector<1x128xf32> to vector<16x128xf32>
    %261 = arith.addf %258, %260 : vector<16x128xf32>
    %c0_108 = arith.constant 0 : index
    %c0_109 = arith.constant 0 : index
    %262 = vector.load %arg26[%c0_108, %c0_109] : memref<128x256xbf16, #tpu.memory_space<vmem>>, vector<128x256xbf16>
    %263 = arith.truncf %261 : vector<16x128xf32> to vector<16x128xbf16>
    %cst_110 = arith.constant dense<0.000000e+00> : vector<16x256xf32>
    %264 = tpu.matmul %263, %262, %cst_110 {dimension_numbers = #tpu.dot_dimension_numbers<[1], [0], [0], [1], [0, 0, 1, 1], [], []>} : vector<16x128xbf16>, vector<128x256xbf16>, vector<16x256xf32> -> vector<16x256xf32>
    %c0_111 = arith.constant 0 : index
    %c0_112 = arith.constant 0 : index
    %265 = vector.load %arg27[%c0_111, %c0_112] : memref<1x256xf32, #tpu.memory_space<vmem>>, vector<1x256xf32>
    %266 = vector.broadcast %265 : vector<1x256xf32> to vector<16x256xf32>
    %267 = arith.addf %264, %266 : vector<16x256xf32>
    %cst_113 = arith.constant 0.000000e+00 : f32
    %268 = vector.broadcast %cst_113 : f32 to vector<16x256xf32>
    %269 = arith.maximumf %267, %268 : vector<16x256xf32>
    %c0_114 = arith.constant 0 : index
    %c0_115 = arith.constant 0 : index
    %270 = vector.load %arg28[%c0_114, %c0_115] : memref<256x128xbf16, #tpu.memory_space<vmem>>, vector<256x128xbf16>
    %271 = arith.truncf %269 : vector<16x256xf32> to vector<16x256xbf16>
    %cst_116 = arith.constant dense<0.000000e+00> : vector<16x128xf32>
    %272 = tpu.matmul %271, %270, %cst_116 {dimension_numbers = #tpu.dot_dimension_numbers<[1], [0], [0], [1], [0, 0, 1, 1], [], []>} : vector<16x256xbf16>, vector<256x128xbf16>, vector<16x128xf32> -> vector<16x128xf32>
    %c0_117 = arith.constant 0 : index
    %c0_118 = arith.constant 0 : index
    %273 = vector.load %arg29[%c0_117, %c0_118] : memref<1x128xf32, #tpu.memory_space<vmem>>, vector<1x128xf32>
    %274 = vector.broadcast %273 : vector<1x128xf32> to vector<16x128xf32>
    %275 = arith.addf %272, %274 : vector<16x128xf32>
    %276 = arith.addf %275, %261 : vector<16x128xf32>
    %cst_119 = arith.constant dense<0.000000e+00> : vector<16xf32>
    %277 = vector.multi_reduction <add>, %276, %cst_119 [1] : vector<16x128xf32> to vector<16xf32>
    %278 = vector.shape_cast %277 : vector<16xf32> to vector<16x1xf32>
    %cst_120 = arith.constant 1.280000e+02 : f32
    %279 = vector.broadcast %cst_120 : f32 to vector<16x1xf32>
    %280 = arith.divf %278, %279 : vector<16x1xf32>
    %281 = vector.broadcast %280 : vector<16x1xf32> to vector<16x128xf32>
    %282 = arith.subf %276, %281 : vector<16x128xf32>
    %283 = arith.mulf %282, %282 : vector<16x128xf32>
    %cst_121 = arith.constant dense<0.000000e+00> : vector<16xf32>
    %284 = vector.multi_reduction <add>, %283, %cst_121 [1] : vector<16x128xf32> to vector<16xf32>
    %285 = vector.shape_cast %284 : vector<16xf32> to vector<16x1xf32>
    %cst_122 = arith.constant 1.280000e+02 : f32
    %286 = vector.broadcast %cst_122 : f32 to vector<16x1xf32>
    %287 = arith.divf %285, %286 : vector<16x1xf32>
    %288 = vector.broadcast %280 : vector<16x1xf32> to vector<16x128xf32>
    %289 = arith.subf %276, %288 : vector<16x128xf32>
    %cst_123 = arith.constant 9.99999996E-13 : f32
    %290 = vector.broadcast %cst_123 : f32 to vector<16x1xf32>
    %291 = arith.addf %287, %290 : vector<16x1xf32>
    %292 = math.rsqrt %291 : vector<16x1xf32>
    %293 = vector.broadcast %292 : vector<16x1xf32> to vector<16x128xf32>
    %294 = arith.mulf %289, %293 : vector<16x128xf32>
    %c0_124 = arith.constant 0 : index
    %c0_125 = arith.constant 0 : index
    %295 = vector.load %arg30[%c0_124, %c0_125] : memref<1x128xf32, #tpu.memory_space<vmem>>, vector<1x128xf32>
    %296 = vector.broadcast %295 : vector<1x128xf32> to vector<16x128xf32>
    %297 = arith.mulf %294, %296 : vector<16x128xf32>
    %c0_126 = arith.constant 0 : index
    %c0_127 = arith.constant 0 : index
    %298 = vector.load %arg31[%c0_126, %c0_127] : memref<1x128xf32, #tpu.memory_space<vmem>>, vector<1x128xf32>
    %299 = vector.broadcast %298 : vector<1x128xf32> to vector<16x128xf32>
    %300 = arith.addf %297, %299 : vector<16x128xf32>
    %c0_128 = arith.constant 0 : index
    %c0_129 = arith.constant 0 : index
    %c0_130 = arith.constant 0 : index
    %301 = vector.load %arg32[%c0_128, %c0_129, %c0_130] : memref<1x16x128xf32, #tpu.memory_space<vmem>>, vector<1x16x128xf32>
    %302 = vector.shape_cast %301 : vector<1x16x128xf32> to vector<16x128xf32>
    %303 = vector.shape_cast %300 : vector<16x128xf32> to vector<1x16x128xf32>
    tpu.vector_store %arg32[%c0_128, %c0_129, %c0_130], %303 {strides = array<i32>} : memref<1x16x128xf32, #tpu.memory_space<vmem>>, vector<1x16x128xf32>,
    return
  }
  func.func @transform_0(%arg0: i32, %arg1: i32) -> (i32, i32, i32) {
    %c0_i32 = arith.constant 0 : i32
    %c0_i32_0 = arith.constant 0 : i32
    %c0_i32_1 = arith.constant 0 : i32
    return %arg0, %c0_i32, %c0_i32_0 : i32, i32, i32
  }
  func.func @transform_1(%arg0: i32, %arg1: i32) -> (i32, i32, i32) {
    %c0_i32 = arith.constant 0 : i32
    %c0_i32_0 = arith.constant 0 : i32
    %c0_i32_1 = arith.constant 0 : i32
    return %arg0, %c0_i32, %c0_i32_0 : i32, i32, i32
  }
  func.func @transform_2(%arg0: i32, %arg1: i32) -> (i32, i32, i32) {
    %c0_i32 = arith.constant 0 : i32
    %c0_i32_0 = arith.constant 0 : i32
    %c0_i32_1 = arith.constant 0 : i32
    return %arg0, %c0_i32, %c0_i32_0 : i32, i32, i32
  }
  func.func @transform_3(%arg0: i32, %arg1: i32) -> (i32, i32, i32) {
    %c0_i32 = arith.constant 0 : i32
    %c0_i32_0 = arith.constant 0 : i32
    %c0_i32_1 = arith.constant 0 : i32
    return %arg0, %c0_i32, %c0_i32_0 : i32, i32, i32
  }
  func.func @transform_4(%arg0: i32, %arg1: i32) -> (i32, i32) {
    %c0_i32 = arith.constant 0 : i32
    %c0_i32_0 = arith.constant 0 : i32
    %c0_i32_1 = arith.constant 0 : i32
    return %c0_i32, %c0_i32_0 : i32, i32
  }
  func.func @transform_5(%arg0: i32, %arg1: i32) -> (i32, i32) {
    %c0_i32 = arith.constant 0 : i32
    %c0_i32_0 = arith.constant 0 : i32
    %c0_i32_1 = arith.constant 0 : i32
    return %c0_i32, %c0_i32_0 : i32, i32
  }
  func.func @transform_6(%arg0: i32, %arg1: i32) -> (i32, i32) {
    %c0_i32 = arith.constant 0 : i32
    %c0_i32_0 = arith.constant 0 : i32
    %c0_i32_1 = arith.constant 0 : i32
    return %c0_i32, %c0_i32_0 : i32, i32
  }
  func.func @transform_7(%arg0: i32, %arg1: i32) -> (i32, i32) {
    %c0_i32 = arith.constant 0 : i32
    %c0_i32_0 = arith.constant 0 : i32
    %c0_i32_1 = arith.constant 0 : i32
    return %c0_i32, %c0_i32_0 : i32, i32
  }
  func.func @transform_8(%arg0: i32, %arg1: i32) -> (i32, i32) {
    %c0_i32 = arith.constant 0 : i32
    %c0_i32_0 = arith.constant 0 : i32
    %c0_i32_1 = arith.constant 0 : i32
    return %c0_i32, %c0_i32_0 : i32, i32
  }
  func.func @transform_9(%arg0: i32, %arg1: i32) -> (i32, i32) {
    %c0_i32 = arith.constant 0 : i32
    %c0_i32_0 = arith.constant 0 : i32
    %c0_i32_1 = arith.constant 0 : i32
    return %c0_i32, %c0_i32_0 : i32, i32
  }
  func.func @transform_10(%arg0: i32, %arg1: i32) -> (i32, i32) {
    %c0_i32 = arith.constant 0 : i32
    %c0_i32_0 = arith.constant 0 : i32
    %c0_i32_1 = arith.constant 0 : i32
    return %c0_i32, %c0_i32_0 : i32, i32
  }
  func.func @transform_11(%arg0: i32, %arg1: i32) -> (i32, i32) {
    %c0_i32 = arith.constant 0 : i32
    %c0_i32_0 = arith.constant 0 : i32
    %c0_i32_1 = arith.constant 0 : i32
    return %c0_i32, %c0_i32_0 : i32, i32
  }
  func.func @transform_12(%arg0: i32, %arg1: i32) -> (i32, i32) {
    %c0_i32 = arith.constant 0 : i32
    %c0_i32_0 = arith.constant 0 : i32
    %c0_i32_1 = arith.constant 0 : i32
    return %c0_i32, %c0_i32_0 : i32, i32
  }
  func.func @transform_13(%arg0: i32, %arg1: i32) -> (i32, i32) {
    %c0_i32 = arith.constant 0 : i32
    %c0_i32_0 = arith.constant 0 : i32
    %c0_i32_1 = arith.constant 0 : i32
    return %c0_i32, %c0_i32_0 : i32, i32
  }
  func.func @transform_14(%arg0: i32, %arg1: i32) -> (i32, i32) {
    %c0_i32 = arith.constant 0 : i32
    %c0_i32_0 = arith.constant 0 : i32
    %c0_i32_1 = arith.constant 0 : i32
    return %c0_i32, %c0_i32_0 : i32, i32
  }
  func.func @transform_15(%arg0: i32, %arg1: i32) -> (i32, i32) {
    %c0_i32 = arith.constant 0 : i32
    %c0_i32_0 = arith.constant 0 : i32
    %c0_i32_1 = arith.constant 0 : i32
    return %c0_i32, %c0_i32_0 : i32, i32
  }
  func.func @transform_16(%arg0: i32, %arg1: i32) -> (i32, i32) {
    %c0_i32 = arith.constant 0 : i32
    %c0_i32_0 = arith.constant 0 : i32
    %c0_i32_1 = arith.constant 0 : i32
    return %c0_i32, %c0_i32_0 : i32, i32
  }
  func.func @transform_17(%arg0: i32, %arg1: i32) -> (i32, i32) {
    %c0_i32 = arith.constant 0 : i32
    %c0_i32_0 = arith.constant 0 : i32
    %c0_i32_1 = arith.constant 0 : i32
    return %c0_i32, %c0_i32_0 : i32, i32
  }
  func.func @transform_18(%arg0: i32, %arg1: i32) -> (i32, i32) {
    %c0_i32 = arith.constant 0 : i32
    %c0_i32_0 = arith.constant 0 : i32
    %c0_i32_1 = arith.constant 0 : i32
    return %c0_i32, %c0_i32_0 : i32, i32
  }
  func.func @transform_19(%arg0: i32, %arg1: i32) -> (i32, i32) {
    %c0_i32 = arith.constant 0 : i32
    %c0_i32_0 = arith.constant 0 : i32
    %c0_i32_1 = arith.constant 0 : i32
    return %c0_i32, %c0_i32_0 : i32, i32
  }
  func.func @transform_20(%arg0: i32, %arg1: i32) -> (i32, i32) {
    %c0_i32 = arith.constant 0 : i32
    %c0_i32_0 = arith.constant 0 : i32
    %c0_i32_1 = arith.constant 0 : i32
    return %c0_i32, %c0_i32_0 : i32, i32
  }
  func.func @transform_21(%arg0: i32, %arg1: i32) -> (i32, i32) {
    %c0_i32 = arith.constant 0 : i32
    %c0_i32_0 = arith.constant 0 : i32
    %c0_i32_1 = arith.constant 0 : i32
    return %c0_i32, %c0_i32_0 : i32, i32
  }
  func.func @transform_22(%arg0: i32, %arg1: i32) -> (i32, i32) {
    %c0_i32 = arith.constant 0 : i32
    %c0_i32_0 = arith.constant 0 : i32
    %c0_i32_1 = arith.constant 0 : i32
    return %c0_i32, %c0_i32_0 : i32, i32
  }
  func.func @transform_23(%arg0: i32, %arg1: i32) -> (i32, i32) {
    %c0_i32 = arith.constant 0 : i32
    %c0_i32_0 = arith.constant 0 : i32
    %c0_i32_1 = arith.constant 0 : i32
    return %c0_i32, %c0_i32_0 : i32, i32
  }
  func.func @transform_24(%arg0: i32, %arg1: i32) -> (i32, i32) {
    %c0_i32 = arith.constant 0 : i32
    %c0_i32_0 = arith.constant 0 : i32
    %c0_i32_1 = arith.constant 0 : i32
    return %c0_i32, %c0_i32_0 : i32, i32
  }
  func.func @transform_25(%arg0: i32, %arg1: i32) -> (i32, i32) {
    %c0_i32 = arith.constant 0 : i32
    %c0_i32_0 = arith.constant 0 : i32
    %c0_i32_1 = arith.constant 0 : i32
    return %c0_i32, %c0_i32_0 : i32, i32
  }
  func.func @transform_26(%arg0: i32, %arg1: i32) -> (i32, i32) {
    %c0_i32 = arith.constant 0 : i32
    %c0_i32_0 = arith.constant 0 : i32
    %c0_i32_1 = arith.constant 0 : i32
    return %c0_i32, %c0_i32_0 : i32, i32
  }
  func.func @transform_27(%arg0: i32, %arg1: i32) -> (i32, i32) {
    %c0_i32 = arith.constant 0 : i32
    %c0_i32_0 = arith.constant 0 : i32
    %c0_i32_1 = arith.constant 0 : i32
    return %c0_i32, %c0_i32_0 : i32, i32
  }
  func.func @transform_28(%arg0: i32, %arg1: i32) -> (i32, i32) {
    %c0_i32 = arith.constant 0 : i32
    %c0_i32_0 = arith.constant 0 : i32
    %c0_i32_1 = arith.constant 0 : i32
    return %c0_i32, %c0_i32_0 : i32, i32
  }
  func.func @transform_29(%arg0: i32, %arg1: i32) -> (i32, i32) {
    %c0_i32 = arith.constant 0 : i32
    %c0_i32_0 = arith.constant 0 : i32
    %c0_i32_1 = arith.constant 0 : i32
    return %c0_i32, %c0_i32_0 : i32, i32
  }
  func.func @transform_30(%arg0: i32, %arg1: i32) -> (i32, i32, i32) {
    %c0_i32 = arith.constant 0 : i32
    %c0_i32_0 = arith.constant 0 : i32
    return %arg0, %arg1, %c0_i32 : i32, i32, i32
  }
}

</mosaic_0001>

<bundles_post_ra>
// kernel: tpu_custom_call.1
= control target key start
LH: loop header
LB: loop body
LE: loop exit
PB: predicated region body
PF: predicated region fallthrough
CT: control target
= control target key end

     0   :  { %s5754_s6 = smov 1   ;;  %s5755_s10 = smov 2   ;;  %s6872_s0 = inlined_call_operand.smem [shape: u32[31], index: -1, kind: input, shape index: {}] }
   0x1   :  { %s5826_s5 = sld [smem:[%s6872_s0]]   ;;  %s5756_s14 = smov 3  }
   0x2   :  { %s5831_s9 = sld [smem:[%s6872_s0 + %s5754_s6]]   ;;  %s5757_s18 = smov 4  }
   0x3   :  { %s5836_s13 = sld [smem:[%s6872_s0 + %s5755_s10]]   ;;  %s5758_s22 = smov 5  }
   0x4   :  { %s5841_s17 = sld [smem:[%s6872_s0 + %s5756_s14]]   ;;  %s5759_s26 = smov 6  }
   0x5   :  { %s5846_s21 = sld [smem:[%s6872_s0 + %s5757_s18]]   ;;  %s5760_s30 = smov 7  }
   0x6   :  { %s5851_s25 = sld [smem:[%s6872_s0 + %s5758_s22]]   ;;  %s5761_s4 = smov 8  }
   0x7   :  { %6920 = sst [smem:[#allocation50_spill]] %s5826_s5  ;;  %s5762_s10 = smov 9  }
   0x8   :  { %6921 = sst [smem:[#allocation51_spill]] %s5831_s9  ;;  %s5763_s15 = smov 10  }
   0x9   :  { %6922 = sst [smem:[#allocation52_spill]] %s5836_s13  ;;  %s5764_s20 = smov 11  }
   0xa   :  { %6923 = sst [smem:[#allocation53_spill]] %s5841_s17  ;;  %s5766_s1 = smov 13  }
   0xb   :  { %6924 = sst [smem:[#allocation54_spill]] %s5846_s21  ;;  %s5767_s7 = smov 14  }
   0xc   :  { %6925 = sst [smem:[#allocation55_spill]] %s5851_s25  ;;  %s5769_s22 = smov 16  }
   0xd   :  { %s5856_s29 = sld [smem:[%s6872_s0 + %s5759_s26]]   ;;  %s5765_s26 = smov 12  }
   0xe   :  { %s5861_s3 = sld [smem:[%s6872_s0 + %s5760_s30]]   ;;  %s5770_s28 = smov 17  }
   0xf   :  { %s5866_s8 = sld [smem:[%s6872_s0 + %s5761_s4]]  }
  0x10   :  { %s5871_s14 = sld [smem:[%s6872_s0 + %s5762_s10]]  }
  0x11   :  { %s5876_s19 = sld [smem:[%s6872_s0 + %s5763_s15]]   ;;  %s5768_s15 = smov 15  }
  0x12   :  { %s5881_s24 = sld [smem:[%s6872_s0 + %s5764_s20]]  }
  0x13   :  { %6926 = sst [smem:[#allocation56_spill]] %s5856_s29 }
  0x14   :  { %6927 = sst [smem:[#allocation57_spill]] %s5861_s3 }
  0x15   :  { %6928 = sst [smem:[#allocation58_spill]] %s5866_s8 }
  0x16   :  { %6929 = sst [smem:[#allocation59_spill]] %s5871_s14 }
  0x17   :  { %6930 = sst [smem:[#allocation60_spill]] %s5876_s19 }
  0x18   :  { %6931 = sst [smem:[#allocation61_spill]] %s5881_s24 }
  0x19   :  { %s5886_s30 = sld [smem:[%s6872_s0 + %s5765_s26]]  }
  0x1a   :  { %s5891_s6 = sld [smem:[%s6872_s0 + %s5766_s1]]  }
  0x1b   :  { %s5896_s12 = sld [smem:[%s6872_s0 + %s5767_s7]]   ;;  %s5771_s7 = smov 18  }
  0x1c   :  { %s5901_s20 = sld [smem:[%s6872_s0 + %s5768_s15]]   ;;  %s5772_s15 = smov 19  }
  0x1d   :  { %s5906_s27 = sld [smem:[%s6872_s0 + %s5769_s22]]   ;;  %s5773_s22 = smov 20  }
  0x1e   :  { %s5911_s4 = sld [smem:[%s6872_s0 + %s5770_s28]]   ;;  %s5774_s28 = smov 21  }
  0x1f   :  { %s5916_s25 = sld [smem:[%s6872_s0 + %s5771_s7]]   ;;  %s5775_s7 = smov 22  }
  0x20   :  { %6932 = sst [smem:[#allocation62_spill]] %s5891_s6 }
  0x21   :  { %6933 = sst [smem:[#allocation63_spill]] %s5896_s12 }
  0x22   :  { %6934 = sst [smem:[#allocation64_spill]] %s5901_s20 }
  0x23   :  { %6935 = sst [smem:[#allocation65_spill]] %s5906_s27 }
  0x24   :  { %6936 = sst [smem:[#allocation66_spill]] %s5911_s4 }
  0x25   :  { %6937 = sst [smem:[#allocation67_spill]] %s5916_s25 }
  0x26   :  { %s5921_s3 = sld [smem:[%s6872_s0 + %s5772_s15]]   ;;  %s5776_s15 = smov 23  }
  0x27   :  { %s5926_s17 = sld [smem:[%s6872_s0 + %s5773_s22]]   ;;  %s5777_s22 = smov 24  }
  0x28   :  { %s5931_s13 = sld [smem:[%s6872_s0 + %s5774_s28]]   ;;  %s5778_s28 = smov 25  }
  0x29   :  { %s5936_s25 = sld [smem:[%s6872_s0 + %s5775_s7]]   ;;  %s5779_s7 = smov 26  }
  0x2a   :  { %s5946_s5 = sld [smem:[%s6872_s0 + %s5777_s22]]   ;;  %s5781_s22 = smov 28  }
  0x2c   :  { %6938 = sst [smem:[#allocation68_spill]] %s5921_s3 }
  0x2d   :  { %6939 = sst [smem:[#allocation69_spill]] %s5926_s17 }
  0x2e   :  { %6940 = sst [smem:[#allocation70_spill]] %s5931_s13 }
  0x2f   :  { %6941 = sst [smem:[#allocation71_spill]] %s5936_s25 }
  0x30   :  { %s5941_s3 = sld [smem:[%s6872_s0 + %s5776_s15]]   ;;  %s5780_s15 = smov 27  }
  0x31   :  { %6943 = sst [smem:[#allocation73_spill]] %s5946_s5 }
  0x32   :  { %s5951_s13 = sld [smem:[%s6872_s0 + %s5778_s28]]   ;;  %s5782_s28 = smov 29  }
  0x33   :  { %s5956_s25 = sld [smem:[%s6872_s0 + %s5779_s7]]   ;;  %s5783_s7 = smov 30  }
  0x34   :  { %s5966_s17 = sld [smem:[%s6872_s0 + %s5781_s22]]  }
  0x36   :  { %6942 = sst [smem:[#allocation72_spill]] %s5941_s3 }
  0x37   :  { %s5961_s3 = sld [smem:[%s6872_s0 + %s5780_s15]]  }
  0x38   :  { %6944 = sst [smem:[#allocation74_spill]] %s5951_s13 }
  0x39   :  { %6945 = sst [smem:[#allocation75_spill]] %s5956_s25 }
  0x3a   :  { %6946 = sst [smem:[#allocation76_spill]] %s5966_s17 }
  0x3b   :  { %s5971_s13 = sld [smem:[%s6872_s0 + %s5782_s28]]  }
  0x3c   :  { %s5976_s25 = sld [smem:[%s6872_s0 + %s5783_s7]]  }
  0x41   :  { %6947 = sst [smem:[#allocation77_spill]] %s5971_s13 }
  0x42   :  { %6948 = sst [smem:[#allocation78_spill]] %s5976_s25 }
  0x43   :  { %66 = vsyncpa [#allocation8], 0 }
  0x44   :  { %68 = vsyncpa [#allocation8 + $0x1], 0 }
  0x45   :  { %69 = vsyncpa [#allocation11], 0 }
  0x46   :  { %71 = vsyncpa [#allocation11 + $0x1], 0 }
  0x47   :  { %72 = vsyncpa [#allocation14], 0 }
  0x48   :  { %74 = vsyncpa [#allocation14 + $0x1], 0 }
  0x49   :  { %75 = vsyncpa [#allocation17], 0 }
  0x4a   :  { %76 = vsyncpa [#allocation20], 0 }
  0x4b   :  { %77 = vsyncpa [#allocation23], 0 }
  0x4c   :  { %78 = vsyncpa [#allocation26], 0 }
  0x4d   :  { %79 = vsyncpa [#allocation29], 0 }
  0x4e   :  { %80 = vsyncpa [#allocation32], 0 }
  0x4f   :  { %81 = vsyncpa [#allocation35], 0 }
  0x50   :  { %82 = vsyncpa [#allocation9], 0 }
  0x51   :  { %84 = vsyncpa [#allocation9 + $0x1], 0  ;;  %s5978_s15 = smov 0   ;;  %s5980_s16 = smov 0  }
  0x52   :  { %s5982_s0 = smov 0   ;;  %s5984_s18 = smov 0  }
  0x53   :  { %s5986_s22 = smov 0   ;;  %s5988_s23 = smov 0  }
  0x54 LB: > { %s6949_s27 = sld [smem:[#allocation65_spill]]  ;;  %s6950_s19 = sld [smem:[#allocation60_spill]]  ;;  %s5732_s15 = sphi %s5978_s15, %s7029_s15   ;;  %s5752_s23 = sphi %s5988_s23, %s90_s23   ;;  %s5748_s22 = sphi %s5986_s22, %s7032_s22   ;;  %s5744_s18 = sphi %s5984_s18, %s7031_s18   ;;  %s5740_s0 = sphi %s5982_s0, %s7027_s0   ;;  %s5736_s16 = sphi %s5980_s16, %s7030_s16  }
  0x55   : > { %s6951_s12 = sld [smem:[#allocation63_spill]]  ;;  %s6952_s8 = sld [smem:[#allocation58_spill]] }
  0x56   : > { %s6953_s9 = sld [smem:[#allocation51_spill]]  ;;  %s6954_s29 = sld [smem:[#allocation56_spill]] }
  0x57   : > { %s6955_s24 = sld [smem:[#allocation61_spill]]  ;;  %s6956_s20 = sld [smem:[#allocation64_spill]] }
  0x58   : > { %s6957_s14 = sld [smem:[#allocation59_spill]]  ;;  %s6958_s6 = sld [smem:[#allocation62_spill]] }
  0x59   : > { %s6959_s5 = sld [smem:[#allocation73_spill]]  ;;  %s6960_s4 = sld [smem:[#allocation66_spill]] }
  0x5a   : > { %s6961_s21 = sld [smem:[#allocation54_spill]]  ;;  %6962 = sst [smem:[#allocation79_spill]] %s5740_s0 }
  0x5b   : > { %6963 = sst [smem:[#allocation80_spill]] %s5744_s18  ;;  %s6009_s26 = sadd.s32 4294967295, %s5752_s23  }
  0x5c   : > { %p4059_p0 = scmp.ge.s32.totalorder %s5752_s23, 1  ;;  %p6880_p1 = scmp.eq.s32.totalorder %s6009_s26, 0 }
  0x5d   : > { %p785_p2 = scmp.lt.s32.totalorder %s5752_s23, 3  ;;  %s5784_s1 = smov [#allocation15]  }
  0x5e   : > { %s797_s2 = sshll.u32 %s5784_s1, 4  ;;  %s5785_s10 = smov [#allocation16]   ;;  %s6018_s2 = int_to_ptr.vmem [resolvable:$true] %s797_s2 }
  0x5f   : > { %p6014_p3 = pnand %p4059_p0, %p785_p2  ;;  %s813_s11 = sshll.u32 %s5785_s10, 4  ;;  %s6029_s11 = int_to_ptr.vmem [resolvable:$true] %s813_s11 }
  0x60   : > { %s5786_s25 = smov [#allocation19]   ;;  %s5090_s13 = scalar_lea.hbm %s6961_s21, 1024 }
  0x61   : > { %s6964_s28 = scalar_select %p6014_p3, 1, 0 }
  0x62   : > { %p4706_p4 = pneg %p6014_p3  ;;  %s6031_s18 = sshll.u32 %s5786_s25, 4  ;;  %s844_s18 = int_to_ptr.vmem [resolvable:$true] %s6031_s18 }
  0x63   : > { %p5091_p7 = scmp.ne.s32.totalorder %s6961_s21, %s5090_s13  ;;  %p5097_p11 = scmp.lt.u32.totalorder %s5090_s13, %s6961_s21 }
  0x64   : > { %p6025_p6 = pnand %p4706_p4, %p6880_p1 }
  0x66   : > { %s6965_s7 = scalar_select %p6025_p6, 1, 0 }
  0x67   : > { %p6037_p8 = pneg %p6025_p6 }
  0x69   : > { %s6966_s1 = scalar_select %p6037_p8, 1, 0 }
  0x6a   : > { %p5093_p9 = pnand %p6037_p8, %p5091_p7 }
  0x6c   : > { %p5094_p10 = pneg %p5093_p9 }
  0x6e   : > { %p5099_p12 = pnand %p5097_p11, %p5094_p10 }
  0x70   : > { %5102 = shalt.err (!%p5099_p12)
}
  0x71   : > { %s5103_s25 = scalar_lea.vmem %s6018_s2, 1024  ;;  %p5111_p4 = scmp.lt.s32.totalorder %s6018_s2, %s6018_s2 }
  0x72   : > { %p5104_p13 = scmp.ne.s32.totalorder %s6018_s2, %s5103_s25  ;;  %p5112_p5 = scmp.lt.s32.totalorder %s5103_s25, %s5103_s25 }
  0x74   : > { %p5106_p0 = pnand %p5104_p13, %p6037_p8  ;;  %p5113_p1 = por %p5112_p5, %p5111_p4 }
  0x76   : > { %p5107_p2 = pneg %p5106_p0 }
  0x78   : > { %p5114_p3 = pnand %p5113_p1, %p5107_p2 }
  0x7a   : > { %5117 = shalt.err (!%p5114_p3)
}
  0x7b   : > { %s6882_s10 = smov 64   ;;  %s6884_s13 = smov 4  }
  0x7c   : > { %4709 = dma.hbm_to_vmem [thread:$0]  (!%p6025_p6), %s6961_s21, 1024, %s6018_s2, [#allocation14], %s6882_s10, %s6882_s10, %s6884_s13  }
  0x7d   : > { %s5118_s17 = scalar_lea.hbm %s6954_s29, 1024 }
  0x7e   : > { %p5119_p7 = scmp.ne.s32.totalorder %s6954_s29, %s5118_s17  ;;  %p5125_p3 = scmp.lt.u32.totalorder %s5118_s17, %s6954_s29 }
  0x80   : > { %p5121_p5 = pnand %p5119_p7, %p6037_p8 }
  0x82   : > { %p5122_p1 = pneg %p5121_p5 }
  0x84   : > { %p5127_p9 = pnand %p5125_p3, %p5122_p1 }
  0x86   : > { %5130 = shalt.err (!%p5127_p9)
}
  0x87   : > { %s5131_s25 = scalar_lea.vmem %s6029_s11, 1024  ;;  %p5139_p13 = scmp.lt.s32.totalorder %s6029_s11, %s6029_s11 }
  0x88   : > { %p5132_p10 = scmp.ne.s32.totalorder %s6029_s11, %s5131_s25  ;;  %p5140_p0 = scmp.lt.s32.totalorder %s5131_s25, %s5131_s25 }
  0x8a   : > { %p5134_p11 = pnand %p5132_p10, %p6037_p8  ;;  %p5141_p2 = por %p5140_p0, %p5139_p13 }
  0x8c   : > { %p5135_p12 = pneg %p5134_p11 }
  0x8e   : > { %p5142_p4 = pnand %p5141_p2, %p5135_p12 }
  0x90   : > { %5145 = shalt.err (!%p5142_p4)
}
  0x91   : > { %4712 = dma.hbm_to_vmem [thread:$0]  (!%p6025_p6), %s6954_s29, 1024, %s6029_s11, [#allocation17], %s6882_s10, %s6882_s10, %s6884_s13  }
  0x92   : > { %s5146_s17 = scalar_lea.hbm %s6957_s14, 16 }
  0x93   : > { %p5147_p7 = scmp.ne.s32.totalorder %s6957_s14, %s5146_s17  ;;  %p5153_p3 = scmp.lt.u32.totalorder %s5146_s17, %s6957_s14 }
  0x95   : > { %p5149_p5 = pnand %p5147_p7, %p6037_p8 }
  0x97   : > { %p5150_p1 = pneg %p5149_p5 }
  0x99   : > { %p5155_p9 = pnand %p5153_p3, %p5150_p1 }
  0x9b   : > { %5158 = shalt.err (!%p5155_p9)
}
  0x9c   : > { %s5159_s2 = scalar_lea.vmem %s844_s18, 16  ;;  %s5166_s25 = scalar_lea.vmem %s844_s18, 32 }
  0x9d   : > { %p5160_p10 = scmp.ne.s32.totalorder %s844_s18, %s5159_s2  ;;  %p5167_p13 = scmp.lt.s32.totalorder %s844_s18, %s844_s18 }
  0x9e   : > { %p5168_p0 = scmp.lt.s32.totalorder %s5166_s25, %s5159_s2 }
  0x9f   : > { %p5162_p11 = pnand %p5160_p10, %p6037_p8 }
  0xa0   : > { %p5169_p2 = por %p5168_p0, %p5167_p13 }
  0xa1   : > { %p5163_p12 = pneg %p5162_p11 }
  0xa3   : > { %p5170_p4 = pnand %p5169_p2, %p5163_p12 }
  0xa5   : > { %5173 = shalt.err (!%p5170_p4)
}
  0xa6   : > { %4718 = dma.hbm_to_vmem [thread:$0]  (!%p6025_p6), %s6957_s14, 16, %s844_s18, [#allocation20]  }
  0xa7   : > { %s5789_s11 = smov [#allocation22]   ;;  %s5790_s10 = smov [#allocation25]  }
  0xa8   : > { %s867_s17 = sshll.u32 %s5789_s11, 4  ;;  %s889_s13 = sshll.u32 %s5790_s10, 4  ;;  %s868_s17 = int_to_ptr.vmem [resolvable:$true] %s867_s17  ;;  %s890_s13 = int_to_ptr.vmem [resolvable:$true] %s889_s13 }
  0xa9   : > { %s5174_s21 = scalar_lea.hbm %s6955_s24, 16 }
  0xaa   : > { %p5175_p7 = scmp.ne.s32.totalorder %s6955_s24, %s5174_s21  ;;  %p5181_p3 = scmp.lt.u32.totalorder %s5174_s21, %s6955_s24 }
  0xac   : > { %p5177_p5 = pnand %p5175_p7, %p6037_p8 }
  0xae   : > { %p5178_p1 = pneg %p5177_p5 }
  0xb0   : > { %p5183_p9 = pnand %p5181_p3, %p5178_p1 }
  0xb2   : > { %5186 = shalt.err (!%p5183_p9)
}
  0xb3   : > { %s5187_s2 = scalar_lea.vmem %s868_s17, 16  ;;  %s5194_s18 = scalar_lea.vmem %s868_s17, 32 }
  0xb4   : > { %p5188_p10 = scmp.ne.s32.totalorder %s868_s17, %s5187_s2  ;;  %p5195_p13 = scmp.lt.s32.totalorder %s868_s17, %s868_s17 }
  0xb5   : > { %p5196_p0 = scmp.lt.s32.totalorder %s5194_s18, %s5187_s2 }
  0xb6   : > { %p5190_p11 = pnand %p5188_p10, %p6037_p8 }
  0xb7   : > { %p5197_p2 = por %p5196_p0, %p5195_p13 }
  0xb8   : > { %p5191_p12 = pneg %p5190_p11 }
  0xba   : > { %p5198_p4 = pnand %p5197_p2, %p5191_p12 }
  0xbc   : > { %5201 = shalt.err (!%p5198_p4)
}
  0xbd   : > { %4724 = dma.hbm_to_vmem [thread:$0]  (!%p6025_p6), %s6955_s24, 16, %s868_s17, [#allocation23]  }
  0xbe   : > { %s5202_s21 = scalar_lea.hbm %s6958_s6, 16 }
  0xbf   : > { %p5203_p7 = scmp.ne.s32.totalorder %s6958_s6, %s5202_s21  ;;  %p5209_p3 = scmp.lt.u32.totalorder %s5202_s21, %s6958_s6 }
  0xc1   : > { %p5205_p5 = pnand %p5203_p7, %p6037_p8 }
  0xc3   : > { %p5206_p1 = pneg %p5205_p5 }
  0xc5   : > { %p5211_p9 = pnand %p5209_p3, %p5206_p1 }
  0xc7   : > { %5214 = shalt.err (!%p5211_p9)
}
  0xc8   : > { %s5215_s10 = scalar_lea.vmem %s890_s13, 16  ;;  %s5222_s25 = scalar_lea.vmem %s890_s13, 32 }
  0xc9   : > { %p5216_p10 = scmp.ne.s32.totalorder %s890_s13, %s5215_s10  ;;  %p5223_p13 = scmp.lt.s32.totalorder %s890_s13, %s890_s13 }
  0xca   : > { %p5224_p0 = scmp.lt.s32.totalorder %s5222_s25, %s5215_s10 }
  0xcb   : > { %p5218_p11 = pnand %p5216_p10, %p6037_p8 }
  0xcc   : > { %p5225_p2 = por %p5224_p0, %p5223_p13 }
  0xcd   : > { %p5219_p12 = pneg %p5218_p11 }
  0xcf   : > { %p5226_p4 = pnand %p5225_p2, %p5219_p12 }
  0xd1   : > { %5229 = shalt.err (!%p5226_p4)
}
  0xd2   : > { %4730 = dma.hbm_to_vmem [thread:$0]  (!%p6025_p6), %s6958_s6, 16, %s890_s13, [#allocation26]  }
  0xd3   : > { %s5791_s11 = smov [#allocation28]   ;;  %s5792_s2 = smov [#allocation31]  }
  0xd4   : > { %s913_s17 = sshll.u32 %s5791_s11, 4  ;;  %s937_s18 = sshll.u32 %s5792_s2, 4  ;;  %s914_s17 = int_to_ptr.vmem [resolvable:$true] %s913_s17  ;;  %s938_s18 = int_to_ptr.vmem [resolvable:$true] %s937_s18 }
  0xd5   : > { %s5230_s21 = scalar_lea.hbm %s6956_s20, 16 }
  0xd6   : > { %p5231_p7 = scmp.ne.s32.totalorder %s6956_s20, %s5230_s21  ;;  %p5237_p3 = scmp.lt.u32.totalorder %s5230_s21, %s6956_s20 }
  0xd8   : > { %p5233_p5 = pnand %p5231_p7, %p6037_p8 }
  0xda   : > { %p5234_p1 = pneg %p5233_p5 }
  0xdc   : > { %p5239_p9 = pnand %p5237_p3, %p5234_p1 }
  0xde   : > { %5242 = shalt.err (!%p5239_p9)
}
  0xdf   : > { %s5243_s10 = scalar_lea.vmem %s914_s17, 16  ;;  %s5250_s13 = scalar_lea.vmem %s914_s17, 32 }
  0xe0   : > { %p5244_p10 = scmp.ne.s32.totalorder %s914_s17, %s5243_s10  ;;  %p5251_p13 = scmp.lt.s32.totalorder %s914_s17, %s914_s17 }
  0xe1   : > { %p5252_p0 = scmp.lt.s32.totalorder %s5250_s13, %s5243_s10 }
  0xe2   : > { %p5246_p11 = pnand %p5244_p10, %p6037_p8 }
  0xe3   : > { %p5253_p2 = por %p5252_p0, %p5251_p13 }
  0xe4   : > { %p5247_p12 = pneg %p5246_p11 }
  0xe6   : > { %p5254_p4 = pnand %p5253_p2, %p5247_p12 }
  0xe8   : > { %5257 = shalt.err (!%p5254_p4)
}
  0xe9   : > { %4736 = dma.hbm_to_vmem [thread:$0]  (!%p6025_p6), %s6956_s20, 16, %s914_s17, [#allocation29]  }
  0xea   : > { %s5258_s25 = scalar_lea.hbm %s6960_s4, 16 }
  0xeb   : > { %p5259_p7 = scmp.ne.s32.totalorder %s6960_s4, %s5258_s25  ;;  %p5265_p3 = scmp.lt.u32.totalorder %s5258_s25, %s6960_s4 }
  0xed   : > { %p5261_p5 = pnand %p5259_p7, %p6037_p8 }
  0xef   : > { %p5262_p1 = pneg %p5261_p5 }
  0xf1   : > { %p5267_p9 = pnand %p5265_p3, %p5262_p1 }
  0xf3   : > { %5270 = shalt.err (!%p5267_p9)
}
  0xf4   : > { %s5271_s11 = scalar_lea.vmem %s938_s18, 16  ;;  %s5278_s2 = scalar_lea.vmem %s938_s18, 32 }
  0xf5   : > { %p5272_p10 = scmp.ne.s32.totalorder %s938_s18, %s5271_s11  ;;  %p5279_p13 = scmp.lt.s32.totalorder %s938_s18, %s938_s18 }
  0xf6   : > { %p5280_p0 = scmp.lt.s32.totalorder %s5278_s2, %s5271_s11 }
  0xf7   : > { %p5274_p11 = pnand %p5272_p10, %p6037_p8 }
  0xf8   : > { %p5281_p2 = por %p5280_p0, %p5279_p13 }
  0xf9   : > { %p5275_p12 = pneg %p5274_p11 }
  0xfb   : > { %p5282_p4 = pnand %p5281_p2, %p5275_p12 }
  0xfd   : > { %5285 = shalt.err (!%p5282_p4)
}
  0xfe   : > { %4742 = dma.hbm_to_vmem [thread:$0]  (!%p6025_p6), %s6960_s4, 16, %s938_s18, [#allocation32]  }
  0xff   : > { %s5793_s17 = smov [#allocation34]   ;;  %s5286_s10 = scalar_lea.hbm %s6959_s5, 2048 }
 0x100   : > { %s975_s21 = sshll.u32 %s5793_s17, 4  ;;  %p5287_p7 = scmp.ne.s32.totalorder %s6959_s5, %s5286_s10  ;;  %s976_s21 = int_to_ptr.vmem [resolvable:$true] %s975_s21 }
 0x101   : > { %p5293_p3 = scmp.lt.u32.totalorder %s5286_s10, %s6959_s5 }
 0x102   : > { %p5289_p5 = pnand %p5287_p7, %p6037_p8 }
 0x104   : > { %p5290_p1 = pneg %p5289_p5 }
 0x106   : > { %p5295_p9 = pnand %p5293_p3, %p5290_p1 }
 0x108   : > { %5298 = shalt.err (!%p5295_p9)
}
 0x109   : > { %s5299_s13 = scalar_lea.vmem %s976_s21, 2048  ;;  %p5307_p13 = scmp.lt.s32.totalorder %s976_s21, %s976_s21 }
 0x10a   : > { %p5300_p10 = scmp.ne.s32.totalorder %s976_s21, %s5299_s13  ;;  %p5308_p0 = scmp.lt.s32.totalorder %s5299_s13, %s5299_s13 }
 0x10c   : > { %p5302_p11 = pnand %p5300_p10, %p6037_p8  ;;  %p5309_p2 = por %p5308_p0, %p5307_p13 }
 0x10e   : > { %p5303_p12 = pneg %p5302_p11 }
 0x110   : > { %p5310_p4 = pnand %p5309_p2, %p5303_p12 }
 0x112   : > { %5313 = shalt.err (!%p5310_p4)
}
 0x113   : > { %s6887_s18 = smov 128   ;;  %s6889_s25 = smov 8  }
 0x114   : > { %4748 = dma.hbm_to_vmem [thread:$0]  (!%p6025_p6), %s6959_s5, 2048, %s976_s21, [#allocation35], %s6887_s18, %s6887_s18, %s6889_s25  }
 0x115   : > { %s4058_s11 = sadd.s32 4294967294, %s5752_s23   ;;  %s102_s2 = sadd.s32 1, %s5748_s22 }
 0x116   : > { %p104_p7 = scmp.ge.s32.totalorder %s102_s2, 2  ;;  %s109_s17 = sadd.s32 1, %s5740_s0 }
 0x117   : > { %p116_p5 = scmp.ne.s32.totalorder %s5740_s0, %s5736_s16  ;;  %p117_p1 = scmp.eq.s32.totalorder %s5752_s23, 0 }
 0x118   : > { %s7034_s2 = smov (%p104_p7, %s102_s2), 0  ;;  %p122_p9 = scmp.ne.s32.totalorder %s5736_s16, %s5732_s15 }
 0x119   : > { %6967 = sst [smem:[#allocation81_spill]] %s7034_s2  ;;  %p6147_p3 = por %p117_p1, %p116_p5 }
 0x11a   : > { %s106_s21 = ssub.s32 %s5748_s22, %s7034_s2  ;;  %p772_p10 = scmp.eq.s32.totalorder %s6009_s26, 1 }
 0x11b   : > { %p107_p11 = scmp.eq.s32.totalorder %s106_s21, 0  ;;  %p6969_p12 = scmp.eq.s32.totalorder %s6009_s26, 0 }
 0x11c   : > { %p6162_p0 = por %p772_p10, %p116_p5  ;;  %p778_p2 = scmp.eq.s32.totalorder %s4058_s11, 1 }
 0x11d   : > { %p6158_p13 = por %p6969_p12, %p122_p9  ;;  %p4784_p7 = scmp.lt.s32.totalorder %s5752_s23, 2 }
 0x11e   : > { %s6971_s18 = scalar_select %p6162_p0, 1, 0 }
 0x11f   : > { %s6970_s13 = scalar_select %p6158_p13, 1, 0 }
 0x120   : > { %s6167_s25 = scalar_select %p107_p11, %s5740_s0, %s109_s17  }
 0x121   : > { %p6169_p4 = por %p778_p2, %p122_p9  ;;  %s6175_s21 = sand.u32 1, %s5740_s0  }
 0x122   : > { %6972 = sst [smem:[#allocation82_spill]] %s6167_s25  ;;  %s6899_s5 = sshll.u32 %s5748_s22, 8 }
 0x123   : > { %s6973_s4 = scalar_select %p6169_p4, 1, 0 }
 0x124   : > { %s6907_s6 = sshll.u32 %s6175_s21, 4  ;;  %p6181_p5 = pnand %p4784_p7, %p6147_p3 }
 0x125   : > { %s6906_s11 = sand.u32 1, %s5752_s23   ;;  %s6189_s17 = scalar_lea.hbm %s6953_s9, %s6899_s5 }
 0x126   : > { %s6974_s14 = scalar_select %p6181_p5, 1, 0 }
 0x127   : > { %s1039_s20 = scalar_lea.vmem [#allocation10], %s6907_s6  ;;  %s6197_s10 = scalar_lea.sflag [#allocation11], %s6906_s11 }
 0x128   : > { %s1046_s24 = sshll.u32 %s1039_s20, 4  ;;  %s5314_s29 = scalar_lea.hbm %s6189_s17, 256  ;;  %s6193_s24 = int_to_ptr.vmem [resolvable:$true] %s1046_s24 }
 0x129   : > { %p5315_p1 = scmp.ne.s32.totalorder %s6189_s17, %s5314_s29  ;;  %p6203_p3 = pneg %p6181_p5 }
 0x12a   : > { %s5319_s5 = scalar_lea.hbm %s6953_s9, 512  ;;  %p5320_p11 = scmp.lt.u32.totalorder %s6189_s17, %s6953_s9 }
 0x12b   : > { %s6975_s2 = scalar_select %p6203_p3, 1, 0 }
 0x12c   : > { %p5317_p9 = pnand %p6203_p3, %p5315_p1  ;;  %p5321_p12 = scmp.lt.u32.totalorder %s5319_s5, %s5314_s29 }
 0x12d   : > { %p5323_p7 = scmp.lt.u32.totalorder %s5314_s29, %s6189_s17 }
 0x12e   : > { %p5318_p10 = pneg %p5317_p9  ;;  %p5322_p2 = por %p5321_p12, %p5320_p11 }
 0x130   : > { %p5324_p4 = por %p5323_p7, %p5322_p2 }
 0x132   : > { %p5325_p0 = pnand %p5324_p4, %p5318_p10 }
 0x134   : > { %5328 = shalt.err (!%p5325_p0)
}
 0x135   : > { %s5329_s20 = scalar_lea.vmem %s6193_s24, 256  ;;  %s5796_s11 = smov [#allocation10]  }
 0x136   : > { %p5330_p13 = scmp.ne.s32.totalorder %s6193_s24, %s5329_s20  ;;  %s5334_s6 = sshll.u32 %s5796_s11, 4  ;;  %s5335_s6 = int_to_ptr.vmem [resolvable:$false] %s5334_s6 }
 0x137   : > { %s5336_s25 = scalar_lea.vmem %s5335_s6, 512  ;;  %p5337_p1 = scmp.lt.s32.totalorder %s6193_s24, %s5335_s6 }
 0x138   : > { %p5332_p6 = pnand %p5330_p13, %p6203_p3  ;;  %p5338_p9 = scmp.lt.s32.totalorder %s5336_s25, %s5329_s20 }
 0x13a   : > { %p5333_p8 = pneg %p5332_p6  ;;  %p5339_p11 = por %p5338_p9, %p5337_p1 }
 0x13c   : > { %p5340_p12 = pnand %p5339_p11, %p5333_p8 }
 0x13e   : > { %5343 = shalt.err (!%p5340_p12)
}
 0x13f   : > { %s6976_s5 = smov 8   ;;  %s6977_s29 = smov 128  }
 0x140   : > { %4758 = dma.hbm_to_vmem [thread:$0]  (!%p6181_p5), %s6189_s17, 256, %s6193_s24, %s6197_s10, %s6977_s29, %s6977_s29, %s6976_s5  }
 0x141   : > { %s5797_s11 = smov [#allocation18]   ;;  %s5798_s6 = smov [#allocation21]  }
 0x142   : > { %s829_s9 = sshll.u32 %s5797_s11, 4  ;;  %s853_s25 = sshll.u32 %s5798_s6, 4  ;;  %s830_s9 = int_to_ptr.vmem [resolvable:$true] %s829_s9  ;;  %s6226_s25 = int_to_ptr.vmem [resolvable:$true] %s853_s25 }
 0x143   : > { %s5344_s20 = scalar_lea.hbm %s6952_s8, 1024  ;;  %p6978_p8 = scmp.ne.s32.totalorder %s6966_s1, 0 }
 0x144   : > { %p5345_p6 = scmp.ne.s32.totalorder %s6952_s8, %s5344_s20  ;;  %p5351_p4 = scmp.lt.u32.totalorder %s5344_s20, %s6952_s8 }
 0x146   : > { %p5347_p13 = pnand %p5345_p6, %p6978_p8 }
 0x148   : > { %p5348_p0 = pneg %p5347_p13 }
 0x14a   : > { %p5353_p10 = pnand %p5351_p4, %p5348_p0 }
 0x14c   : > { %5356 = shalt.err (!%p5353_p10)
}
 0x14d   : > { %s5357_s0 = scalar_lea.vmem %s830_s9, 1024  ;;  %p5365_p9 = scmp.lt.s32.totalorder %s830_s9, %s830_s9 }
 0x14e   : > { %p5358_p2 = scmp.ne.s32.totalorder %s830_s9, %s5357_s0  ;;  %p5366_p11 = scmp.lt.s32.totalorder %s5357_s0, %s5357_s0 }
 0x150   : > { %p5360_p7 = pnand %p5358_p2, %p6978_p8  ;;  %p5367_p12 = por %p5366_p11, %p5365_p9 }
 0x152   : > { %p5361_p1 = pneg %p5360_p7 }
 0x154   : > { %p5368_p5 = pnand %p5367_p12, %p5361_p1 }
 0x156   : > { %5371 = shalt.err (!%p5368_p5)
}
 0x157   : > { %p6979_p3 = scmp.ne.s32.totalorder %s6965_s7, 0  ;;  %s6980_s24 = smov 4  }
 0x158   : > { %s6981_s17 = smov 64   ;;  %s5372_s11 = scalar_lea.hbm %s6950_s19, 1024 }
 0x159   : > { %4715 = dma.hbm_to_vmem [thread:$0]  (!%p6979_p3), %s6952_s8, 1024, %s830_s9, [#allocation17], %s6981_s17, %s6981_s17, %s6980_s24  }
 0x15a   : > { %p5373_p6 = scmp.ne.s32.totalorder %s6950_s19, %s5372_s11  ;;  %p5379_p4 = scmp.lt.u32.totalorder %s5372_s11, %s6950_s19 }
 0x15c   : > { %p5375_p13 = pnand %p5373_p6, %p6978_p8 }
 0x15e   : > { %p5376_p0 = pneg %p5375_p13 }
 0x160   : > { %p5381_p10 = pnand %p5379_p4, %p5376_p0 }
 0x162   : > { %5384 = shalt.err (!%p5381_p10)
}
 0x163   : > { %s5385_s0 = scalar_lea.vmem %s6226_s25, 1024  ;;  %p5393_p1 = scmp.lt.s32.totalorder %s6226_s25, %s6226_s25 }
 0x164   : > { %p5386_p5 = scmp.ne.s32.totalorder %s6226_s25, %s5385_s0  ;;  %p5394_p9 = scmp.lt.s32.totalorder %s5385_s0, %s5385_s0 }
 0x166   : > { %p5388_p2 = pnand %p5386_p5, %p6978_p8  ;;  %p5395_p11 = por %p5394_p9, %p5393_p1 }
 0x168   : > { %p5389_p7 = pneg %p5388_p2 }
 0x16a   : > { %p5396_p12 = pnand %p5395_p11, %p5389_p7 }
 0x16c   : > { %5399 = shalt.err (!%p5396_p12)
}
 0x16d   : > { %4721 = dma.hbm_to_vmem [thread:$0]  (!%p6979_p3), %s6950_s19, 1024, %s6226_s25, [#allocation20], %s6981_s17, %s6981_s17, %s6980_s24  }
 0x16e   : > { %s5799_s9 = smov [#allocation24]   ;;  %s5800_s20 = smov [#allocation27]  }
 0x16f   : > { %s878_s6 = sshll.u32 %s5799_s9, 4  ;;  %s899_s11 = sshll.u32 %s5800_s20, 4  ;;  %s879_s6 = int_to_ptr.vmem [resolvable:$true] %s878_s6  ;;  %s6259_s11 = int_to_ptr.vmem [resolvable:$true] %s899_s11 }
 0x170   : > { %s5400_s0 = scalar_lea.hbm %s5886_s30, 16 }
 0x171   : > { %p5401_p6 = scmp.ne.s32.totalorder %s5886_s30, %s5400_s0  ;;  %p5407_p4 = scmp.lt.u32.totalorder %s5400_s0, %s5886_s30 }
 0x173   : > { %p5403_p13 = pnand %p5401_p6, %p6978_p8 }
 0x175   : > { %p5404_p0 = pneg %p5403_p13 }
 0x177   : > { %p5409_p10 = pnand %p5407_p4, %p5404_p0 }
 0x179   : > { %5412 = shalt.err (!%p5409_p10)
}
 0x17a   : > { %s5413_s8 = scalar_lea.vmem %s879_s6, 16  ;;  %s5420_s25 = scalar_lea.vmem %s879_s6, 32 }
 0x17b   : > { %p5414_p5 = scmp.ne.s32.totalorder %s879_s6, %s5413_s8  ;;  %p5421_p1 = scmp.lt.s32.totalorder %s879_s6, %s879_s6 }
 0x17c   : > { %p5422_p9 = scmp.lt.s32.totalorder %s5420_s25, %s5413_s8 }
 0x17d   : > { %p5416_p2 = pnand %p5414_p5, %p6978_p8 }
 0x17e   : > { %p5423_p11 = por %p5422_p9, %p5421_p1 }
 0x17f   : > { %p5417_p7 = pneg %p5416_p2 }
 0x181   : > { %p5424_p12 = pnand %p5423_p11, %p5417_p7 }
 0x183   : > { %5427 = shalt.err (!%p5424_p12)
}
 0x184   : > { %4727 = dma.hbm_to_vmem [thread:$0]  (!%p6979_p3), %s5886_s30, 16, %s879_s6, [#allocation23]  }
 0x185   : > { %s5428_s9 = scalar_lea.hbm %s6951_s12, 1024 }
 0x186   : > { %p5429_p6 = scmp.ne.s32.totalorder %s6951_s12, %s5428_s9  ;;  %p5435_p4 = scmp.lt.u32.totalorder %s5428_s9, %s6951_s12 }
 0x188   : > { %p5431_p13 = pnand %p5429_p6, %p6978_p8 }
 0x18a   : > { %p5432_p0 = pneg %p5431_p13 }
 0x18c   : > { %p5437_p10 = pnand %p5435_p4, %p5432_p0 }
 0x18e   : > { %5440 = shalt.err (!%p5437_p10)
}
 0x18f   : > { %s5441_s8 = scalar_lea.vmem %s6259_s11, 1024  ;;  %p5449_p1 = scmp.lt.s32.totalorder %s6259_s11, %s6259_s11 }
 0x190   : > { %p5442_p5 = scmp.ne.s32.totalorder %s6259_s11, %s5441_s8  ;;  %p5450_p9 = scmp.lt.s32.totalorder %s5441_s8, %s5441_s8 }
 0x192   : > { %p5444_p2 = pnand %p5442_p5, %p6978_p8  ;;  %p5451_p11 = por %p5450_p9, %p5449_p1 }
 0x194   : > { %p5445_p7 = pneg %p5444_p2 }
 0x196   : > { %p5452_p12 = pnand %p5451_p11, %p5445_p7 }
 0x198   : > { %5455 = shalt.err (!%p5452_p12)
}
 0x199   : > { %4733 = dma.hbm_to_vmem [thread:$0]  (!%p6979_p3), %s6951_s12, 1024, %s6259_s11, [#allocation26], %s6981_s17, %s6981_s17, %s6980_s24  }
 0x19a   : > { %s5801_s6 = smov [#allocation30]   ;;  %s5802_s0 = smov [#allocation33]  }
 0x19b   : > { %s923_s20 = sshll.u32 %s5801_s6, 4  ;;  %s953_s25 = sshll.u32 %s5802_s0, 4  ;;  %s924_s20 = int_to_ptr.vmem [resolvable:$true] %s923_s20  ;;  %s6289_s25 = int_to_ptr.vmem [resolvable:$true] %s953_s25 }
 0x19c   : > { %s5456_s9 = scalar_lea.hbm %s6949_s27, 1024 }
 0x19d   : > { %p5457_p6 = scmp.ne.s32.totalorder %s6949_s27, %s5456_s9  ;;  %p5463_p4 = scmp.lt.u32.totalorder %s5456_s9, %s6949_s27 }
 0x19f   : > { %p5459_p13 = pnand %p5457_p6, %p6978_p8 }
 0x1a1   : > { %p5460_p0 = pneg %p5459_p13 }
 0x1a3   : > { %p5465_p10 = pnand %p5463_p4, %p5460_p0 }
 0x1a5   : > { %5468 = shalt.err (!%p5465_p10)
}
 0x1a6   : > { %s5469_s8 = scalar_lea.vmem %s924_s20, 1024  ;;  %p5477_p1 = scmp.lt.s32.totalorder %s924_s20, %s924_s20 }
 0x1a7   : > { %p5470_p5 = scmp.ne.s32.totalorder %s924_s20, %s5469_s8  ;;  %p5478_p9 = scmp.lt.s32.totalorder %s5469_s8, %s5469_s8 }
 0x1a9   : > { %p5472_p2 = pnand %p5470_p5, %p6978_p8  ;;  %p5479_p11 = por %p5478_p9, %p5477_p1 }
 0x1ab   : > { %p5473_p7 = pneg %p5472_p2 }
 0x1ad   : > { %p5480_p12 = pnand %p5479_p11, %p5473_p7 }
 0x1af   : > { %5483 = shalt.err (!%p5480_p12)
}
 0x1b0   : > { %s6982_s11 = sld [smem:[#allocation69_spill]] }
 0x1b1   : > { %4739 = dma.hbm_to_vmem [thread:$0]  (!%p6979_p3), %s6949_s27, 1024, %s924_s20, [#allocation29], %s6981_s17, %s6981_s17, %s6980_s24  }
 0x1b6   : > { %s5484_s6 = scalar_lea.hbm %s6982_s11, 1024 }
 0x1b7   : > { %p5485_p6 = scmp.ne.s32.totalorder %s6982_s11, %s5484_s6  ;;  %p5491_p4 = scmp.lt.u32.totalorder %s5484_s6, %s6982_s11 }
 0x1b9   : > { %p5487_p13 = pnand %p5485_p6, %p6978_p8 }
 0x1bb   : > { %p5488_p0 = pneg %p5487_p13 }
 0x1bd   : > { %p5493_p10 = pnand %p5491_p4, %p5488_p0 }
 0x1bf   : > { %5496 = shalt.err (!%p5493_p10)
}
 0x1c0   : > { %s5497_s0 = scalar_lea.vmem %s6289_s25, 1024  ;;  %p5505_p1 = scmp.lt.s32.totalorder %s6289_s25, %s6289_s25 }
 0x1c1   : > { %p5498_p5 = scmp.ne.s32.totalorder %s6289_s25, %s5497_s0  ;;  %p5506_p9 = scmp.lt.s32.totalorder %s5497_s0, %s5497_s0 }
 0x1c3   : > { %p5500_p2 = pnand %p5498_p5, %p6978_p8  ;;  %p5507_p11 = por %p5506_p9, %p5505_p1 }
 0x1c5   : > { %p5501_p7 = pneg %p5500_p2 }
 0x1c7   : > { %p5508_p12 = pnand %p5507_p11, %p5501_p7 }
 0x1c9   : > { %5511 = shalt.err (!%p5508_p12)
}
 0x1ca   : > { %s6983_s20 = sld [smem:[#allocation50_spill]]  ;;  %s6984_s9 = sld [smem:[#allocation75_spill]] }
 0x1cb   : > { %4745 = dma.hbm_to_vmem [thread:$0]  (!%p6979_p3), %s6982_s11, 1024, %s6289_s25, [#allocation32], %s6981_s17, %s6981_s17, %s6980_s24  }
 0x1cc   : > { %s5803_s8 = smov [#allocation36]   ;;  %s6985_s0 = sshll.u32 %s5748_s22, 8 }
 0x1cd   : > { %s991_s6 = sshll.u32 %s5803_s8, 4  ;;  %s992_s6 = int_to_ptr.vmem [resolvable:$true] %s991_s6 }
 0x1d0   : > { %s6325_s12 = scalar_lea.hbm %s6983_s20, %s6985_s0  ;;  %s5512_s19 = scalar_lea.hbm %s6984_s9, 2048 }
 0x1d1   : > { %p5513_p6 = scmp.ne.s32.totalorder %s6984_s9, %s5512_s19  ;;  %p5519_p4 = scmp.lt.u32.totalorder %s5512_s19, %s6984_s9 }
 0x1d3   : > { %p5515_p13 = pnand %p5513_p6, %p6978_p8 }
 0x1d5   : > { %p5516_p0 = pneg %p5515_p13 }
 0x1d7   : > { %p5521_p10 = pnand %p5519_p4, %p5516_p0 }
 0x1d9   : > { %5524 = shalt.err (!%p5521_p10)
}
 0x1da   : > { %s5525_s27 = scalar_lea.vmem %s992_s6, 2048  ;;  %p5533_p1 = scmp.lt.s32.totalorder %s992_s6, %s992_s6 }
 0x1db   : > { %p5526_p5 = scmp.ne.s32.totalorder %s992_s6, %s5525_s27  ;;  %p5534_p9 = scmp.lt.s32.totalorder %s5525_s27, %s5525_s27 }
 0x1dd   : > { %p5528_p2 = pnand %p5526_p5, %p6978_p8  ;;  %p5535_p11 = por %p5534_p9, %p5533_p1 }
 0x1df   : > { %p5529_p7 = pneg %p5528_p2 }
 0x1e1   : > { %p5536_p12 = pnand %p5535_p11, %p5529_p7 }
 0x1e3   : > { %5539 = shalt.err (!%p5536_p12)
}
 0x1e4   : > { %4751 = dma.hbm_to_vmem [thread:$0]  (!%p6979_p3), %s6984_s9, 2048, %s992_s6, [#allocation35], %s6981_s17, %s6981_s17, %s6980_s24  }
 0x1e5   : > { %s6986_s19 = sshll.u32 %s6175_s21, 4  ;;  %s4082_s25 = sshll.u32 %s6175_s21, 2 }
 0x1e6   : > { %s1018_s27 = scalar_lea.vmem [#allocation7], %s6986_s19  ;;  %s1015_s7 = scalar_lea.sflag [#allocation8], %s6175_s21 }
 0x1e7   : > { %s1025_s1 = sshll.u32 %s1018_s27, 4  ;;  %s5540_s8 = scalar_lea.hbm %s6325_s12, 256  ;;  %s6343_s1 = int_to_ptr.vmem [resolvable:$true] %s1025_s1 }
 0x1e8   : > { %p5541_p8 = scmp.ne.s32.totalorder %s6325_s12, %s5540_s8  ;;  %p6987_p6 = scmp.ne.s32.totalorder %s6975_s2, 0 }
 0x1e9   : > { %s5545_s0 = scalar_lea.hbm %s6983_s20, 512  ;;  %p5546_p4 = scmp.lt.u32.totalorder %s6325_s12, %s6983_s20 }
 0x1ea   : > { %p5543_p13 = pnand %p5541_p8, %p6987_p6  ;;  %p5547_p10 = scmp.lt.u32.totalorder %s5545_s0, %s5540_s8 }
 0x1eb   : > { %p5549_p2 = scmp.lt.u32.totalorder %s5540_s8, %s6325_s12 }
 0x1ec   : > { %p5544_p0 = pneg %p5543_p13  ;;  %p5548_p5 = por %p5547_p10, %p5546_p4 }
 0x1ee   : > { %p5550_p7 = por %p5549_p2, %p5548_p5 }
 0x1f0   : > { %p5551_p1 = pnand %p5550_p7, %p5544_p0 }
 0x1f2   : > { %5554 = shalt.err (!%p5551_p1)
}
 0x1f3   : > { %s5555_s24 = scalar_lea.vmem %s6343_s1, 256  ;;  %s5804_s17 = smov [#allocation7]  }
 0x1f4   : > { %p5556_p3 = scmp.ne.s32.totalorder %s6343_s1, %s5555_s24  ;;  %s5560_s6 = sshll.u32 %s5804_s17, 4  ;;  %s5561_s6 = int_to_ptr.vmem [resolvable:$false] %s5560_s6 }
 0x1f5   : > { %s5562_s19 = scalar_lea.vmem %s5561_s6, 512  ;;  %p5563_p12 = scmp.lt.s32.totalorder %s6343_s1, %s5561_s6 }
 0x1f6   : > { %p5558_p9 = pnand %p5556_p3, %p6987_p6  ;;  %p5564_p8 = scmp.lt.s32.totalorder %s5562_s19, %s5555_s24 }
 0x1f8   : > { %p5559_p11 = pneg %p5558_p9  ;;  %p5565_p13 = por %p5564_p8, %p5563_p12 }
 0x1fa   : > { %p5566_p4 = pnand %p5565_p13, %p5559_p11 }
 0x1fc   : > { %5569 = shalt.err (!%p5566_p4)
}
 0x1fd   : > { %p6988_p0 = scmp.ne.s32.totalorder %s6974_s14, 0  ;;  %s6989_s27 = sld [smem:[#allocation52_spill]] }
 0x1fe   : > { %s4243_s8 = sshll.u32 %s5748_s22, 6  ;;  %s1060_s0 = scalar_lea.vmem [#allocation12], %s4082_s25 }
 0x1ff   : > { %4755 = dma.hbm_to_vmem [thread:$0]  (!%p6988_p0), %s6325_s12, 256, %s6343_s1, %s1015_s7, %s6977_s29, %s6977_s29, %s6976_s5  }
 0x200   : > { %s1067_s24 = sshll.u32 %s1060_s0, 4  ;;  %s6376_s24 = int_to_ptr.vmem [resolvable:$true] %s1067_s24 }
 0x203   : > { %s6374_s17 = scalar_lea.hbm %s6989_s27, %s4243_s8  ;;  %s5575_s19 = scalar_lea.hbm %s6989_s27, 128 }
 0x204   : > { %s5570_s6 = scalar_lea.hbm %s6374_s17, 64  ;;  %p5576_p7 = scmp.lt.u32.totalorder %s6374_s17, %s6989_s27 }
 0x205   : > { %p5571_p10 = scmp.ne.s32.totalorder %s6374_s17, %s5570_s6  ;;  %p5577_p1 = scmp.lt.u32.totalorder %s5575_s19, %s5570_s6 }
 0x206   : > { %p5579_p9 = scmp.lt.u32.totalorder %s5570_s6, %s6374_s17 }
 0x207   : > { %p5573_p5 = pnand %p5571_p10, %p6987_p6  ;;  %p5578_p3 = por %p5577_p1, %p5576_p7 }
 0x209   : > { %p5574_p2 = pneg %p5573_p5  ;;  %p5580_p11 = por %p5579_p9, %p5578_p3 }
 0x20b   : > { %p5581_p12 = pnand %p5580_p11, %p5574_p2 }
 0x20d   : > { %5584 = shalt.err (!%p5581_p12)
}
 0x20e   : > { %s5585_s12 = scalar_lea.vmem %s6376_s24, 64  ;;  %s5805_s5 = smov [#allocation12]  }
 0x20f   : > { %p5586_p8 = scmp.ne.s32.totalorder %s6376_s24, %s5585_s12  ;;  %s5590_s29 = sshll.u32 %s5805_s5, 4  ;;  %s5591_s29 = int_to_ptr.vmem [resolvable:$false] %s5590_s29 }
 0x210   : > { %s5592_s1 = scalar_lea.vmem %s5591_s29, 128  ;;  %p5593_p10 = scmp.lt.s32.totalorder %s6376_s24, %s5591_s29 }
 0x211   : > { %p5588_p13 = pnand %p5586_p8, %p6987_p6  ;;  %p5594_p5 = scmp.lt.s32.totalorder %s5592_s1, %s5585_s12 }
 0x213   : > { %p5589_p4 = pneg %p5588_p13  ;;  %p5595_p7 = por %p5594_p5, %p5593_p10 }
 0x215   : > { %p5596_p1 = pnand %p5595_p7, %p5589_p4 }
 0x217   : > { %5599 = shalt.err (!%p5596_p1)
}
 0x218   : > { %s5806_s7 = smov 32   ;;  %s6990_s0 = sld [smem:[#allocation53_spill]] }
 0x219   : > { %s5807_s19 = smov 2   ;;  %s1081_s5 = scalar_lea.vmem [#allocation13], %s4082_s25 }
 0x21a   : > { %4761 = dma.hbm_to_vmem [thread:$0]  (!%p6988_p0), %s6374_s17, 64, %s6376_s24, %s6197_s10, %s5806_s7, %s5806_s7, %s5807_s19  }
 0x21b   : > { %s1088_s29 = sshll.u32 %s1081_s5, 4  ;;  %s6992_s1 = sand.u32 1, %s5752_s23   ;;  %s6406_s29 = int_to_ptr.vmem [resolvable:$true] %s1088_s29 }
 0x21c   : > { %s6410_s9 = scalar_lea.sflag [#allocation14], %s6992_s1 }
 0x21e   : > { %s6991_s6 = smov %s6990_s0  ;;  %s6402_s12 = scalar_lea.hbm %s6990_s0, %s4243_s8 }
 0x21f   : > { %s5600_s11 = scalar_lea.hbm %s6402_s12, 64  ;;  %s5605_s10 = scalar_lea.hbm %s6991_s6, 128 }
 0x220   : > { %p5601_p2 = scmp.ne.s32.totalorder %s6402_s12, %s5600_s11  ;;  %p5606_p11 = scmp.lt.u32.totalorder %s6402_s12, %s6991_s6 }
 0x221   : > { %p5607_p12 = scmp.lt.u32.totalorder %s5605_s10, %s5600_s11  ;;  %p5609_p13 = scmp.lt.u32.totalorder %s5600_s11, %s6402_s12 }
 0x222   : > { %p5603_p3 = pnand %p5601_p2, %p6987_p6 }
 0x223   : > { %p5608_p8 = por %p5607_p12, %p5606_p11 }
 0x224   : > { %p5604_p9 = pneg %p5603_p3 }
 0x225   : > { %p5610_p4 = por %p5609_p13, %p5608_p8 }
 0x227   : > { %p5611_p10 = pnand %p5610_p4, %p5604_p9 }
 0x229   : > { %5614 = shalt.err (!%p5611_p10)
}
 0x22a   : > { %s5615_s21 = scalar_lea.vmem %s6406_s29, 64  ;;  %s5808_s25 = smov [#allocation13]  }
 0x22b   : > { %p5616_p5 = scmp.ne.s32.totalorder %s6406_s29, %s5615_s21  ;;  %s5620_s8 = sshll.u32 %s5808_s25, 4  ;;  %s5621_s8 = int_to_ptr.vmem [resolvable:$false] %s5620_s8 }
 0x22c   : > { %s5622_s24 = scalar_lea.vmem %s5621_s8, 128  ;;  %p5623_p2 = scmp.lt.s32.totalorder %s6406_s29, %s5621_s8 }
 0x22d   : > { %p5618_p7 = pnand %p5616_p5, %p6987_p6  ;;  %p5624_p3 = scmp.lt.s32.totalorder %s5622_s24, %s5615_s21 }
 0x22f   : > { %p5619_p1 = pneg %p5618_p7  ;;  %p5625_p11 = por %p5624_p3, %p5623_p2 }
 0x231   : > { %p5626_p12 = pnand %p5625_p11, %p5619_p1 }
 0x233   : > { %5629 = shalt.err (!%p5626_p12)
}
 0x234   : > { %4764 = dma.hbm_to_vmem [thread:$0]  (!%p6988_p0), %s6402_s12, 64, %s6406_s29, %s6410_s9, %s5806_s7, %s5806_s7, %s5807_s19  }
 0x235   : > { %p6993_p6 = scmp.ne.s32.totalorder %s6964_s28, 0 }
 0x236   : > { %s6436_s2 = sand.u32 (!%p6993_p6), 1, %s5736_s16   ;;  %p6994_p9 = scmp.ne.s32.totalorder (!%p6993_p6), %s6970_s13, 0 }
 0x237   : > { %1100 = sbr.rel (%p6993_p6) target bundleno = 6524 (0x197c), region = 140  ;;  %s6439_s11 = sshll.u32 (!%p6993_p6), %s6436_s2, 4 }
 0x238   : > { %s1103_s14 = scalar_lea.sflag (!%p6993_p6), [#allocation8], %s6436_s2  ;;  %s6443_s17 = scalar_lea.vmem (!%p6993_p6), [#allocation7], %s6439_s11 }
 0x23e   : > { %5683 = dma.done.wait (%p6994_p9), %s1103_s14, 256  }
 0x23f   : > { %5685 = vsyncadd (%p6994_p9), %s1103_s14, 4294967040  ;;  %s1111_s28 = sand.u32 1, %s6009_s26   ;;  %s1115_s7 = scalar_lea.vmem [#allocation10], %s6439_s11 }
 0x240   : > { %s1112_s9 = scalar_lea.sflag [#allocation11], %s1111_s28 }
 0x241   : > { %5687 = dma.done.wait (%p6994_p9), %s1112_s9, 320  }
 0x242   : > { %5689 = vsyncadd (%p6994_p9), %s1112_s9, 4294966976  ;;  %s4091_s0 = sshll.u32 %s6436_s2, 2  ;;  %s1130_s12 = scalar_lea.sflag [#allocation14], %s1111_s28 }
 0x243   : > { %s6456_s19 = scalar_lea.vmem [#allocation12], %s4091_s0  ;;  %s6458_s5 = scalar_lea.vmem [#allocation13], %s4091_s0 }
 0x244   : > { %5691 = dma.done.wait (%p6994_p9), %s1130_s12, 64  }
 0x245   : > { %5693 = vsyncadd (%p6994_p9), %s1130_s12, 4294967232  ;;  %p6995_p0 = scmp.eq.s32.totalorder %s6009_s26, 0 }
 0x247   : > { %5695 = dma.done.wait (%p6995_p0), [#allocation14], 1024   ;;  %p6996_p8 = pmov %p6995_p0 }
 0x248   : > { %p6997_p13 = pmov %p6995_p0 }
 0x249   : > { %5697 = vsyncadd (%p6996_p8), [#allocation14], 4294966272 }
 0x24a   : > { %5699 = dma.done.wait (%p6997_p13), [#allocation17], 2048   ;;  %p6998_p4 = pmov %p6995_p0 }
 0x24b   : > { %p6999_p10 = pmov %p6995_p0 }
 0x24c   : > { %5701 = vsyncadd (%p6998_p4), [#allocation17], 4294965248 }
 0x24d   : > { %5703 = dma.done.wait (%p6999_p10), [#allocation20], 1040   ;;  %p7000_p5 = pmov %p6995_p0 }
 0x24e   : > { %p7001_p7 = pmov %p6995_p0 }
 0x24f   : > { %5705 = vsyncadd (%p7000_p5), [#allocation20], 4294966256 }
 0x250   : > { %5707 = dma.done.wait (%p7001_p7), [#allocation23], 32   ;;  %p7002_p1 = pmov %p6995_p0 }
 0x251   : > { %p7003_p2 = pmov %p6995_p0 }
 0x252   : > { %5709 = vsyncadd (%p7002_p1), [#allocation23], 4294967264 }
 0x253   : > { %5711 = dma.done.wait (%p7003_p2), [#allocation26], 1040   ;;  %p7004_p3 = pmov %p6995_p0 }
 0x254   : > { %p7005_p11 = pmov %p6995_p0 }
 0x255   : > { %5713 = vsyncadd (%p7004_p3), [#allocation26], 4294966256 }
 0x256   : > { %5715 = dma.done.wait (%p7005_p11), [#allocation29], 1040   ;;  %p7006_p12 = pmov %p6995_p0 }
 0x257   : > { %p7007_p6 = pmov %p6995_p0 }
 0x258   : > { %5717 = vsyncadd (%p7006_p12), [#allocation29], 4294966256 }
 0x259   : > { %5719 = dma.done.wait (%p7007_p6), [#allocation32], 1040   ;;  %p7008_p9 = pmov %p6995_p0 }
 0x25b   : > { %5721 = vsyncadd (%p7008_p9), [#allocation32], 4294966256 }
 0x25c   : > { %5723 = dma.done.wait (%p6995_p0), [#allocation35], 4096   ;;  %p7009_p8 = pmov %p6995_p0 }
 0x25d   : > { %v5809_v0 = vmov 0.0   ;;  %vm5810_vm0 = vmmov 0   ;;  %v4908_v1 = vld [vmem:[#allocation16] sm:$0xff]   ;;  %v4909_v2 = vld [vmem:[#allocation16 + $0x8] sm:$0xff]   ;;  %v4910_v3 = vld [vmem:[#allocation16 + $0x10] sm:$0xff]   ;;  %s7010_s26 = sld [smem:[#allocation67_spill]] }
 0x25e   : > { %5725 = vsyncadd (%p7009_p8), [#allocation35], 4294963200  ;;  %4380 = vmatprep.subr.bf16.mxu0 %v5809_v0  ;;  %4396 = vmatprep.mubr.msk.bf16.mxu0 %vm5810_vm0, %v5809_v0  ;;  %v4911_v4 = vld [vmem:[#allocation16 + $0x18] sm:$0xff]   ;;  %v4912_v5 = vld [vmem:[#allocation16 + $0x20] sm:$0xff]   ;;  %s7011_s13 = sld [smem:[#allocation57_spill]]  ;;  %vm1901_vm1 = vcmask 261120  }
 0x25f   : > { %4400 = vmatprep.subr.bf16.mxu1 %v5809_v0  ;;  %4416 = vmatprep.mubr.msk.bf16.mxu1 %vm5810_vm0, %v5809_v0  ;;  %v4913_v6 = vld [vmem:[#allocation16 + $0x28] sm:$0xff]   ;;  %v4914_v7 = vld [vmem:[#allocation16 + $0x30] sm:$0xff]   ;;  %v4915_v8 = vld [vmem:[#allocation16 + $0x38] sm:$0xff]   ;;  %s7012_s29 = sld [smem:[#allocation68_spill]]  ;;  %s7013_s1 = sld [smem:[#allocation55_spill]]  ;;  %vm1949_vm4 = vcmask 130048  }
 0x260   : > { %4381 = vmatpush3.bf16.msra.mxu0 %v4908_v1  ;;  %v1291_v9 = vld [vmem:[%s6443_s17] sm:$0xff]  ;;  %v1292_v10 = vld [vmem:[%s6443_s17 + $0x8] sm:$0xff]  ;;  %s5811_s10 = smov 96   ;;  %s5812_s21 = smov 64   ;;  %vm2148_vm5 = vcmask 523520   ;;  %vm2276_vm6 = vcmask 785920  }
 0x261   : > { %4382 = vmatprep.subr.bf16.mxu0 %v5809_v0  ;;  %v4932_v11 = vld [vmem:[#allocation18] sm:$0xff]   ;;  %v4933_v12 = vld [vmem:[#allocation18 + $0x8] sm:$0xff]   ;;  %v6511_v13 = vpack.c.bf16 %v1292_v10, %v1291_v9  ;;  %v4934_v15 = vld [vmem:[#allocation18 + $0x10] sm:$0xff]   ;;  %s5813_s25 = smov 32   ;;  %vm2404_vm7 = vcmask 1048320   ;;  %s7014_s8 = sld [smem:[#allocation70_spill]] }
 0x262   : > { %4401 = vmatpush3.bf16.msra.mxu1 %v4932_v11  ;;  %v4916_v14 = vld [vmem:[#allocation30] sm:$0xff]   ;;  %v4917_v16 = vld [vmem:[#allocation30 + $0x8] sm:$0xff]   ;;  %v4918_v18 = vld [vmem:[#allocation30 + $0x10] sm:$0xff]   ;;  %s7015_s24 = sld [smem:[#allocation71_spill]]  ;;  %s7016_s14 = sld [smem:[#allocation72_spill]] }
 0x263   : > { %4402 = vmatprep.subr.bf16.mxu1 %v5809_v0  ;;  %v4935_v17 = vld [vmem:[#allocation18 + $0x18] sm:$0xff]   ;;  %v4936_v19 = vld [vmem:[#allocation18 + $0x20] sm:$0xff]   ;;  %v4937_v21 = vld [vmem:[#allocation18 + $0x28] sm:$0xff]   ;;  %s7018_s28 = sld [smem:[#allocation76_spill]]  ;;  %s7019_s9 = sld [smem:[#allocation77_spill]] }
 0x264   : > { %4383 = vmatpush3.bf16.msra.mxu0 %v4909_v2  ;;  %v4919_v20 = vld [vmem:[#allocation30 + $0x18] sm:$0xff]   ;;  %v4920_v22 = vld [vmem:[#allocation30 + $0x20] sm:$0xff]   ;;  %v4921_v24 = vld [vmem:[#allocation30 + $0x28] sm:$0xff]   ;;  %s7021_s0 = sld [smem:[#allocation78_spill]]  ;;  %p7023_p4 = scmp.ne.s32.totalorder %s6971_s18, 0 }
 0x265   : > { %4384 = vmatprep.subr.bf16.mxu0 %v5809_v0  ;;  %v4938_v23 = vld [vmem:[#allocation18 + $0x30] sm:$0xff]   ;;  %v4939_v25 = vld [vmem:[#allocation18 + $0x38] sm:$0xff]   ;;  %v4940_v27 = vld [vmem:[%s7010_s26] sm:$0xff]  }
 0x266   : > { %4403 = vmatpush3.bf16.msra.mxu1 %v4933_v12  ;;  %v4922_v26 = vld [vmem:[#allocation30 + $0x30] sm:$0xff]   ;;  %v4923_v28 = vld [vmem:[#allocation30 + $0x38] sm:$0xff]   ;;  %v4941_v31 = vld [vmem:[%s7010_s26 + $0x8] sm:$0xff]  }
 0x267   : > { %4404 = vmatprep.subr.bf16.mxu1 %v5809_v0  ;;  %v1293_v29 = vld [vmem:[%s1115_s7] sm:$0xff]  ;;  %v1294_v30 = vld [vmem:[%s1115_s7 + $0x8] sm:$0xff]  ;;  %s7020_s7 = sld [smem:[#allocation80_spill]] }
 0x268   : > { %4385 = vmatpush3.bf16.msra.mxu0 %v4910_v3  ;;  %v4924_v32 = vld [vmem:[#allocation15] sm:$0xff]   ;;  %v1540_v33 = vpack.c.bf16 %v1294_v30, %v1293_v29  ;;  %v4942_v34 = vld [vmem:[%s7010_s26 + $0x10] sm:$0xff]   ;;  %v4925_v35 = vld [vmem:[#allocation15 + $0x8] sm:$0xff]  }
 0x269   : > { %4386 = vmatprep.subr.bf16.mxu0 %v5809_v0  ;;  %v4943_v36 = vld [vmem:[%s7010_s26 + $0x18] sm:$0xff]   ;;  %v4926_v37 = vld [vmem:[#allocation15 + $0x10] sm:$0xff]   ;;  %v4944_v38 = vld [vmem:[%s7010_s26 + $0x20] sm:$0xff]  }
 0x26a   : > { %4405 = vmatpush3.bf16.msra.mxu1 %v4934_v15  ;;  %v4927_v39 = vld [vmem:[#allocation15 + $0x18] sm:$0xff]   ;;  %v4945_v40 = vld [vmem:[%s7010_s26 + $0x28] sm:$0xff]   ;;  %v4928_v41 = vld [vmem:[#allocation15 + $0x20] sm:$0xff]  }
 0x26b   : > { %4406 = vmatprep.subr.bf16.mxu1 %v5809_v0  ;;  %v4946_v42 = vld [vmem:[%s7010_s26 + $0x30] sm:$0xff]   ;;  %v4929_v43 = vld [vmem:[#allocation15 + $0x28] sm:$0xff]   ;;  %v4947_v44 = vld [vmem:[%s7010_s26 + $0x38] sm:$0xff]  }
 0x26c   : > { %4387 = vmatpush3.bf16.msra.mxu0 %v4911_v4  ;;  %v4930_v45 = vld [vmem:[#allocation15 + $0x30] sm:$0xff]   ;;  %v4931_v46 = vld [vmem:[#allocation15 + $0x38] sm:$0xff]   ;;  %v4109_v47 = vld [vmem:[%s7011_s13] ss:$0 sm:$0xff] }
 0x26d   : > { %4388 = vmatprep.subr.bf16.mxu0 %v5809_v0  ;;  %v4118_v56 = vld [vmem:[#allocation19] ss:$0 sm:$0xff]  ;;  %v4127_v63 = vld [vmem:[#allocation31] ss:$0 sm:$0xff]  ;;  %v4136_v9 = vld [vmem:[%s7012_s29] ss:$0 sm:$0xff] }
 0x26e   : > { %4407 = vmatpush3.bf16.msra.mxu1 %v4935_v17  ;;  %s4245_s12 = sshll.u32 %s7020_s7, 8 }
 0x26f   : > { %4408 = vmatprep.subr.bf16.mxu1 %v5809_v0  ;;  %s6825_s29 = scalar_lea.hbm %s7021_s0, %s4245_s12 }
 0x270   : > { %4389 = vmatpush3.bf16.msra.mxu0 %v4912_v5 }
 0x271   : > { %4390 = vmatprep.subr.bf16.mxu0 %v5809_v0 }
 0x272   : > { %4409 = vmatpush3.bf16.msra.mxu1 %v4936_v19 }
 0x273   : > { %4410 = vmatprep.subr.bf16.mxu1 %v5809_v0 }
 0x274   : > { %4391 = vmatpush3.bf16.msra.mxu0 %v4913_v6 }
 0x275   : > { %4392 = vmatprep.subr.bf16.mxu0 %v5809_v0 }
 0x276   : > { %4411 = vmatpush3.bf16.msra.mxu1 %v4937_v21 }
 0x277   : > { %4412 = vmatprep.subr.bf16.mxu1 %v5809_v0 }
 0x278   : > { %4393 = vmatpush3.bf16.msra.mxu0 %v4914_v7 }
 0x279   : > { %4394 = vmatprep.subr.bf16.mxu0 %v5809_v0 }
 0x27a   : > { %4413 = vmatpush3.bf16.msra.mxu1 %v4938_v23 }
 0x27b   : > { %4414 = vmatprep.subr.bf16.mxu1 %v5809_v0 }
 0x27c   : > { %4395 = vmatpush3.bf16.msra.mxu0 %v4915_v8 }
 0x27d   : > { %4420 = vmatprep.subr.bf16.mxu0 %v5809_v0 }
 0x27e   : > { %4415 = vmatpush3.bf16.msra.mxu1 %v4939_v25 }
 0x27f   : > { %4397 = vmatmul.mubr.bf16.vlgmr.msra.gmra.mrb[0].mxu0 %v6511_v13  ;;  %4440 = vmatprep.subr.bf16.mxu1 %v5809_v0 }
 0x280   : > { %4421 = vmatpush3.bf16.msra.mxu0 %v4916_v14  ;;  %4436 = vmatprep.mubr.msk.bf16.mxu0 %vm5810_vm0, %v5809_v0 }
 0x281   : > { %4422 = vmatprep.subr.bf16.mxu0 %v5809_v0  ;;  %4417 = vmatmul.mubr.bf16.vlgmr.msra.gmra.mrb[0].mxu1 %v6511_v13 }
 0x282   : > { %4441 = vmatpush3.bf16.msra.mxu1 %v4940_v27  ;;  %4456 = vmatprep.mubr.msk.bf16.mxu1 %vm5810_vm0, %v5809_v0  ;;  %v4247_v27 = vld [vmem:[%s6456_s19] sm:$0xf]   ;;  %s7022_s19 = smov %s7021_s0 }
 0x283   : > { %4442 = vmatprep.subr.bf16.mxu1 %v5809_v0  ;;  %v4249_v29 = vunpack.c.1.s8 %v4247_v27 }
 0x284   : > { %4423 = vmatpush3.bf16.msra.mxu0 %v4917_v16  ;;  %v4145_v16 = vld [vmem:[%s7013_s1] ss:$0 sm:$0xff]  ;;  %s3714_s1 = scalar_lea.sflag [#allocation9], %s6436_s2 }
 0x285   : > { %4424 = vmatprep.subr.bf16.mxu0 %v5809_v0 }
 0x286   : > { %4443 = vmatpush3.bf16.msra.mxu1 %v4941_v31  ;;  %v1766_v31 = vcvt.s32.f32 %v4249_v29 }
 0x287   : > { %4444 = vmatprep.subr.bf16.mxu1 %v5809_v0 }
 0x288   : > { %4425 = vmatpush3.bf16.msra.mxu0 %v4918_v18  ;;  %vm1768_vm3 = vcmp.eq.f32.partialorder %v1766_v31, 0.0 }
 0x289   : > { %4426 = vmatprep.subr.bf16.mxu0 %v5809_v0 }
 0x28a   : > { %4445 = vmatpush3.bf16.msra.mxu1 %v4942_v34  ;;  %v6598_v34 = vsel %vm1768_vm3, -10000.0, %v5809_v0 }
 0x28b   : > { %4446 = vmatprep.subr.bf16.mxu1 %v5809_v0 }
 0x28c   : > { %4427 = vmatpush3.bf16.msra.mxu0 %v4919_v20 }
 0x28d   : > { %4428 = vmatprep.subr.bf16.mxu0 %v5809_v0 }
 0x28e   : > { %4447 = vmatpush3.bf16.msra.mxu1 %v4943_v36 }
 0x28f   : > { %4448 = vmatprep.subr.bf16.mxu1 %v5809_v0 }
 0x290   : > { %4429 = vmatpush3.bf16.msra.mxu0 %v4920_v22 }
 0x291   : > { %4430 = vmatprep.subr.bf16.mxu0 %v5809_v0 }
 0x292   : > { %4449 = vmatpush3.bf16.msra.mxu1 %v4944_v38 }
 0x293   : > { %4450 = vmatprep.subr.bf16.mxu1 %v5809_v0 }
 0x294   : > { %4431 = vmatpush3.bf16.msra.mxu0 %v4921_v24 }
 0x295   : > { %4432 = vmatprep.subr.bf16.mxu0 %v5809_v0 }
 0x296   : > { %4451 = vmatpush3.bf16.msra.mxu1 %v4945_v40 }
 0x297   : > { %4452 = vmatprep.subr.bf16.mxu1 %v5809_v0 }
 0x298   : > { %4433 = vmatpush3.bf16.msra.mxu0 %v4922_v26 }
 0x299   : > { %4434 = vmatprep.subr.bf16.mxu0 %v5809_v0 }
 0x29a   : > { %4453 = vmatpush3.bf16.msra.mxu1 %v4946_v42 }
 0x29b   : > { %4454 = vmatprep.subr.bf16.mxu1 %v5809_v0 }
 0x29c   : > { %4435 = vmatpush3.bf16.msra.mxu0 %v4923_v28  ;;  %v4248_v28 = vunpack.c.0.s8 %v4247_v27 }
 0x29d   : > { %4460 = vmatprep.subr.bf16.mxu0 %v5809_v0 }
 0x29e   : > { %4455 = vmatpush3.bf16.msra.mxu1 %v4947_v44  ;;  %v1765_v30 = vcvt.s32.f32 %v4248_v28 }
 0x29f   : > { %4437 = vmatmul.mubr.bf16.vlgmr.msra.gmra.mrb[4].mxu0 %v1540_v33  ;;  %4480 = vmatprep.subr.bf16.mxu1 %v5809_v0 }
 0x2a0   : > { %4461 = vmatpush3.bf16.msra.mxu0 %v4924_v32  ;;  %4476 = vmatprep.mubr.msk.bf16.mxu0 %vm5810_vm0, %v5809_v0  ;;  %vm1767_vm2 = vcmp.eq.f32.partialorder %v1765_v30, 0.0 }
 0x2a1   : > { %4462 = vmatprep.subr.bf16.mxu0 %v5809_v0  ;;  %4457 = vmatmul.mubr.bf16.vlgmr.msra.gmra.mrb[4].mxu1 %v1540_v33  ;;  %v6595_v32 = vsel %vm1767_vm2, -10000.0, %v5809_v0 }
 0x2a2   : > { %4482 = vmatprep.mubr.msk.bf16.mxu1 %vm5810_vm0, %v5809_v0 }
 0x2a4   : > { %4463 = vmatpush3.bf16.msra.mxu0 %v4925_v35 }
 0x2a5   : > { %4464 = vmatprep.subr.bf16.mxu0 %v5809_v0 }
 0x2a8   : > { %4465 = vmatpush3.bf16.msra.mxu0 %v4926_v37 }
 0x2a9   : > { %4466 = vmatprep.subr.bf16.mxu0 %v5809_v0 }
 0x2ac   : > { %4467 = vmatpush3.bf16.msra.mxu0 %v4927_v39 }
 0x2ad   : > { %4468 = vmatprep.subr.bf16.mxu0 %v5809_v0 }
 0x2b0   : > { %4469 = vmatpush3.bf16.msra.mxu0 %v4928_v41 }
 0x2b1   : > { %4470 = vmatprep.subr.bf16.mxu0 %v5809_v0 }
 0x2b4   : > { %4471 = vmatpush3.bf16.msra.mxu0 %v4929_v43 }
 0x2b5   : > { %4472 = vmatprep.subr.bf16.mxu0 %v5809_v0 }
 0x2b8   : > { %4473 = vmatpush3.bf16.msra.mxu0 %v4930_v45 }
 0x2b9   : > { %4474 = vmatprep.subr.bf16.mxu0 %v5809_v0 }
 0x2bc   : > { %4475 = vmatpush3.bf16.msra.mxu0 %v4931_v46 }
 0x2bd   : > { %4528 = vmatprep.subr.bf16.mxu0 %v5809_v0 }
 0x2bf   : > { %4477 = vmatmul.mubr.bf16.vlgmr.msra.gmra.mrb[8].mxu0 %v6511_v13 }
 0x2c0   : > { %4544 = vmatprep.mubr.msk.bf16.mxu0 %vm5810_vm0, %v5809_v0 }
 0x352   : > { %v1401_v48 = vpop.f32.mrb[0].mxu0 }
 0x353   : > { %v1402_v49 = vadd.f32 %v4109_v47, %v1401_v48  ;;  %v4398_v50 = vpop.f32.mrb[1].mxu0 }
 0x354   : > { %v1404_v51 = vpop.f32.mrb[2].mxu0  ;;  %v1515_v57 = vpop.f32.mrb[0].mxu1 }
 0x355   : > { %v1405_v52 = vadd.f32 %v4109_v47, %v1404_v51  ;;  %v4399_v53 = vpop.f32.mrb[3].mxu0  ;;  %v1516_v58 = vadd.f32 %v4118_v56, %v1515_v57  ;;  %v4418_v59 = vpop.f32.mrb[1].mxu1 }
 0x356   : > { %v1518_v60 = vpop.f32.mrb[2].mxu1 }
 0x357   : > { %v6572_v54 = vpack.c.bf16 %v1405_v52, %v1402_v49  ;;  %v1519_v61 = vadd.f32 %v4118_v56, %v1518_v60  ;;  %v4419_v62 = vpop.f32.mrb[3].mxu1 }
 0x359   : > { %v1906_v55 = vsel %vm1901_vm1, %v6572_v54, 0  ;;  %v6577_v1 = vpack.c.bf16 %v1519_v61, %v1516_v58 }
 0x35a   : > { %4481 = vmatpush3.bf16.xpose.msra.mxu1 %v1906_v55 }
 0x35b   : > { %4486 = vmatprep.subr.bf16.mxu1 %v5809_v0 }
 0x372   : > { %v1630_v2 = vpop.f32.mrb[4].mxu0 }
 0x373   : > { %v1631_v3 = vadd.f32 %v4127_v63, %v1630_v2  ;;  %v4438_v4 = vpop.f32.mrb[5].mxu0 }
 0x374   : > { %v1633_v5 = vpop.f32.mrb[6].mxu0  ;;  %v1744_v10 = vpop.f32.mrb[4].mxu1 }
 0x375   : > { %v1634_v6 = vadd.f32 %v4127_v63, %v1633_v5  ;;  %v4439_v7 = vpop.f32.mrb[7].mxu0  ;;  %v1745_v11 = vadd.f32 %v4136_v9, %v1744_v10  ;;  %v4458_v12 = vpop.f32.mrb[5].mxu1 }
 0x376   : > { %v1747_v13 = vpop.f32.mrb[6].mxu1 }
 0x377   : > { %v6579_v8 = vpack.c.bf16 %v1634_v6, %v1631_v3  ;;  %v1748_v14 = vadd.f32 %v4136_v9, %v1747_v13  ;;  %v4459_v15 = vpop.f32.mrb[7].mxu1 }
 0x379   : > { %v6583_v17 = vpack.c.bf16 %v1748_v14, %v1745_v11 }
 0x392   : > { %v1889_v18 = vpop.f32.mrb[8].mxu0 }
 0x393   : > { %v1890_v19 = vadd.f32 %v4145_v16, %v1889_v18  ;;  %v4478_v20 = vpop.f32.mrb[9].mxu0 }
 0x394   : > { %v1892_v21 = vpop.f32.mrb[10].mxu0 }
 0x395   : > { %v1893_v22 = vadd.f32 %v4145_v16, %v1892_v21  ;;  %v4479_v23 = vpop.f32.mrb[11].mxu0  ;;  %v1896_v24 = vmul.f32 0.17677669, %v1890_v19 }
 0x397   : > { %v1897_v25 = vmul.f32 0.17677669, %v1893_v22 }
 0x399   : > { %v6585_v26 = vpack.c.bf16 %v1897_v25, %v1896_v24 }
 0x39b   : > { %4483 = vmatmul.mubr.msk.bf16.vlgmr.msra.gmra.mrb[8].mxu1 %vm1901_vm1, %v6585_v26 }
 0x39c   : > { %4487 = vmatpush3.bf16.msra.mxu1 %v6577_v1  ;;  %4488 = vmatprep.mubr.msk.bf16.mxu1 %vm5810_vm0, %v5809_v0 }
 0x39d   : > { %4492 = vmatprep.subr.bf16.mxu1 %v5809_v0 }
 0x46e   : > { %v1942_v33 = vpop.f32.mrb[8].mxu1 }
 0x46f   : > { %v1943_v35 = vadd.f32 %v1942_v33, %v6595_v32  ;;  %v4484_v36 = vpop.f32.mrb[9].mxu1 }
 0x470   : > { %v1945_v37 = vpop.f32.mrb[10].mxu1 }
 0x471   : > { %v1946_v38 = vadd.f32 %v1945_v37, %v6598_v34  ;;  %v4485_v39 = vpop.f32.mrb[11].mxu1  ;;  %v1950_v40 = vsel %vm1949_vm4, %v1943_v35, -inf }
 0x472   : > { %1951 = vmax.xlane.f32.xlu0 %v1950_v40 }
 0x473   : > { %v1953_v41 = vsel %vm1949_vm4, %v1946_v38, -inf }
 0x476   : > { %1954 = vmax.xlane.f32.xlu0 %v1953_v41 }
 0x48c   : > { %2023 = vrot.lane.b32.xlu0 %v6572_v54, %s5811_s10 }
 0x4ff   : > { %v1952_v42 = vpop.xlane.xlu0 %1951 }
 0x500   : > { %v1956_v43 = vsub.f32 %v1943_v35, %v1952_v42 }
 0x502   : > { %v1958_v44 = vmul.f32 1.442695, %v1956_v43 }
 0x503   : > { %v1955_v45 = vpop.xlane.xlu0 %1954 }
 0x504   : > { %5012 = vpow2.f32 %v1958_v44  ;;  %v1957_v46 = vsub.f32 %v1946_v38, %v1955_v45 }
 0x506   : > { %v1960_v47 = vmul.f32 1.442695, %v1957_v46 }
 0x507   : > { %v2024_v59 = vpop.permute.xlu0 %2023 }
 0x508   : > { %5014 = vpow2.f32 %v1960_v47  ;;  %v2029_v61 = vsel %vm1901_vm1, %v2024_v59, 0 }
 0x50e   : > { %v5013_v48 = vpop.eup %5012 }
 0x50f   : > { %v1962_v49 = vsel %vm1949_vm4, %v5013_v48, 0.0 }
 0x510   : > { %1963 = vadd.xlane.f32.xlu1 %v1962_v49 }
 0x512   : > { %v5015_v50 = vpop.eup %5014 }
 0x513   : > { %v1965_v51 = vsel %vm1949_vm4, %v5015_v50, 0.0 }
 0x514   : > { %1966 = vadd.xlane.f32.xlu1 %v1965_v51 }
 0x525   : > { %2020 = vrot.lane.b32.xlu1 %v6585_v26, %s5811_s10 }
 0x59d   : > { %v1964_v52 = vpop.xlane.xlu1 %1963 }
 0x59e   : > { %5016 = vrcp.f32 %v1964_v52 }
 0x5a1   : > { %v1967_v53 = vpop.xlane.xlu1 %1966 }
 0x5a2   : > { %5018 = vrcp.f32 %v1967_v53 }
 0x5a5   : > { %v2021_v62 = vpop.permute.xlu1 %2020 }
 0x5a8   : > { %v5017_v55 = vpop.eup %5016 }
 0x5a9   : > { %v1970_v57 = vmul.f32 %v5017_v55, %v5013_v48 }
 0x5ac   : > { %v5019_v56 = vpop.eup %5018 }
 0x5ad   : > { %v1971_v58 = vmul.f32 %v5019_v56, %v5015_v50 }
 0x5af   : > { %v1972_v60 = vpack.c.bf16 %v1971_v58, %v1970_v57 }
 0x5b1   : > { %4489 = vmatmul.mubr.msk.bf16.vlgmr.msra.gmra.mrb[12].mxu1 %vm1949_vm4, %v1972_v60 }
 0x5b2   : > { %4493 = vmatpush3.bf16.xpose.msra.mxu1 %v2029_v61  ;;  %4494 = vmatprep.mubr.msk.bf16.mxu1 %vm5810_vm0, %v5809_v0 }
 0x5b3   : > { %4498 = vmatprep.subr.bf16.mxu1 %v5809_v0 }
 0x5b9   : > { %4495 = vmatmul.mubr.msk.bf16.vlgmr.msra.gmra.mrb[16].mxu1 %vm1901_vm1, %v2021_v62 }
 0x5ba   : > { %4500 = vmatprep.mubr.msk.bf16.mxu1 %vm5810_vm0, %v5809_v0 }
 0x684   : > { %v2010_v63 = vpop.f32.mrb[12].mxu1 }
 0x685   : > { %v4490_v2 = vpop.f32.mrb[13].mxu1 }
 0x686   : > { %v2013_v3 = vpop.f32.mrb[14].mxu1 }
 0x687   : > { %v2017_v4 = vpack.c.bf16 %v2013_v3, %v2010_v63  ;;  %v4491_v5 = vpop.f32.mrb[15].mxu1 }
 0x689   : > { %2018 = vst.msk [vmem:[#allocation6] sm:$0xff] %vm1901_vm1, %v2017_v4 }
 0x68c   : > { %v2065_v6 = vpop.f32.mrb[16].mxu1 }
 0x68d   : > { %v2066_v7 = vadd.f32 %v2065_v6, %v6595_v32  ;;  %v4496_v9 = vpop.f32.mrb[17].mxu1 }
 0x68e   : > { %v2068_v10 = vpop.f32.mrb[18].mxu1 }
 0x68f   : > { %v2069_v11 = vadd.f32 %v2068_v10, %v6598_v34  ;;  %v4497_v12 = vpop.f32.mrb[19].mxu1  ;;  %v2072_v13 = vsel %vm1949_vm4, %v2066_v7, -inf }
 0x690   : > { %2073 = vmax.xlane.f32.xlu1 %v2072_v13 }
 0x691   : > { %v2075_v14 = vsel %vm1949_vm4, %v2069_v11, -inf }
 0x692   : > { %2076 = vmax.xlane.f32.xlu0 %v2075_v14 }
 0x71d   : > { %v2074_v15 = vpop.xlane.xlu1 %2073 }
 0x71e   : > { %v2078_v16 = vsub.f32 %v2066_v7, %v2074_v15 }
 0x71f   : > { %v2077_v18 = vpop.xlane.xlu0 %2076 }
 0x720   : > { %v2080_v19 = vmul.f32 1.442695, %v2078_v16  ;;  %v2079_v20 = vsub.f32 %v2069_v11, %v2077_v18 }
 0x722   : > { %5020 = vpow2.f32 %v2080_v19  ;;  %v2082_v21 = vmul.f32 1.442695, %v2079_v20 }
 0x724   : > { %5022 = vpow2.f32 %v2082_v21 }
 0x72c   : > { %v5021_v22 = vpop.eup %5020 }
 0x72d   : > { %v2084_v23 = vsel %vm1949_vm4, %v5021_v22, 0.0 }
 0x72e   : > { %v5023_v24 = vpop.eup %5022  ;;  %2085 = vadd.xlane.f32.xlu0 %v2084_v23 }
 0x72f   : > { %v2087_v25 = vsel %vm1949_vm4, %v5023_v24, 0.0 }
 0x730   : > { %2088 = vadd.xlane.f32.xlu1 %v2087_v25 }
 0x741   : > { %2152 = vrot.lane.b32.xlu1 %v6572_v54, %s5812_s21 }
 0x744   : > { %2096 = vrot.lane.b32.xlu0 %v6577_v1, %s5811_s10 }
 0x745   : > { %2150 = vrot.lane.b32.xlu1 %v6585_v26, %s5812_s21 }
 0x7bb   : > { %v2086_v27 = vpop.xlane.xlu0 %2085 }
 0x7bc   : > { %5024 = vrcp.f32 %v2086_v27 }
 0x7bd   : > { %v2089_v28 = vpop.xlane.xlu1 %2088 }
 0x7be   : > { %5026 = vrcp.f32 %v2089_v28 }
 0x7bf   : > { %v2097_v29 = vpop.permute.xlu0 %2096 }
 0x7c0   : > { %4499 = vmatpush3.bf16.msra.mxu1 %v2097_v29 }
 0x7c1   : > { %4504 = vmatprep.subr.bf16.mxu1 %v5809_v0  ;;  %v2153_v36 = vpop.permute.xlu1 %2152 }
 0x7c2   : > { %v2158_v38 = vsel %vm1901_vm1, %v2153_v36, 0 }
 0x7c5   : > { %v2151_v39 = vpop.permute.xlu1 %2150 }
 0x7c6   : > { %v5025_v30 = vpop.eup %5024 }
 0x7c7   : > { %v2092_v33 = vmul.f32 %v5025_v30, %v5021_v22 }
 0x7c8   : > { %v5027_v31 = vpop.eup %5026 }
 0x7c9   : > { %v2093_v35 = vmul.f32 %v5027_v31, %v5023_v24 }
 0x7cb   : > { %v2094_v37 = vpack.c.bf16 %v2093_v35, %v2092_v33 }
 0x7cd   : > { %4501 = vmatmul.mubr.msk.bf16.vlgmr.msra.gmra.mrb[20].mxu1 %vm1949_vm4, %v2094_v37 }
 0x7ce   : > { %4505 = vmatpush3.bf16.xpose.msra.mxu1 %v2158_v38  ;;  %4506 = vmatprep.mubr.msk.bf16.mxu1 %vm5810_vm0, %v5809_v0 }
 0x7cf   : > { %4510 = vmatprep.subr.bf16.mxu1 %v5809_v0 }
 0x7d5   : > { %4507 = vmatmul.mubr.msk.bf16.vlgmr.msra.gmra.mrb[24].mxu1 %vm1901_vm1, %v2151_v39 }
 0x7d6   : > { %4512 = vmatprep.mubr.msk.bf16.mxu1 %vm5810_vm0, %v5809_v0 }
 0x8a0   : > { %v6640_v40 = vpop.f32.mrb[20].mxu1 }
 0x8a1   : > { %v4502_v41 = vpop.f32.mrb[21].mxu1 }
 0x8a2   : > { %v6642_v42 = vpop.f32.mrb[22].mxu1 }
 0x8a3   : > { %v2143_v43 = vpack.c.bf16 %v6642_v42, %v6640_v40  ;;  %v4503_v44 = vpop.f32.mrb[23].mxu1 }
 0x8a8   : > { %v2194_v45 = vpop.f32.mrb[24].mxu1 }
 0x8a9   : > { %v2195_v46 = vadd.f32 %v2194_v45, %v6595_v32  ;;  %v4508_v47 = vpop.f32.mrb[25].mxu1 }
 0x8aa   : > { %v2197_v48 = vpop.f32.mrb[26].mxu1  ;;  %v4949_v47 = vld [vmem:[#allocation21 + $0x8] sm:$0xff]  }
 0x8ab   : > { %v2198_v49 = vadd.f32 %v2197_v48, %v6598_v34  ;;  %v4509_v50 = vpop.f32.mrb[27].mxu1  ;;  %v2201_v51 = vsel %vm1949_vm4, %v2195_v46, -inf  ;;  %v4950_v48 = vld [vmem:[#allocation21 + $0x10] sm:$0xff]  }
 0x8ac   : > { %2202 = vmax.xlane.f32.xlu1 %v2201_v51  ;;  %v4952_v50 = vld [vmem:[#allocation21 + $0x20] sm:$0xff]   ;;  %v4953_v51 = vld [vmem:[#allocation21 + $0x28] sm:$0xff]  }
 0x8ad   : > { %v2204_v52 = vsel %vm1949_vm4, %v2198_v49, -inf }
 0x8ae   : > { %2205 = vmax.xlane.f32.xlu0 %v2204_v52  ;;  %v4954_v52 = vld [vmem:[#allocation21 + $0x30] sm:$0xff]  }
 0x8bd   : > { %2224 = vrot.lane.b32.xlu1 %v6577_v1, %s5812_s21 }
 0x8c1   : > { %2278 = vrot.lane.b32.xlu1 %v6585_v26, %s5813_s25 }
 0x939   : > { %v2203_v53 = vpop.xlane.xlu1 %2202 }
 0x93a   : > { %v2207_v55 = vsub.f32 %v2195_v46, %v2203_v53  ;;  %v4948_v46 = vld [vmem:[#allocation21] sm:$0xff]   ;;  %v4955_v53 = vld [vmem:[#allocation21 + $0x38] sm:$0xff]  }
 0x93b   : > { %v2206_v56 = vpop.xlane.xlu0 %2205  ;;  %4529 = vmatpush3.bf16.msra.mxu0 %v4948_v46 }
 0x93c   : > { %v2209_v57 = vmul.f32 1.442695, %v2207_v55  ;;  %v2208_v58 = vsub.f32 %v2198_v49, %v2206_v56  ;;  %4530 = vmatprep.subr.bf16.mxu0 %v5809_v0  ;;  %v4951_v49 = vld [vmem:[#allocation21 + $0x18] sm:$0xff]  }
 0x93d   : > { %v2225_v59 = vpop.permute.xlu1 %2224 }
 0x93e   : > { %5028 = vpow2.f32 %v2209_v57  ;;  %v2211_v60 = vmul.f32 1.442695, %v2208_v58  ;;  %4511 = vmatpush3.bf16.msra.mxu1 %v2225_v59 }
 0x93f   : > { %4516 = vmatprep.subr.bf16.mxu1 %v5809_v0  ;;  %4531 = vmatpush3.bf16.msra.mxu0 %v4949_v47 }
 0x940   : > { %5030 = vpow2.f32 %v2211_v60  ;;  %4532 = vmatprep.subr.bf16.mxu0 %v5809_v0 }
 0x943   : > { %4533 = vmatpush3.bf16.msra.mxu0 %v4950_v48 }
 0x944   : > { %4534 = vmatprep.subr.bf16.mxu0 %v5809_v0 }
 0x947   : > { %4535 = vmatpush3.bf16.msra.mxu0 %v4951_v49 }
 0x948   : > { %v5029_v61 = vpop.eup %5028  ;;  %4536 = vmatprep.subr.bf16.mxu0 %v5809_v0 }
 0x949   : > { %v2213_v62 = vsel %vm1949_vm4, %v5029_v61, 0.0 }
 0x94a   : > { %v5031_v63 = vpop.eup %5030  ;;  %2214 = vadd.xlane.f32.xlu0 %v2213_v62  ;;  %v2684_v62 = vsel %vm1901_vm1, %v6579_v8, 0 }
 0x94b   : > { %v2216_v2 = vsel %vm1949_vm4, %v5031_v63, 0.0  ;;  %4537 = vmatpush3.bf16.msra.mxu0 %v4952_v50 }
 0x94c   : > { %4538 = vmatprep.subr.bf16.mxu0 %v5809_v0 }
 0x94e   : > { %2217 = vadd.xlane.f32.xlu0 %v2216_v2 }
 0x94f   : > { %4539 = vmatpush3.bf16.msra.mxu0 %v4953_v51 }
 0x950   : > { %4540 = vmatprep.subr.bf16.mxu0 %v5809_v0 }
 0x953   : > { %4541 = vmatpush3.bf16.msra.mxu0 %v4954_v52 }
 0x954   : > { %4542 = vmatprep.subr.bf16.mxu0 %v5809_v0 }
 0x957   : > { %4543 = vmatpush3.bf16.msra.mxu0 %v4955_v53 }
 0x958   : > { %4568 = vmatprep.subr.bf16.mxu0 %v5809_v0 }
 0x964   : > { %2280 = vrot.lane.b32.xlu0 %v6572_v54, %s5813_s25  ;;  %v2279_v54 = vpop.permute.xlu1 %2278 }
 0x9d7   : > { %v2215_v26 = vpop.xlane.xlu0 %2214 }
 0x9d8   : > { %5032 = vrcp.f32 %v2215_v26 }
 0x9db   : > { %v2218_v3 = vpop.xlane.xlu0 %2217 }
 0x9dc   : > { %5034 = vrcp.f32 %v2218_v3 }
 0x9df   : > { %v2281_v9 = vpop.permute.xlu0 %2280 }
 0x9e0   : > { %v2286_v11 = vsel %vm1901_vm1, %v2281_v9, 0 }
 0x9e2   : > { %v5033_v4 = vpop.eup %5032 }
 0x9e3   : > { %v2221_v6 = vmul.f32 %v5033_v4, %v5029_v61 }
 0x9e6   : > { %v5035_v5 = vpop.eup %5034 }
 0x9e7   : > { %v2222_v7 = vmul.f32 %v5035_v5, %v5031_v63  ;;  %v4162_v63 = vld [vmem:[#allocation22] ss:$0 sm:$0xff] }
 0x9e9   : > { %v2223_v10 = vpack.c.bf16 %v2222_v7, %v2221_v6  ;;  %v5088_v7 = vld [vmem:[%s6443_s17] sm:$0xff] }
 0x9eb   : > { %4513 = vmatmul.mubr.msk.bf16.vlgmr.msra.gmra.mrb[28].mxu1 %vm1949_vm4, %v2223_v10  ;;  %v5089_v10 = vld [vmem:[%s6443_s17 + $0x8] sm:$0xff]  ;;  %s7017_s17 = sld [smem:[#allocation74_spill]] }
 0x9ec   : > { %4517 = vmatpush3.bf16.xpose.msra.mxu1 %v2286_v11  ;;  %4518 = vmatprep.mubr.msk.bf16.mxu1 %vm5810_vm0, %v5809_v0 }
 0x9ed   : > { %4522 = vmatprep.subr.bf16.mxu1 %v5809_v0 }
 0x9f3   : > { %4519 = vmatmul.mubr.msk.bf16.vlgmr.msra.gmra.mrb[32].mxu1 %vm1901_vm1, %v2279_v54  ;;  %v4956_v54 = vld [vmem:[#allocation27] sm:$0xff]  }
 0x9f4   : > { %4524 = vmatprep.mubr.msk.bf16.mxu1 %vm5810_vm0, %v5809_v0 }
 0xabe   : > { %v2264_v12 = vpop.f32.mrb[28].mxu1 }
 0xabf   : > { %v4514_v13 = vpop.f32.mrb[29].mxu1 }
 0xac0   : > { %v2267_v14 = vpop.f32.mrb[30].mxu1 }
 0xac1   : > { %v2271_v15 = vpack.c.bf16 %v2267_v14, %v2264_v12  ;;  %v4515_v16 = vpop.f32.mrb[31].mxu1  ;;  %v4957_v12 = vld [vmem:[#allocation27 + $0x8] sm:$0xff]  }
 0xac6   : > { %v2322_v18 = vpop.f32.mrb[32].mxu1 }
 0xac7   : > { %v2323_v19 = vadd.f32 %v2322_v18, %v6595_v32  ;;  %v4520_v20 = vpop.f32.mrb[33].mxu1 }
 0xac8   : > { %v2325_v21 = vpop.f32.mrb[34].mxu1 }
 0xac9   : > { %v2326_v22 = vadd.f32 %v2325_v21, %v6598_v34  ;;  %v4521_v23 = vpop.f32.mrb[35].mxu1  ;;  %v2329_v24 = vsel %vm1949_vm4, %v2323_v19, -inf }
 0xaca   : > { %2330 = vmax.xlane.f32.xlu1 %v2329_v24  ;;  %v4959_v23 = vld [vmem:[#allocation27 + $0x18] sm:$0xff]   ;;  %v4960_v24 = vld [vmem:[#allocation27 + $0x20] sm:$0xff]  }
 0xacb   : > { %v2332_v25 = vsel %vm1949_vm4, %v2326_v22, -inf }
 0xacc   : > { %2333 = vmax.xlane.f32.xlu0 %v2332_v25  ;;  %v4961_v25 = vld [vmem:[#allocation27 + $0x28] sm:$0xff]  }
 0xb57   : > { %v2331_v27 = vpop.xlane.xlu1 %2330 }
 0xb58   : > { %v2335_v28 = vsub.f32 %v2323_v19, %v2331_v27  ;;  %v4962_v27 = vld [vmem:[#allocation27 + $0x30] sm:$0xff]  }
 0xb59   : > { %v2334_v29 = vpop.xlane.xlu0 %2333 }
 0xb5a   : > { %v2337_v30 = vmul.f32 1.442695, %v2335_v28  ;;  %v2336_v31 = vsub.f32 %v2326_v22, %v2334_v29  ;;  %v4958_v22 = vld [vmem:[#allocation27 + $0x10] sm:$0xff]   ;;  %v4963_v28 = vld [vmem:[#allocation27 + $0x38] sm:$0xff]  }
 0xb5c   : > { %5036 = vpow2.f32 %v2337_v30  ;;  %v2339_v33 = vmul.f32 1.442695, %v2336_v31 }
 0xb5e   : > { %5038 = vpow2.f32 %v2339_v33 }
 0xb66   : > { %v5037_v32 = vpop.eup %5036 }
 0xb67   : > { %v2341_v35 = vsel %vm1949_vm4, %v5037_v32, 0.0 }
 0xb68   : > { %v5039_v36 = vpop.eup %5038  ;;  %2342 = vadd.xlane.f32.xlu0 %v2341_v35 }
 0xb69   : > { %v2344_v34 = vsel %vm1949_vm4, %v5039_v36, 0.0 }
 0xb6a   : > { %2345 = vadd.xlane.f32.xlu1 %v2344_v34 }
 0xb7b   : > { %2145 = vrot.lane.b32.xlu1 %v2143_v43, %s5813_s25 }
 0xb7e   : > { %2352 = vrot.lane.b32.xlu0 %v6577_v1, %s5813_s25 }
 0xb7f   : > { %2273 = vrot.lane.b32.xlu1 %v2271_v15, %s5812_s21 }
 0xbf5   : > { %v2343_v37 = vpop.xlane.xlu0 %2342 }
 0xbf6   : > { %5040 = vrcp.f32 %v2343_v37  ;;  %v4171_v37 = vld [vmem:[#allocation24] ss:$0 sm:$0xff] }
 0xbf7   : > { %v2346_v38 = vpop.xlane.xlu1 %2345 }
 0xbf8   : > { %5042 = vrcp.f32 %v2346_v38 }
 0xbf9   : > { %v2353_v39 = vpop.permute.xlu0 %2352 }
 0xbfa   : > { %4523 = vmatpush3.bf16.msra.mxu1 %v2353_v39 }
 0xbfb   : > { %v2146_v41 = vpop.permute.xlu1 %2145  ;;  %4548 = vmatprep.subr.bf16.mxu1 %v5809_v0 }
 0xbfc   : > { %2149 = vst.msk [vmem:[#allocation6] sm:$0xff] %vm2148_vm5, %v2146_v41 }
 0xbff   : > { %v2274_v40 = vpop.permute.xlu1 %2273 }
 0xc00   : > { %v5041_v42 = vpop.eup %5040  ;;  %2277 = vst.msk [vmem:[#allocation6] sm:$0xff] %vm2276_vm6, %v2274_v40  ;;  %v4172_v40 = vld [vmem:[#allocation25] ss:$0 sm:$0xff] }
 0xc01   : > { %v2349_v43 = vmul.f32 %v5041_v42, %v5037_v32 }
 0xc02   : > { %v5043_v1 = vpop.eup %5042 }
 0xc03   : > { %v2350_v44 = vmul.f32 %v5043_v1, %v5039_v36 }
 0xc05   : > { %v2351_v45 = vpack.c.bf16 %v2350_v44, %v2349_v43 }
 0xc07   : > { %4525 = vmatmul.mubr.msk.bf16.vlgmr.msra.gmra.mrb[36].mxu1 %vm1949_vm4, %v2351_v45  ;;  %v4173_v45 = vld [vmem:[#allocation28] ss:$0 sm:$0xff] }
 0xc08   : > { %4564 = vmatprep.mubr.msk.bf16.mxu1 %vm5810_vm0, %v5809_v0  ;;  %4549 = vmatpush3.bf16.msra.mxu1 %v4956_v54 }
 0xc09   : > { %4550 = vmatprep.subr.bf16.mxu1 %v5809_v0 }
 0xc0c   : > { %4551 = vmatpush3.bf16.msra.mxu1 %v4957_v12 }
 0xc0d   : > { %4552 = vmatprep.subr.bf16.mxu1 %v5809_v0 }
 0xc10   : > { %4553 = vmatpush3.bf16.msra.mxu1 %v4958_v22 }
 0xc11   : > { %4554 = vmatprep.subr.bf16.mxu1 %v5809_v0 }
 0xc14   : > { %4555 = vmatpush3.bf16.msra.mxu1 %v4959_v23 }
 0xc15   : > { %4556 = vmatprep.subr.bf16.mxu1 %v5809_v0 }
 0xc18   : > { %4557 = vmatpush3.bf16.msra.mxu1 %v4960_v24 }
 0xc19   : > { %4558 = vmatprep.subr.bf16.mxu1 %v5809_v0 }
 0xc1c   : > { %4559 = vmatpush3.bf16.msra.mxu1 %v4961_v25 }
 0xc1d   : > { %4560 = vmatprep.subr.bf16.mxu1 %v5809_v0 }
 0xc20   : > { %4561 = vmatpush3.bf16.msra.mxu1 %v4962_v27 }
 0xc21   : > { %4562 = vmatprep.subr.bf16.mxu1 %v5809_v0 }
 0xc24   : > { %4563 = vmatpush3.bf16.msra.mxu1 %v4963_v28 }
 0xc25   : > { %4574 = vmatprep.subr.bf16.mxu1 %v5809_v0 }
 0xcda   : > { %v2392_v55 = vpop.f32.mrb[36].mxu1 }
 0xcdb   : > { %v4526_v56 = vpop.f32.mrb[37].mxu1 }
 0xcdc   : > { %v2395_v57 = vpop.f32.mrb[38].mxu1 }
 0xcdd   : > { %v2399_v58 = vpack.c.bf16 %v2395_v57, %v2392_v55  ;;  %v4527_v59 = vpop.f32.mrb[39].mxu1 }
 0xcdf   : > { %2401 = vrot.lane.b32.xlu1 %v2399_v58, %s5811_s10 }
 0xd51   : > { %v2402_v60 = vpop.permute.xlu1 %2401 }
 0xd52   : > { %2405 = vst.msk [vmem:[#allocation6] sm:$0xff] %vm2404_vm7, %v2402_v60 }
 0xd59   : > { %v2406_v61 = vld [vmem:[#allocation6] sm:$0xff] }
 0xd5a   : > { %4545 = vmatmul.mubr.bf16.vlgmr.msra.gmra.mrb[12].mxu0 %v2406_v61 }
 0xd5b   : > { %4569 = vmatpush3.bf16.xpose.msra.mxu0 %v2684_v62  ;;  %4570 = vmatprep.mubr.msk.bf16.mxu0 %vm5810_vm0, %v5809_v0 }
 0xd5c   : > { %4580 = vmatprep.subr.bf16.mxu0 %v5809_v0 }
 0xe2d   : > { %v2512_v2 = vpop.f32.mrb[12].mxu0 }
 0xe2e   : > { %v2513_v26 = vadd.f32 %v4162_v63, %v2512_v2  ;;  %v4546_v3 = vpop.f32.mrb[13].mxu0  ;;  %v4251_v2 = vld [vmem:[%s6458_s5] sm:$0xf]   ;;  %s1284_s5 = scalar_lea.vmem [#allocation37], %s6439_s11  ;;  %s5815_s11 = smov [#allocation37]  }
 0xe2f   : > { %v2515_v4 = vpop.f32.mrb[14].mxu0  ;;  %v4253_v3 = vunpack.c.1.s8 %v4251_v2  ;;  %s3729_s13 = sshll.u32 %s1284_s5, 4  ;;  %s6827_s13 = int_to_ptr.vmem [resolvable:$true] %s3729_s13 }
 0xe30   : > { %v2516_v5 = vadd.f32 %v4162_v63, %v2515_v4  ;;  %v4547_v6 = vpop.f32.mrb[15].mxu0  ;;  %v2519_v9 = vadd.f32 %v5088_v7, %v2513_v26  ;;  %v4252_v26 = vunpack.c.0.s8 %v4251_v2 }
 0xe32   : > { %2521 = vadd.xlane.f32.xlu0 %v2519_v9  ;;  %v2520_v11 = vadd.f32 %v5089_v10, %v2516_v5  ;;  %v1777_v4 = vcvt.s32.f32 %v4252_v26  ;;  %v1778_v5 = vcvt.s32.f32 %v4253_v3 }
 0xe34   : > { %2523 = vadd.xlane.f32.xlu1 %v2520_v11  ;;  %vm1779_vm8 = vcmp.eq.f32.partialorder %v1777_v4, 0.0  ;;  %vm1780_vm9 = vcmp.eq.f32.partialorder %v1778_v5, 0.0 }
 0xe35   : > { %v1781_v6 = vsel %vm1779_vm8, -10000.0, %v5809_v0 }
 0xebf   : > { %v2522_v13 = vpop.xlane.xlu0 %2521 }
 0xec0   : > { %v2526_v14 = vmul.f32 0.0078125, %v2522_v13 }
 0xec1   : > { %v2524_v15 = vpop.xlane.xlu1 %2523 }
 0xec2   : > { %v2528_v16 = vsub.f32 %v2519_v9, %v2526_v14  ;;  %v2527_v18 = vmul.f32 0.0078125, %v2524_v15  ;;  %v1782_v9 = vsel %vm1780_vm9, -10000.0, %v5809_v0 }
 0xec4   : > { %v2529_v19 = vsub.f32 %v2520_v11, %v2527_v18  ;;  %v2530_v20 = vmul.f32 %v2528_v16, %v2528_v16 }
 0xec6   : > { %2532 = vadd.xlane.f32.xlu0 %v2530_v20  ;;  %v2531_v21 = vmul.f32 %v2529_v19, %v2529_v19 }
 0xeca   : > { %2534 = vadd.xlane.f32.xlu0 %v2531_v21 }
 0xee0   : > { %2800 = vrot.lane.b32.xlu0 %v6579_v8, %s5811_s10 }
 0xee4   : > { %3055 = vrot.lane.b32.xlu0 %v6579_v8, %s5813_s25 }
 0xf53   : > { %v2533_v29 = vpop.xlane.xlu0 %2532 }
 0xf54   : > { %v2536_v30 = vmul.f32 0.0078125, %v2533_v29 }
 0xf56   : > { %v2538_v31 = vadd.f32 1e-12, %v2536_v30 }
 0xf57   : > { %v2535_v33 = vpop.xlane.xlu0 %2534 }
 0xf58   : > { %5044 = vrsqrt.f32 %v2538_v31  ;;  %v2537_v32 = vmul.f32 0.0078125, %v2535_v33 }
 0xf5a   : > { %v2539_v35 = vadd.f32 1e-12, %v2537_v32 }
 0xf5b   : > { %v2801_v55 = vpop.permute.xlu0 %2800 }
 0xf5c   : > { %5046 = vrsqrt.f32 %v2539_v35  ;;  %v2806_v57 = vsel %vm1901_vm1, %v2801_v55, 0 }
 0xf5f   : > { %v3056_v61 = vpop.permute.xlu0 %3055 }
 0xf62   : > { %v5045_v36 = vpop.eup %5044 }
 0xf63   : > { %v2542_v34 = vmul.f32 %v5045_v36, %v2528_v16 }
 0xf65   : > { %v2551_v41 = vmul.f32 %v4171_v37, %v2542_v34 }
 0xf66   : > { %v5047_v38 = vpop.eup %5046 }
 0xf67   : > { %v2543_v39 = vmul.f32 %v5047_v38, %v2529_v19  ;;  %v6715_v1 = vadd.f32 %v4172_v40, %v2551_v41 }
 0xf69   : > { %v2552_v42 = vmul.f32 %v4171_v37, %v2543_v39 }
 0xf6b   : > { %v6717_v43 = vadd.f32 %v4172_v40, %v2552_v42 }
 0xf6d   : > { %v2578_v44 = vpack.c.bf16 %v6717_v43, %v6715_v1 }
 0xf6f   : > { %4565 = vmatmul.mubr.bf16.vlgmr.msra.gmra.mrb[40].mxu1 %v2578_v44 }
 0xf70   : > { %4575 = vmatpush3.bf16.msra.mxu1 %v6583_v17  ;;  %4576 = vmatprep.mubr.msk.bf16.mxu1 %vm5810_vm0, %v5809_v0 }
 0xf71   : > { %4586 = vmatprep.subr.bf16.mxu1 %v5809_v0 }
0x1042   : > { %v2668_v46 = vpop.f32.mrb[40].mxu1 }
0x1043   : > { %v2669_v47 = vadd.f32 %v4173_v45, %v2668_v46  ;;  %v4566_v48 = vpop.f32.mrb[41].mxu1 }
0x1044   : > { %v2671_v49 = vpop.f32.mrb[42].mxu1 }
0x1045   : > { %v2672_v50 = vadd.f32 %v4173_v45, %v2671_v49  ;;  %v4567_v51 = vpop.f32.mrb[43].mxu1  ;;  %v2675_v52 = vmul.f32 0.17677669, %v2669_v47 }
0x1047   : > { %v2676_v53 = vmul.f32 0.17677669, %v2672_v50 }
0x1049   : > { %v2677_v56 = vpack.c.bf16 %v2676_v53, %v2675_v52 }
0x104b   : > { %2797 = vrot.lane.b32.xlu1 %v2677_v56, %s5811_s10  ;;  %4571 = vmatmul.mubr.msk.bf16.vlgmr.msra.gmra.mrb[16].mxu0 %vm1901_vm1, %v2677_v56 }
0x104c   : > { %4581 = vmatpush3.bf16.xpose.msra.mxu0 %v2806_v57  ;;  %4582 = vmatprep.mubr.msk.bf16.mxu0 %vm5810_vm0, %v5809_v0 }
0x104d   : > { %4592 = vmatprep.subr.bf16.mxu0 %v5809_v0 }
0x104f   : > { %2928 = vrot.lane.b32.xlu1 %v6579_v8, %s5812_s21  ;;  %v3061_v8 = vsel %vm1901_vm1, %v3056_v61, 0 }
0x1053   : > { %2926 = vrot.lane.b32.xlu1 %v2677_v56, %s5812_s21 }
0x1057   : > { %3053 = vrot.lane.b32.xlu1 %v2677_v56, %s5813_s25 }
0x10bd   : > { %v2798_v58 = vpop.permute.xlu1 %2797 }
0x10be   : > { %4583 = vmatmul.mubr.msk.bf16.vlgmr.msra.gmra.mrb[20].mxu0 %vm1901_vm1, %v2798_v58 }
0x10bf   : > { %4594 = vmatprep.mubr.msk.bf16.mxu0 %vm5810_vm0, %v5809_v0 }
0x10c1   : > { %v2929_v59 = vpop.permute.xlu1 %2928 }
0x10c2   : > { %v2934_v60 = vsel %vm1901_vm1, %v2929_v59, 0 }
0x10c3   : > { %4593 = vmatpush3.bf16.xpose.msra.mxu0 %v2934_v60 }
0x10c4   : > { %4604 = vmatprep.subr.bf16.mxu0 %v5809_v0 }
0x10c5   : > { %v2927_v62 = vpop.permute.xlu1 %2926 }
0x10c9   : > { %v3054_v63 = vpop.permute.xlu1 %3053 }
0x10ca   : > { %4595 = vmatmul.mubr.msk.bf16.vlgmr.msra.gmra.mrb[24].mxu0 %vm1901_vm1, %v2927_v62 }
0x10cb   : > { %4605 = vmatpush3.bf16.xpose.msra.mxu0 %v3061_v8  ;;  %4606 = vmatprep.mubr.msk.bf16.mxu0 %vm5810_vm0, %v5809_v0 }
0x10cc   : > { %4616 = vmatprep.subr.bf16.mxu0 %v5809_v0 }
0x10d2   : > { %4607 = vmatmul.mubr.msk.bf16.vlgmr.msra.gmra.mrb[28].mxu0 %vm1901_vm1, %v3054_v63 }
0x10d3   : > { %4632 = vmatprep.mubr.msk.bf16.mxu0 %vm5810_vm0, %v5809_v0 }
0x111e   : > { %v2720_v7 = vpop.f32.mrb[16].mxu0 }
0x111f   : > { %v2721_v10 = vadd.f32 %v2720_v7, %v1781_v6  ;;  %v4572_v11 = vpop.f32.mrb[17].mxu0 }
0x1120   : > { %v2723_v54 = vpop.f32.mrb[18].mxu0 }
0x1121   : > { %v2724_v12 = vadd.f32 %v2723_v54, %v1782_v9  ;;  %v4573_v13 = vpop.f32.mrb[19].mxu0  ;;  %v2727_v14 = vsel %vm1949_vm4, %v2721_v10, -inf }
0x1122   : > { %2728 = vmax.xlane.f32.xlu0 %v2727_v14 }
0x1123   : > { %v2730_v15 = vsel %vm1949_vm4, %v2724_v12, -inf }
0x1124   : > { %2731 = vmax.xlane.f32.xlu1 %v2730_v15 }
0x1191   : > { %v2842_v16 = vpop.f32.mrb[20].mxu0 }
0x1192   : > { %v2843_v18 = vadd.f32 %v2842_v16, %v1781_v6  ;;  %v4584_v19 = vpop.f32.mrb[21].mxu0 }
0x1193   : > { %v2845_v20 = vpop.f32.mrb[22].mxu0 }
0x1194   : > { %v2846_v21 = vadd.f32 %v2845_v20, %v1782_v9  ;;  %v4585_v22 = vpop.f32.mrb[23].mxu0  ;;  %v2849_v23 = vsel %vm1949_vm4, %v2843_v18, -inf }
0x1195   : > { %2850 = vmax.xlane.f32.xlu0 %v2849_v23 }
0x1196   : > { %v2852_v24 = vsel %vm1949_vm4, %v2846_v21, -inf }
0x1199   : > { %2853 = vmax.xlane.f32.xlu0 %v2852_v24 }
0x119d   : > { %v2970_v25 = vpop.f32.mrb[24].mxu0 }
0x119e   : > { %v2971_v27 = vadd.f32 %v2970_v25, %v1781_v6  ;;  %v4596_v28 = vpop.f32.mrb[25].mxu0 }
0x119f   : > { %v2973_v29 = vpop.f32.mrb[26].mxu0 }
0x11a0   : > { %v2974_v30 = vadd.f32 %v2973_v29, %v1782_v9  ;;  %v4597_v31 = vpop.f32.mrb[27].mxu0  ;;  %v2977_v33 = vsel %vm1949_vm4, %v2971_v27, -inf }
0x11a1   : > { %2978 = vmax.xlane.f32.xlu0 %v2977_v33 }
0x11a2   : > { %v2980_v32 = vsel %vm1949_vm4, %v2974_v30, -inf }
0x11a3   : > { %2981 = vmax.xlane.f32.xlu1 %v2980_v32 }
0x11a5   : > { %v3097_v35 = vpop.f32.mrb[28].mxu0 }
0x11a6   : > { %v3098_v36 = vadd.f32 %v3097_v35, %v1781_v6  ;;  %v4608_v34 = vpop.f32.mrb[29].mxu0 }
0x11a7   : > { %v3100_v37 = vpop.f32.mrb[30].mxu0 }
0x11a8   : > { %v6757_v38 = vadd.f32 %v3100_v37, %v1782_v9  ;;  %v4609_v39 = vpop.f32.mrb[31].mxu0  ;;  %v3104_v41 = vsel %vm1949_vm4, %v3098_v36, -inf }
0x11a9   : > { %3105 = vmax.xlane.f32.xlu0 %v3104_v41 }
0x11aa   : > { %v3107_v40 = vsel %vm1949_vm4, %v6757_v38, -inf }
0x11ab   : > { %3108 = vmax.xlane.f32.xlu1 %v3107_v40 }
0x11af   : > { %v2729_v42 = vpop.xlane.xlu0 %2728 }
0x11b0   : > { %v2733_v44 = vsub.f32 %v2721_v10, %v2729_v42 }
0x11b1   : > { %v2732_v45 = vpop.xlane.xlu1 %2731 }
0x11b2   : > { %v2735_v46 = vmul.f32 1.442695, %v2733_v44  ;;  %v2734_v47 = vsub.f32 %v2724_v12, %v2732_v45 }
0x11b4   : > { %5048 = vpow2.f32 %v2735_v46  ;;  %v2737_v48 = vmul.f32 1.442695, %v2734_v47 }
0x11b6   : > { %5050 = vpow2.f32 %v2737_v48 }
0x11be   : > { %v5049_v49 = vpop.eup %5048 }
0x11bf   : > { %v2739_v50 = vsel %vm1949_vm4, %v5049_v49, 0.0 }
0x11c0   : > { %v5051_v51 = vpop.eup %5050  ;;  %2740 = vadd.xlane.f32.xlu0 %v2739_v50 }
0x11c1   : > { %v2742_v52 = vsel %vm1949_vm4, %v5051_v51, 0.0 }
0x11c2   : > { %2743 = vadd.xlane.f32.xlu1 %v2742_v52 }
0x1222   : > { %v2851_v53 = vpop.xlane.xlu0 %2850 }
0x1223   : > { %v2855_v55 = vsub.f32 %v2843_v18, %v2851_v53 }
0x1225   : > { %v2857_v56 = vmul.f32 1.442695, %v2855_v55 }
0x1226   : > { %v2854_v57 = vpop.xlane.xlu0 %2853 }
0x1227   : > { %5052 = vpow2.f32 %v2857_v56  ;;  %v2856_v58 = vsub.f32 %v2846_v21, %v2854_v57 }
0x1229   : > { %v2859_v59 = vmul.f32 1.442695, %v2856_v58 }
0x122b   : > { %5054 = vpow2.f32 %v2859_v59 }
0x122e   : > { %v2979_v60 = vpop.xlane.xlu0 %2978 }
0x122f   : > { %v2983_v61 = vsub.f32 %v2971_v27, %v2979_v60  ;;  %v4964_v60 = vld [vmem:[#allocation33] sm:$0xff]  }
0x1230   : > { %v2982_v62 = vpop.xlane.xlu1 %2981  ;;  %4617 = vmatpush3.bf16.msra.mxu0 %v4964_v60  ;;  %v5000_v60 = vld [vmem:[#allocation36 + $0x50] sm:$0xff]  }
0x1231   : > { %v5053_v8 = vpop.eup %5052  ;;  %v2985_v63 = vmul.f32 1.442695, %v2983_v61  ;;  %v2984_v2 = vsub.f32 %v2974_v30, %v2982_v62  ;;  %4618 = vmatprep.subr.bf16.mxu0 %v5809_v0 }
0x1232   : > { %v2861_v26 = vsel %vm1949_vm4, %v5053_v8, 0.0 }
0x1233   : > { %5056 = vpow2.f32 %v2985_v63  ;;  %v2987_v3 = vmul.f32 1.442695, %v2984_v2  ;;  %2862 = vadd.xlane.f32.xlu0 %v2861_v26  ;;  %v4966_v26 = vld [vmem:[#allocation33 + $0x10] sm:$0xff]  }
0x1235   : > { %v5055_v4 = vpop.eup %5054  ;;  %5058 = vpow2.f32 %v2987_v3 }
0x1236   : > { %v3106_v5 = vpop.xlane.xlu0 %3105  ;;  %v2864_v6 = vsel %vm1949_vm4, %v5055_v4, 0.0 }
0x1237   : > { %v3110_v7 = vsub.f32 %v3098_v36, %v3106_v5  ;;  %2865 = vadd.xlane.f32.xlu1 %v2864_v6  ;;  %v4967_v6 = vld [vmem:[#allocation33 + $0x18] sm:$0xff]  }
0x1238   : > { %v3109_v15 = vpop.xlane.xlu1 %3108 }
0x1239   : > { %v3112_v9 = vmul.f32 1.442695, %v3110_v7  ;;  %v3111_v24 = vsub.f32 %v6757_v38, %v3109_v15 }
0x123b   : > { %5060 = vpow2.f32 %v3112_v9  ;;  %v3114_v25 = vmul.f32 1.442695, %v3111_v24 }
0x123d   : > { %v5057_v10 = vpop.eup %5056 }
0x123e   : > { %v2989_v11 = vsel %vm1949_vm4, %v5057_v10, 0.0 }
0x123f   : > { %v5059_v54 = vpop.eup %5058  ;;  %2990 = vadd.xlane.f32.xlu0 %v2989_v11  ;;  %v4969_v11 = vld [vmem:[#allocation33 + $0x28] sm:$0xff]  }
0x1240   : > { %v2992_v12 = vsel %vm1949_vm4, %v5059_v54, 0.0 }
0x1241   : > { %2993 = vadd.xlane.f32.xlu1 %v2992_v12  ;;  %v4971_v12 = vld [vmem:[#allocation33 + $0x38] sm:$0xff]  }
0x1245   : > { %v5061_v13 = vpop.eup %5060 }
0x1246   : > { %v3116_v14 = vsel %vm1949_vm4, %v5061_v13, 0.0 }
0x1247   : > { %3117 = vadd.xlane.f32.xlu0 %v3116_v14 }
0x124d   : > { %v2741_v16 = vpop.xlane.xlu0 %2740 }
0x124e   : > { %5062 = vrcp.f32 %v2741_v16 }
0x124f   : > { %v2744_v18 = vpop.xlane.xlu1 %2743 }
0x1250   : > { %5064 = vrcp.f32 %v2744_v18 }
0x1251   : > { %5066 = vpow2.f32 %v3114_v25 }
0x1252   : > { %3000 = vrot.lane.b32.xlu1 %v6583_v17, %s5812_s21 }
0x1258   : > { %v5063_v19 = vpop.eup %5062 }
0x1259   : > { %v2747_v21 = vmul.f32 %v5063_v19, %v5049_v49 }
0x125a   : > { %v5065_v20 = vpop.eup %5064 }
0x125b   : > { %v2748_v22 = vmul.f32 %v5065_v20, %v5051_v51  ;;  %v5067_v27 = vpop.eup %5066 }
0x125c   : > { %v3119_v28 = vsel %vm1949_vm4, %v5067_v27, 0.0 }
0x125d   : > { %2873 = vrot.lane.b32.xlu0 %v6583_v17, %s5811_s10  ;;  %v2749_v23 = vpack.c.bf16 %v2748_v22, %v2747_v21 }
0x125f   : > { %4577 = vmatmul.mubr.msk.bf16.vlgmr.msra.gmra.mrb[44].mxu1 %vm1949_vm4, %v2749_v23 }
0x1260   : > { %4588 = vmatprep.mubr.msk.bf16.mxu1 %vm5810_vm0, %v5809_v0 }
0x1276   : > { %3120 = vadd.xlane.f32.xlu1 %v3119_v28 }
0x1287   : > { %3127 = vrot.lane.b32.xlu1 %v6583_v17, %s5813_s25 }
0x12c0   : > { %v2863_v30 = vpop.xlane.xlu0 %2862 }
0x12c4   : > { %v2866_v29 = vpop.xlane.xlu1 %2865 }
0x12c5   : > { %5068 = vrcp.f32 %v2866_v29 }
0x12c6   : > { %5070 = vrcp.f32 %v2863_v30 }
0x12cc   : > { %v2991_v33 = vpop.xlane.xlu0 %2990 }
0x12ce   : > { %v2994_v31 = vpop.xlane.xlu1 %2993 }
0x12cf   : > { %5072 = vrcp.f32 %v2994_v31  ;;  %v5069_v32 = vpop.eup %5068 }
0x12d0   : > { %5074 = vrcp.f32 %v2991_v33  ;;  %v5071_v36 = vpop.eup %5070  ;;  %v2870_v34 = vmul.f32 %v5069_v32, %v5055_v4  ;;  %v4972_v33 = vld [vmem:[#allocation34] ss:$8 sps:$4 sm:$0xff]   ;;  %v4974_v32 = vld [vmem:[#allocation34 + $0x4] ss:$8 sps:$4 sm:$0xff]  }
0x12d1   : > { %v2869_v37 = vmul.f32 %v5071_v36, %v5053_v8  ;;  %v4965_v8 = vld [vmem:[#allocation33 + $0x8] sm:$0xff]   ;;  %v4975_v36 = vld [vmem:[#allocation34 + $0x10] ss:$8 sps:$4 sm:$0xff]  }
0x12d2   : > { %v3001_v17 = vpop.permute.xlu1 %3000  ;;  %4619 = vmatpush3.bf16.msra.mxu0 %v4965_v8  ;;  %v5003_v8 = vld [vmem:[#allocation36 + $0x18] sm:$0xff]  }
0x12d3   : > { %v2871_v39 = vpack.c.bf16 %v2870_v34, %v2869_v37  ;;  %4620 = vmatprep.subr.bf16.mxu0 %v5809_v0 }
0x12d4   : > { %v3118_v35 = vpop.xlane.xlu0 %3117 }
0x12d5   : > { %5076 = vrcp.f32 %v3118_v35  ;;  %v4977_v35 = vld [vmem:[#allocation34 + $0x14] ss:$8 sps:$4 sm:$0xff]  }
0x12d6   : > { %4621 = vmatpush3.bf16.msra.mxu0 %v4966_v26  ;;  %v5006_v26 = vld [vmem:[#allocation36 + $0x68] sm:$0xff]  }
0x12d7   : > { %4622 = vmatprep.subr.bf16.mxu0 %v5809_v0 }
0x12d8   : > { %v2874_v38 = vpop.permute.xlu0 %2873 }
0x12d9   : > { %4587 = vmatpush3.bf16.msra.mxu1 %v2874_v38  ;;  %v5073_v41 = vpop.eup %5072 }
0x12da   : > { %4598 = vmatprep.subr.bf16.mxu1 %v5809_v0  ;;  %v5075_v40 = vpop.eup %5074  ;;  %v2998_v42 = vmul.f32 %v5073_v41, %v5059_v54  ;;  %4623 = vmatpush3.bf16.msra.mxu0 %v4967_v6  ;;  %v4970_v54 = vld [vmem:[#allocation33 + $0x30] sm:$0xff]  }
0x12db   : > { %v2997_v44 = vmul.f32 %v5075_v40, %v5057_v10  ;;  %v4968_v10 = vld [vmem:[#allocation33 + $0x20] sm:$0xff]   ;;  %4624 = vmatprep.subr.bf16.mxu0 %v5809_v0 }
0x12dc   : > { %4589 = vmatmul.mubr.msk.bf16.vlgmr.msra.gmra.mrb[48].mxu1 %vm1949_vm4, %v2871_v39  ;;  %v4980_v40 = vld [vmem:[#allocation34 + $0x24] ss:$8 sps:$4 sm:$0xff]  }
0x12dd   : > { %4599 = vmatpush3.bf16.msra.mxu1 %v3001_v17  ;;  %4600 = vmatprep.mubr.msk.bf16.mxu1 %vm5810_vm0, %v5809_v0  ;;  %v2999_v45 = vpack.c.bf16 %v2998_v42, %v2997_v44  ;;  %v4978_v42 = vld [vmem:[#allocation34 + $0x20] ss:$8 sps:$4 sm:$0xff]   ;;  %v4983_v44 = vld [vmem:[#allocation34 + $0x34] ss:$8 sps:$4 sm:$0xff]  }
0x12de   : > { %4610 = vmatprep.subr.bf16.mxu1 %v5809_v0  ;;  %4625 = vmatpush3.bf16.msra.mxu0 %v4968_v10 }
0x12df   : > { %v5077_v48 = vpop.eup %5076  ;;  %4626 = vmatprep.subr.bf16.mxu0 %v5809_v0 }
0x12e0   : > { %v3124_v50 = vmul.f32 %v5077_v48, %v5061_v13  ;;  %v4989_v48 = vld [vmem:[#allocation34 + $0x54] ss:$8 sps:$4 sm:$0xff]  }
0x12e2   : > { %4627 = vmatpush3.bf16.msra.mxu0 %v4969_v11 }
0x12e3   : > { %4628 = vmatprep.subr.bf16.mxu0 %v5809_v0 }
0x12e4   : > { %4601 = vmatmul.mubr.msk.bf16.vlgmr.msra.gmra.mrb[52].mxu1 %vm1949_vm4, %v2999_v45  ;;  %v4981_v45 = vld [vmem:[#allocation34 + $0x30] ss:$8 sps:$4 sm:$0xff]  }
0x12e5   : > { %4612 = vmatprep.mubr.msk.bf16.mxu1 %vm5810_vm0, %v5809_v0 }
0x12e6   : > { %4629 = vmatpush3.bf16.msra.mxu0 %v4970_v54  ;;  %v4199_v54 = vld [vmem:[%s7015_s24] ss:$0 sm:$0xff] }
0x12e7   : > { %4630 = vmatprep.subr.bf16.mxu0 %v5809_v0  ;;  %v4190_v0 = vld [vmem:[%s7014_s8] ss:$0 sm:$0xff] }
0x12ea   : > { %4631 = vmatpush3.bf16.msra.mxu0 %v4971_v12 }
0x1303   : > { %v3121_v46 = vpop.xlane.xlu1 %3120 }
0x1304   : > { %5078 = vrcp.f32 %v3121_v46  ;;  %v4986_v46 = vld [vmem:[#allocation34 + $0x44] ss:$8 sps:$4 sm:$0xff]  }
0x1307   : > { %v3128_v47 = vpop.permute.xlu1 %3127 }
0x1308   : > { %4611 = vmatpush3.bf16.msra.mxu1 %v3128_v47  ;;  %v4984_v47 = vld [vmem:[#allocation34 + $0x40] ss:$8 sps:$4 sm:$0xff]  }
0x1309   : > { %3444 = vmatprep.subr.bf16.mxu1 %v4974_v32 }
0x130e   : > { %v5079_v49 = vpop.eup %5078 }
0x130f   : > { %v3125_v51 = vmul.f32 %v5079_v49, %v5067_v27  ;;  %v4987_v49 = vld [vmem:[#allocation34 + $0x50] ss:$8 sps:$4 sm:$0xff]  }
0x1311   : > { %v3126_v52 = vpack.c.bf16 %v3125_v51, %v3124_v50  ;;  %v4992_v50 = vld [vmem:[#allocation34 + $0x64] ss:$8 sps:$4 sm:$0xff]   ;;  %v4990_v51 = vld [vmem:[#allocation34 + $0x60] ss:$8 sps:$4 sm:$0xff]  }
0x1313   : > { %4613 = vmatmul.mubr.msk.bf16.vlgmr.msra.gmra.mrb[56].mxu1 %vm1949_vm4, %v3126_v52  ;;  %v4995_v52 = vld [vmem:[#allocation34 + $0x74] ss:$8 sps:$4 sm:$0xff]  }
0x1314   : > { %3445 = vmatpush1.bf16.msra.mxu1 %v4972_v33 }
0x1315   : > { %3446 = vmatprep.subr.bf16.mxu1 %v4977_v35 }
0x1318   : > { %3447 = vmatpush1.bf16.msra.mxu1 %v4975_v36 }
0x1319   : > { %3448 = vmatprep.subr.bf16.mxu1 %v4980_v40 }
0x131c   : > { %3449 = vmatpush1.bf16.msra.mxu1 %v4978_v42 }
0x131d   : > { %3450 = vmatprep.subr.bf16.mxu1 %v4983_v44 }
0x1320   : > { %3451 = vmatpush1.bf16.msra.mxu1 %v4981_v45 }
0x1321   : > { %3452 = vmatprep.subr.bf16.mxu1 %v4986_v46  ;;  %v4217_v46 = vld [vmem:[%s5961_s3] ss:$0 sm:$0xff] }
0x1324   : > { %3453 = vmatpush1.bf16.msra.mxu1 %v4984_v47 }
0x1325   : > { %3454 = vmatprep.subr.bf16.mxu1 %v4989_v48 }
0x1328   : > { %3455 = vmatpush1.bf16.msra.mxu1 %v4987_v49 }
0x1329   : > { %3456 = vmatprep.subr.bf16.mxu1 %v4992_v50 }
0x132c   : > { %3457 = vmatpush1.bf16.msra.mxu1 %v4990_v51 }
0x132d   : > { %3458 = vmatprep.subr.bf16.mxu1 %v4995_v52 }
0x1332   : > { %v2787_v53 = vpop.f32.mrb[44].mxu1 }
0x1333   : > { %v4578_v55 = vpop.f32.mrb[45].mxu1 }
0x1334   : > { %v2790_v56 = vpop.f32.mrb[46].mxu1  ;;  %v5814_v55 = vmov 0  }
0x1335   : > { %v2794_v57 = vpack.c.bf16 %v2790_v56, %v2787_v53  ;;  %v4579_v58 = vpop.f32.mrb[47].mxu1  ;;  %v4993_v53 = vld [vmem:[#allocation34 + $0x70] ss:$8 sps:$4 sm:$0xff]   ;;  %3476 = vmatprep.mubr.bf16.mxu1 %v5814_v55  ;;  %v4996_v56 = vld [vmem:[#allocation36 + $0x40] sm:$0xff]  }
0x1336   : > { %3459 = vmatpush1.bf16.msra.mxu1 %v4993_v53  ;;  %v4998_v58 = vld [vmem:[#allocation36 + $0x48] sm:$0xff]   ;;  %4358 = vmatprep.subr.bf16.mxu0 %v4996_v56 }
0x1337   : > { %2795 = vst.msk [vmem:[#allocation6] sm:$0xff] %vm1901_vm1, %v2794_v57  ;;  %v4997_v57 = vld [vmem:[#allocation36] sm:$0xff]  }
0x13af   : > { %v2913_v59 = vpop.f32.mrb[48].mxu1 }
0x13b0   : > { %v4590_v61 = vpop.f32.mrb[49].mxu1 }
0x13b1   : > { %v2916_v62 = vpop.f32.mrb[50].mxu1  ;;  %v5001_v61 = vld [vmem:[#allocation36 + $0x10] sm:$0xff]  }
0x13b2   : > { %v2920_v63 = vpack.c.bf16 %v2916_v62, %v2913_v59  ;;  %v4591_v2 = vpop.f32.mrb[51].mxu1  ;;  %v4999_v59 = vld [vmem:[#allocation36 + $0x8] sm:$0xff]   ;;  %v5002_v62 = vld [vmem:[#allocation36 + $0x58] sm:$0xff]  }
0x13b3   : > { %v5005_v2 = vld [vmem:[#allocation36 + $0x20] sm:$0xff]  }
0x13b4   : > { %2922 = vrot.lane.b32.xlu1 %v2920_v63, %s5813_s25  ;;  %v5004_v63 = vld [vmem:[#allocation36 + $0x60] sm:$0xff]  }
0x13b7   : > { %v3040_v3 = vpop.f32.mrb[52].mxu1 }
0x13b8   : > { %v4602_v4 = vpop.f32.mrb[53].mxu1 }
0x13b9   : > { %v3043_v5 = vpop.f32.mrb[54].mxu1 }
0x13ba   : > { %v3047_v7 = vpack.c.bf16 %v3043_v5, %v3040_v3  ;;  %v4603_v9 = vpop.f32.mrb[55].mxu1 }
0x13bc   : > { %3049 = vrot.lane.b32.xlu0 %v3047_v7, %s5812_s21  ;;  %s5634_s21 = sshll.u32 %s5815_s11, 4  ;;  %s5635_s21 = int_to_ptr.vmem [resolvable:$false] %s5634_s21 }
0x13bd   : > { %s5636_s25 = scalar_lea.vmem %s5635_s21, 512  ;;  %p5637_p7 = scmp.lt.s32.totalorder %s6827_s13, %s5635_s21 }
0x13e6   : > { %v3167_v13 = vpop.f32.mrb[56].mxu1 }
0x13e7   : > { %v4614_v14 = vpop.f32.mrb[57].mxu1 }
0x13e8   : > { %v3170_v15 = vpop.f32.mrb[58].mxu1 }
0x13e9   : > { %v3174_v16 = vpack.c.bf16 %v3170_v15, %v3167_v13  ;;  %v4615_v18 = vpop.f32.mrb[59].mxu1  ;;  %v4200_v15 = vld [vmem:[%s7016_s14] ss:$0 sm:$0xff] }
0x13eb   : > { %3176 = vrot.lane.b32.xlu1 %v3174_v16, %s5811_s10  ;;  %s5630_s10 = scalar_lea.vmem %s6827_s13, 256 }
0x13ec   : > { %p5631_p13 = scmp.ne.s32.totalorder %s6827_s13, %s5630_s10  ;;  %p5638_p1 = scmp.lt.s32.totalorder %s5636_s25, %s5630_s10 }
0x13ee   : > { %p5632_p10 = pnand %p5631_p13, %p7023_p4  ;;  %p5639_p2 = por %p5638_p1, %p5637_p7 }
0x13f0   : > { %p5633_p5 = pneg %p5632_p10 }
0x13f2   : > { %p5640_p3 = pnand %p5639_p2, %p5633_p5 }
0x1426   : > { %v2923_v19 = vpop.permute.xlu1 %2922 }
0x1427   : > { %2925 = vst.msk [vmem:[#allocation6] sm:$0xff] %vm2148_vm5, %v2923_v19 }
0x142e   : > { %v3050_v20 = vpop.permute.xlu0 %3049 }
0x142f   : > { %3052 = vst.msk [vmem:[#allocation6] sm:$0xff] %vm2276_vm6, %v3050_v20 }
0x145d   : > { %v3177_v21 = vpop.permute.xlu1 %3176 }
0x145e   : > { %3179 = vst.msk [vmem:[#allocation6] sm:$0xff] %vm2404_vm7, %v3177_v21  ;;  %v5007_v21 = vld [vmem:[#allocation36 + $0x28] sm:$0xff]  }
0x1465   : > { %v3180_v22 = vld [vmem:[#allocation6] sm:$0xff] }
0x1466   : > { %4633 = vmatmul.mubr.bf16.vlgmr.msra.gmra.mrb[32].mxu0 %v3180_v22  ;;  %v5008_v22 = vld [vmem:[#allocation36 + $0x70] sm:$0xff]  }
0x1467   : > { %4359 = vmatpush3.bf16.msra.mxu0 %v4997_v57 }
0x1468   : > { %4360 = vmatprep.subr.bf16.mxu0 %v4998_v58 }
0x146b   : > { %4361 = vmatpush3.bf16.msra.mxu0 %v4999_v59 }
0x146c   : > { %4362 = vmatprep.subr.bf16.mxu0 %v5000_v60 }
0x146f   : > { %4363 = vmatpush3.bf16.msra.mxu0 %v5001_v61 }
0x1470   : > { %4364 = vmatprep.subr.bf16.mxu0 %v5002_v62 }
0x1473   : > { %4365 = vmatpush3.bf16.msra.mxu0 %v5003_v8 }
0x1474   : > { %4366 = vmatprep.subr.bf16.mxu0 %v5004_v63 }
0x1477   : > { %4367 = vmatpush3.bf16.msra.mxu0 %v5005_v2 }
0x1478   : > { %4368 = vmatprep.subr.bf16.mxu0 %v5006_v26 }
0x147b   : > { %4369 = vmatpush3.bf16.msra.mxu0 %v5007_v21 }
0x147c   : > { %4370 = vmatprep.subr.bf16.mxu0 %v5008_v22 }
0x1539   : > { %v3286_v23 = vpop.f32.mrb[32].mxu0 }
0x153a   : > { %v3287_v24 = vadd.f32 %v4190_v0, %v3286_v23  ;;  %v4634_v25 = vpop.f32.mrb[33].mxu0  ;;  %v5010_v23 = vld [vmem:[#allocation36 + $0x78] sm:$0xff]  }
0x153b   : > { %v3289_v27 = vpop.f32.mrb[34].mxu0  ;;  %v3354_v25 = vlaneseq }
0x153c   : > { %v3290_v28 = vadd.f32 %v4190_v0, %v3289_v27  ;;  %v4635_v29 = vpop.f32.mrb[35].mxu0  ;;  %v3293_v30 = vadd.f32 %v3287_v24, %v6715_v1  ;;  %v5009_v0 = vld [vmem:[#allocation36 + $0x30] sm:$0xff]   ;;  %v5011_v24 = vld [vmem:[#allocation36 + $0x38] sm:$0xff]  }
0x153d   : > { %4371 = vmatpush3.bf16.msra.mxu0 %v5009_v0  ;;  %v3355_v27 = vshrl.u32 %v3354_v25, 7  ;;  %v3352_v29 = vld [vmem:[%s7017_s17] sm:$0x3] }
0x153e   : > { %3295 = vadd.xlane.f32.xlu0 %v3293_v30  ;;  %v3294_v31 = vadd.f32 %v3290_v28, %v6717_v43  ;;  %4372 = vmatprep.subr.bf16.mxu0 %v5010_v23 }
0x153f   : > { %v3356_v28 = vsub.s32 0, %v3355_v27 }
0x1540   : > { %3297 = vadd.xlane.f32.xlu1 %v3294_v31 }
0x1541   : > { %4373 = vmatpush3.bf16.msra.mxu0 %v5011_v24 }
0x15cb   : > { %v3296_v34 = vpop.xlane.xlu0 %3295 }
0x15cc   : > { %v3299_v37 = vmul.f32 0.0078125, %v3296_v34 }
0x15cd   : > { %v3298_v38 = vpop.xlane.xlu1 %3297 }
0x15ce   : > { %v6806_v39 = vsub.f32 %v3293_v30, %v3299_v37  ;;  %v3300_v41 = vmul.f32 0.0078125, %v3298_v38  ;;  %v3360_v30 = vsub.s32 1, %v3355_v27 }
0x15d0   : > { %v6808_v17 = vsub.f32 %v3294_v31, %v3300_v41  ;;  %v3303_v1 = vmul.f32 %v6806_v39, %v6806_v39  ;;  %v3357_v31 = vrot.slane %v3352_v29, %v3356_v28  ;;  %v3361_v33 = vrot.slane %v3352_v29, %v3360_v30 }
0x15d2   : > { %3305 = vadd.xlane.f32.xlu0 %v3303_v1  ;;  %v3304_v43 = vmul.f32 %v6808_v17, %v6808_v17 }
0x15d6   : > { %3307 = vadd.xlane.f32.xlu0 %v3304_v43 }
0x165f   : > { %v3306_v3 = vpop.xlane.xlu0 %3305 }
0x1660   : > { %v3309_v4 = vmul.f32 0.0078125, %v3306_v3 }
0x1662   : > { %v3311_v5 = vadd.f32 1e-12, %v3309_v4 }
0x1663   : > { %v3308_v6 = vpop.xlane.xlu0 %3307 }
0x1664   : > { %5080 = vrsqrt.f32 %v3311_v5  ;;  %v3310_v7 = vmul.f32 0.0078125, %v3308_v6 }
0x1666   : > { %v3312_v9 = vadd.f32 1e-12, %v3310_v7 }
0x1668   : > { %5082 = vrsqrt.f32 %v3312_v9  ;;  %v4234_v9 = vld [vmem:[%s7018_s28] ss:$0 sm:$0xff] }
0x166e   : > { %v5081_v10 = vpop.eup %5080 }
0x166f   : > { %v3315_v11 = vmul.f32 %v5081_v10, %v6806_v39 }
0x1671   : > { %v3324_v14 = vmul.f32 %v4199_v54, %v3315_v11 }
0x1672   : > { %v5083_v12 = vpop.eup %5082 }
0x1673   : > { %v3316_v13 = vmul.f32 %v5083_v12, %v6808_v17  ;;  %v3333_v18 = vadd.f32 %v4200_v15, %v3324_v14 }
0x1675   : > { %v3325_v16 = vmul.f32 %v4199_v54, %v3316_v13  ;;  %v4235_v54 = vld [vmem:[%s7019_s9] ss:$0 sm:$0xff] }
0x1677   : > { %v3334_v19 = vadd.f32 %v4200_v15, %v3325_v16 }
0x1679   : > { %v3351_v20 = vpack.c.bf16 %v3334_v19, %v3333_v18 }
0x167b   : > { %3477 = vmatmul.mubr.bf16.vlgmr.msra.gmra.mrb[60].mxu1 %v3351_v20 }
0x174e   : > { %v3478_v32 = vpop.f32.mrb[60].mxu1 }
0x174f   : > { %v3479_v35 = vadd.f32 %v3478_v32, %v3357_v31  ;;  %v3480_v36 = vpop.f32.mrb[61].mxu1 }
0x1750   : > { %v3481_v34 = vadd.f32 %v3480_v36, %v3361_v33  ;;  %v3482_v37 = vpop.f32.mrb[62].mxu1 }
0x1751   : > { %v3483_v38 = vadd.f32 %v3482_v37, %v3357_v31  ;;  %v3484_v39 = vpop.f32.mrb[63].mxu1  ;;  %v3487_v17 = vmax.f32 %v3479_v35, 0.0 }
0x1752   : > { %v3485_v41 = vadd.f32 %v3484_v39, %v3361_v33  ;;  %v3488_v43 = vmax.f32 %v3481_v34, 0.0 }
0x1753   : > { %v3489_v1 = vmax.f32 %v3483_v38, 0.0 }
0x1754   : > { %v3490_v40 = vmax.f32 %v3485_v41, 0.0 }
0x1755   : > { %v3523_v42 = vpack.c.bf16 %v3489_v1, %v3487_v17 }
0x1756   : > { %v3524_v44 = vpack.c.bf16 %v3490_v40, %v3488_v43 }
0x1758   : > { %3660 = vmatprep.mubr.bf16.mxu0 %v3524_v44 }
0x1759   : > { %3661 = vmatmul.mubr.bf16.vlgmr.msra.gmra.mrb[36].mxu0 %v3523_v42 }
0x182c   : > { %v4374_v45 = vpop.f32.mrb[36].mxu0 }
0x182d   : > { %v4375_v47 = vpop.f32.mrb[37].mxu0 }
0x182e   : > { %v4376_v48 = vadd.f32 %v4375_v47, %v4374_v45  ;;  %v4377_v49 = vpop.f32.mrb[38].mxu0 }
0x182f   : > { %v4378_v50 = vpop.f32.mrb[39].mxu0 }
0x1830   : > { %v3663_v51 = vadd.f32 %v4376_v48, %v4217_v46  ;;  %v4379_v52 = vadd.f32 %v4378_v50, %v4377_v49 }
0x1832   : > { %v3666_v53 = vadd.f32 %v4379_v52, %v4217_v46  ;;  %v3669_v55 = vadd.f32 %v3663_v51, %v3333_v18 }
0x1834   : > { %3671 = vadd.xlane.f32.xlu0 %v3669_v55  ;;  %v3670_v56 = vadd.f32 %v3666_v53, %v3334_v19 }
0x1836   : > { %3673 = vadd.xlane.f32.xlu1 %v3670_v56 }
0x18c1   : > { %v3672_v57 = vpop.xlane.xlu0 %3671 }
0x18c2   : > { %v3675_v58 = vmul.f32 0.0078125, %v3672_v57 }
0x18c3   : > { %v3674_v59 = vpop.xlane.xlu1 %3673 }
0x18c4   : > { %v3677_v60 = vsub.f32 %v3669_v55, %v3675_v58  ;;  %v3676_v61 = vmul.f32 0.0078125, %v3674_v59 }
0x18c6   : > { %v3678_v62 = vsub.f32 %v3670_v56, %v3676_v61  ;;  %v3679_v8 = vmul.f32 %v3677_v60, %v3677_v60 }
0x18c8   : > { %3681 = vadd.xlane.f32.xlu0 %v3679_v8  ;;  %v3680_v63 = vmul.f32 %v3678_v62, %v3678_v62 }
0x18ca   : > { %3683 = vadd.xlane.f32.xlu1 %v3680_v63 }
0x1955   : > { %v3682_v2 = vpop.xlane.xlu0 %3681 }
0x1956   : > { %v3685_v26 = vmul.f32 0.0078125, %v3682_v2 }
0x1957   : > { %v3684_v3 = vpop.xlane.xlu1 %3683 }
0x1958   : > { %v3687_v4 = vadd.f32 1e-12, %v3685_v26  ;;  %v3686_v5 = vmul.f32 0.0078125, %v3684_v3 }
0x195a   : > { %5084 = vrsqrt.f32 %v3687_v4  ;;  %v3688_v6 = vadd.f32 1e-12, %v3686_v5 }
0x195c   : > { %5086 = vrsqrt.f32 %v3688_v6 }
0x1964   : > { %v5085_v7 = vpop.eup %5084 }
0x1965   : > { %v3691_v10 = vmul.f32 %v5085_v7, %v3677_v60 }
0x1966   : > { %v5087_v11 = vpop.eup %5086 }
0x1967   : > { %v3700_v12 = vmul.f32 %v4234_v9, %v3691_v10  ;;  %v3692_v13 = vmul.f32 %v5087_v11, %v3678_v62 }
0x1969   : > { %v3709_v14 = vadd.f32 %v4235_v54, %v3700_v12  ;;  %v3701_v15 = vmul.f32 %v4234_v9, %v3692_v13 }
0x196b   : > { %v3710_v16 = vadd.f32 %v4235_v54, %v3701_v15  ;;  %3711 = vst [vmem:[%s1284_s5] sm:$0xff] %v3709_v14 }
0x196d   : > { %3712 = vst [vmem:[%s1284_s5 + $0x8] sm:$0xff] %v3710_v16 }
0x196e   : > { %5643 = shalt.err (!%p5640_p3)
}
0x196f   : > { %s5644_s8 = scalar_lea.hbm %s6825_s29, 256  ;;  %s5648_s24 = scalar_lea.hbm %s7022_s19, 512 }
0x1970   : > { %p5645_p11 = scmp.ne.s32.totalorder %s6825_s29, %s5644_s8  ;;  %p5649_p9 = scmp.lt.u32.totalorder %s6825_s29, %s7022_s19 }
0x1971   : > { %p5650_p0 = scmp.lt.u32.totalorder %s5648_s24, %s5644_s8  ;;  %p5652_p13 = scmp.lt.u32.totalorder %s5644_s8, %s6825_s29 }
0x1972   : > { %p5646_p12 = pnand %p5645_p11, %p7023_p4 }
0x1973   : > { %p5651_p8 = por %p5650_p0, %p5649_p9 }
0x1974   : > { %p5647_p6 = pneg %p5646_p12 }
0x1975   : > { %p5653_p10 = por %p5652_p13, %p5651_p8 }
0x1977   : > { %p5654_p5 = pnand %p5653_p10, %p5647_p6 }
0x1979   : > { %5657 = shalt.err (!%p5654_p5)
}
0x197a   : > { %s5816_s14 = smov 128   ;;  %s5817_s17 = smov 8  }
0x197b   : > { %4704 = dma.vmem_to_hbm [thread:$0]  (%p7023_p4), %s6827_s13, 256, %s6825_s29, %s3714_s1, %s5816_s14, %s5816_s14, %s5817_s17  }
0x197c PF: > { %s3744_s28 = sand.u32 1, %s5732_s15   ;;  %p7024_p7 = scmp.ne.s32.totalorder %s6973_s4, 0 }
0x197d   : > { %p7025_p1 = scmp.ge.s32.totalorder %s5752_s23, 2  ;;  %s3745_s9 = scalar_lea.sflag [#allocation9], %s3744_s28 }
0x197f   : > { %p4766_p2 = pnand %p7025_p1, %p7024_p7 }
0x1981   : > { %5727 = dma.done.wait (!%p4766_p2), %s3745_s9, 256  }
0x1982   : > { %5729 = vsyncadd (!%p4766_p2), %s3745_s9, 4294967040  ;;  %s90_s23 = sadd.s32 1, %s5752_s23   ;;  %s7026_s7 = sld [smem:[#allocation79_spill]] }
0x1983   : > { %p87_p3 = scmp.ge.s32.totalorder %s90_s23, 4   ;;  %s7027_s0 = sld [smem:[#allocation82_spill]] }
0x1984   : > { %s7028_s2 = sld [smem:[#allocation81_spill]]  ;;  %s7029_s15 = smov %s5736_s16 }
0x1985   : > { %s7031_s18 = smov %s5748_s22  ;;  %89 = sbr.rel (!%p87_p3) target bundleno = 84 (0x54), region = 319 }
0x1988   : > { %s7030_s16 = smov %s7026_s7 }
0x198a   : > { %s7032_s22 = smov %s7028_s2 }
0x198c   :  { %3750 = vsyncpa [#allocation8], 1 }
0x198d   :  { %3752 = vsyncpa [#allocation8 + $0x1], 1 }
0x198e   :  { %3753 = vsyncpa [#allocation11], 1 }
0x198f   :  { %3755 = vsyncpa [#allocation11 + $0x1], 1 }
0x1990   :  { %3756 = vsyncpa [#allocation14], 1 }
0x1991   :  { %3758 = vsyncpa [#allocation14 + $0x1], 1 }
0x1992   :  { %3759 = vsyncpa [#allocation17], 1 }
0x1993   :  { %3760 = vsyncpa [#allocation20], 1 }
0x1994   :  { %3761 = vsyncpa [#allocation23], 1 }
0x1995   :  { %3762 = vsyncpa [#allocation26], 1 }
0x1996   :  { %3763 = vsyncpa [#allocation29], 1 }
0x1997   :  { %3764 = vsyncpa [#allocation32], 1 }
0x1998   :  { %3765 = vsyncpa [#allocation35], 1 }
0x1999   :  { %3766 = vsyncpa [#allocation9], 1 }
0x199a   :  { %3768 = vsyncpa [#allocation9 + $0x1], 1 }

</bundles_post_ra>
